<compile_context>
chip_gen: v7x
topology: tpu7x:2x2x1
jax: 0.10.0
libtpu: 0.0.40
codegen_flags: <defaults>
</compile_context>

<pallas_src>
import functools
import math

import jax
import jax.numpy as jnp
from jax import lax
from jax.experimental import pallas as pl
from jax.experimental.pallas import tpu as pltpu

_MASK_VALUE = -1e30  # large-finite stand-in for -inf (identical after softmax)


# ---------------------------------------------------------------------------
# Pallas kernels
# ---------------------------------------------------------------------------
def _layernorm_kernel(x_ref, g_ref, b_ref, o_ref, *, eps):
    x = x_ref[...].astype(jnp.float32)
    mean = jnp.mean(x, axis=-1, keepdims=True)
    xc = x - mean
    var = jnp.mean(xc * xc, axis=-1, keepdims=True)
    inv = lax.rsqrt(var + eps)
    o_ref[...] = ((xc * inv) * g_ref[...] + b_ref[...]).astype(o_ref.dtype)


def layernorm(x, gamma, beta, eps=1e-5):
    """LayerNorm over the last dim; x: (..., D)."""
    orig_shape = x.shape
    D = orig_shape[-1]
    x2 = x.reshape(-1, D).astype(jnp.float32)
    M = x2.shape[0]
    out = pl.pallas_call(
        functools.partial(_layernorm_kernel, eps=eps),
        out_shape=jax.ShapeDtypeStruct((M, D), jnp.float32),
        grid=(1,),
        in_specs=[pl.BlockSpec((M, D), lambda i: (0, 0)),
                  pl.BlockSpec((1, D), lambda i: (0, 0)),
                  pl.BlockSpec((1, D), lambda i: (0, 0))],
        out_specs=pl.BlockSpec((M, D), lambda i: (0, 0)),
    )(x2, gamma.reshape(1, D), beta.reshape(1, D))
    return out.reshape(orig_shape)


def _linear_kernel(x_ref, w_ref, b_ref, o_ref, *, activation):
    y = jnp.dot(x_ref[...], w_ref[...], preferred_element_type=jnp.float32)
    y = y + b_ref[...]
    if activation == "quickgelu":          # x * sigmoid(1.702 x)
        y = y * (1.0 / (1.0 + jnp.exp(-1.702 * y)))
    o_ref[...] = y.astype(o_ref.dtype)


def linear(x, w, b=None, activation="none"):
    """y = act(x @ w + b).  x: (M, K), w: (K, N), b: (N,) or None."""
    M, K = x.shape
    N = w.shape[1]
    if b is None:
        b = jnp.zeros((N,), jnp.float32)
    return pl.pallas_call(
        functools.partial(_linear_kernel, activation=activation),
        out_shape=jax.ShapeDtypeStruct((M, N), jnp.float32),
        grid=(1,),
        in_specs=[pl.BlockSpec((M, K), lambda i: (0, 0)),
                  pl.BlockSpec((K, N), lambda i: (0, 0)),
                  pl.BlockSpec((1, N), lambda i: (0, 0))],
        out_specs=pl.BlockSpec((M, N), lambda i: (0, 0)),
    )(x.astype(jnp.float32), w.astype(jnp.float32), b.reshape(1, N))


def _mha_kernel(q_ref, k_ref, v_ref, mask_ref, o_ref, *, scale):
    q = q_ref[0]                                           # (L, Dh)
    k = k_ref[0]
    v = v_ref[0]
    s = lax.dot_general(q, k, (((1,), (1,)), ((), ())),
                        preferred_element_type=jnp.float32) * scale
    s = s + mask_ref[...]
    s = s - jnp.max(s, axis=-1, keepdims=True)
    p = jnp.exp(s)
    p = p / jnp.sum(p, axis=-1, keepdims=True)
    o_ref[0] = jnp.dot(p, v, preferred_element_type=jnp.float32)


def mha_core(q, k, v, mask, scale):
    """q/k/v: (B*H, L, Dh); mask: (L, L) additive, broadcast over batch*heads."""
    BH, L, Dh = q.shape
    return pl.pallas_call(
        functools.partial(_mha_kernel, scale=scale),
        out_shape=jax.ShapeDtypeStruct((BH, L, Dh), jnp.float32),
        grid=(BH,),
        in_specs=[pl.BlockSpec((1, L, Dh), lambda i: (i, 0, 0)),
                  pl.BlockSpec((1, L, Dh), lambda i: (i, 0, 0)),
                  pl.BlockSpec((1, L, Dh), lambda i: (i, 0, 0)),
                  pl.BlockSpec((L, L), lambda i: (0, 0))],
        out_specs=pl.BlockSpec((1, L, Dh), lambda i: (i, 0, 0)),
        compiler_params=pltpu.CompilerParams(dimension_semantics=("parallel",)),
    )(q, k, v, mask)


def _logits_kernel(scale_ref, img_ref, txt_ref, o_ref):
    img = img_ref[...]
    txt = txt_ref[...]
    img = img * lax.rsqrt(jnp.sum(img * img, axis=-1, keepdims=True))
    txt = txt * lax.rsqrt(jnp.sum(txt * txt, axis=-1, keepdims=True))
    logits = lax.dot_general(img, txt, (((1,), (1,)), ((), ())),
                             preferred_element_type=jnp.float32)
    o_ref[...] = scale_ref[0] * logits


def clip_logits(image_features, text_features, logit_scale):
    B, E = image_features.shape
    Bt = text_features.shape[0]
    scale = jnp.exp(logit_scale).reshape(1).astype(jnp.float32)
    return pl.pallas_call(
        _logits_kernel,
        out_shape=jax.ShapeDtypeStruct((B, Bt), jnp.float32),
        grid=(1,),
        in_specs=[pl.BlockSpec(memory_space=pltpu.MemorySpace.SMEM),
                  pl.BlockSpec((B, E), lambda i: (0, 0)),
                  pl.BlockSpec((Bt, E), lambda i: (0, 0))],
        out_specs=pl.BlockSpec((B, Bt), lambda i: (0, 0)),
    )(scale, image_features, text_features)


# ---------------------------------------------------------------------------
# Model forward (wrappers around the kernels)
# ---------------------------------------------------------------------------
def _residual_attention_block(x, p, n_head, attn_mask):
    B, L, D = x.shape
    Dh = D // n_head
    y = layernorm(x, p["ln_1_g"], p["ln_1_b"])
    qkv = linear(y.reshape(B * L, D), p["in_proj_w"], p["in_proj_b"])
    q, k, v = jnp.split(qkv.reshape(B, L, 3 * D), 3, axis=-1)

    def heads(t):
        return t.reshape(B, L, n_head, Dh).transpose(0, 2, 1, 3).reshape(B * n_head, L, Dh)

    o = mha_core(heads(q), heads(k), heads(v), attn_mask, scale=1.0 / math.sqrt(Dh))
    o = o.reshape(B, n_head, L, Dh).transpose(0, 2, 1, 3).reshape(B * L, D)
    x = x + linear(o, p["out_proj_w"], p["out_proj_b"]).reshape(B, L, D)

    y = layernorm(x, p["ln_2_g"], p["ln_2_b"])
    h = linear(y.reshape(B * L, D), p["c_fc_w"], p["c_fc_b"], activation="quickgelu")
    h = linear(h, p["c_proj_w"], p["c_proj_b"]).reshape(B, L, D)
    return x + h


def _encode_image(v, image, heads, patch_size):
    B, C, H, W = image.shape
    gh, gw = H // patch_size, W // patch_size
    Dv = v["conv1_w"].shape[1]
    # conv1 (kernel == stride, no bias) == non-overlapping patchify + matmul.
    patches = image.reshape(B, C, gh, patch_size, gw, patch_size)
    patches = patches.transpose(0, 2, 4, 1, 3, 5).reshape(B * gh * gw, C * patch_size * patch_size)
    x = linear(patches, v["conv1_w"]).reshape(B, gh * gw, Dv)
    cls = jnp.broadcast_to(v["class_embedding"].reshape(1, 1, Dv), (B, 1, Dv))
    x = jnp.concatenate([cls, x], axis=1) + v["positional_embedding"][None]
    x = layernorm(x, v["ln_pre_g"], v["ln_pre_b"])
    L = x.shape[1]
    no_mask = jnp.zeros((L, L), jnp.float32)
    for blk in v["blocks"]:
        x = _residual_attention_block(x, blk, heads, no_mask)
    x = layernorm(x[:, 0, :], v["ln_post_g"], v["ln_post_b"])
    return linear(x, v["proj"])


def _encode_text(t, text, token, heads):
    x = text.astype(jnp.float32) + t["positional_embedding"][None]
    for blk in t["blocks"]:
        x = _residual_attention_block(x, blk, heads, t["attn_mask"])
    x = layernorm(x, t["ln_final_g"], t["ln_final_b"])
    B = x.shape[0]
    # TODO(synk): EOT-token gather (x[arange(B), token.argmax(-1)]) is a tiny
    # dynamic gather left to XLA.
    x = x[jnp.arange(B), jnp.argmax(token, axis=-1)]
    return linear(x, t["text_projection"])


@functools.partial(jax.jit,
                   static_argnames=("vision_heads", "vision_patch_size", "text_heads"))
def clip_forward(params, image, text, token, *, vision_heads, vision_patch_size,
                 text_heads):
    image_features = _encode_image(params["visual"], image, vision_heads, vision_patch_size)
    text_features = _encode_text(params["text"], text, token, text_heads)
    logits_per_image = clip_logits(image_features, text_features, params["logit_scale"])
    return logits_per_image, logits_per_image.T


# ---------------------------------------------------------------------------
# Parameters (arrays only, so the whole dict is a clean jit pytree)
# ---------------------------------------------------------------------------
def build_params(key, *, embed_dim, image_resolution, vision_layers, vision_width,
                 vision_patch_size, context_length, vocab_size, transformer_width,
                 transformer_heads, transformer_layers):
    del transformer_heads  # head counts are static call args
    keys = iter(jax.random.split(key, 128))

    def nrm(shape, std):
        return std * jax.random.normal(next(keys), shape, jnp.float32)

    def make_block(width, layers):
        attn_std = width ** -0.5
        proj_std = (width ** -0.5) * ((2 * layers) ** -0.5)
        fc_std = (2 * width) ** -0.5
        return dict(
            ln_1_g=jnp.ones((width,), jnp.float32),
            ln_1_b=jnp.zeros((width,), jnp.float32),
            in_proj_w=nrm((width, 3 * width), attn_std),   # stored (D, 3D) = W^T
            in_proj_b=jnp.zeros((3 * width,), jnp.float32),
            out_proj_w=nrm((width, width), proj_std),
            out_proj_b=jnp.zeros((width,), jnp.float32),
            ln_2_g=jnp.ones((width,), jnp.float32),
            ln_2_b=jnp.zeros((width,), jnp.float32),
            c_fc_w=nrm((width, 4 * width), fc_std),
            c_fc_b=jnp.zeros((4 * width,), jnp.float32),
            c_proj_w=nrm((4 * width, width), proj_std),
            c_proj_b=jnp.zeros((width,), jnp.float32),
        )

    grid = image_resolution // vision_patch_size
    n_tok = grid * grid + 1
    vscale = vision_width ** -0.5
    patch_dim = 3 * vision_patch_size * vision_patch_size
    visual = dict(
        conv1_w=nrm((patch_dim, vision_width), patch_dim ** -0.5),
        class_embedding=nrm((vision_width,), vscale),
        positional_embedding=nrm((n_tok, vision_width), vscale),
        ln_pre_g=jnp.ones((vision_width,), jnp.float32),
        ln_pre_b=jnp.zeros((vision_width,), jnp.float32),
        blocks=[make_block(vision_width, vision_layers) for _ in range(vision_layers)],
        ln_post_g=jnp.ones((vision_width,), jnp.float32),
        ln_post_b=jnp.zeros((vision_width,), jnp.float32),
        proj=nrm((vision_width, embed_dim), vscale),
    )

    # build_attention_mask(): additive causal mask (large-negative above diagonal).
    causal = jnp.triu(jnp.full((context_length, context_length), _MASK_VALUE,
                               jnp.float32), k=1)
    text = dict(
        token_embedding=nrm((vocab_size, transformer_width), 0.02),
        positional_embedding=nrm((context_length, transformer_width), 0.01),
        blocks=[make_block(transformer_width, transformer_layers)
                for _ in range(transformer_layers)],
        ln_final_g=jnp.ones((transformer_width,), jnp.float32),
        ln_final_b=jnp.zeros((transformer_width,), jnp.float32),
        text_projection=nrm((transformer_width, embed_dim), transformer_width ** -0.5),
        attn_mask=causal,
    )
    return dict(visual=visual, text=text,
                logit_scale=jnp.array(math.log(1.0 / 0.07), jnp.float32))


# ---------------------------------------------------------------------------
# Pure-JAX reference (mirrors the PyTorch module's math exactly, in f32)
# ---------------------------------------------------------------------------
def _ref_layernorm(x, g, b, eps=1e-5):
    x = x.astype(jnp.float32)
    m = jnp.mean(x, axis=-1, keepdims=True)
    v = jnp.mean((x - m) ** 2, axis=-1, keepdims=True)
    return (x - m) / jnp.sqrt(v + eps) * g + b


def _ref_block(x, p, n_head, mask):
    B, L, D = x.shape
    Dh = D // n_head
    y = _ref_layernorm(x, p["ln_1_g"], p["ln_1_b"])
    qkv = y @ p["in_proj_w"] + p["in_proj_b"]
    q, k, v = jnp.split(qkv, 3, axis=-1)

    def heads(t):
        return t.reshape(B, L, n_head, Dh).transpose(0, 2, 1, 3)

    q, k, v = heads(q), heads(k), heads(v)
    s = jnp.einsum("bhqd,bhkd->bhqk", q, k) / math.sqrt(Dh) + mask
    a = jax.nn.softmax(s, axis=-1)
    o = jnp.einsum("bhqk,bhkd->bhqd", a, v).transpose(0, 2, 1, 3).reshape(B, L, D)
    x = x + o @ p["out_proj_w"] + p["out_proj_b"]
    y = _ref_layernorm(x, p["ln_2_g"], p["ln_2_b"])
    h = y @ p["c_fc_w"] + p["c_fc_b"]
    h = h * jax.nn.sigmoid(1.702 * h)
    return x + h @ p["c_proj_w"] + p["c_proj_b"]


def clip_forward_reference(params, image, text, token, *, vision_heads,
                           vision_patch_size, text_heads):
    v = params["visual"]
    B, C, H, W = image.shape
    gh, gw = H // vision_patch_size, W // vision_patch_size
    Dv = v["conv1_w"].shape[1]
    patches = image.reshape(B, C, gh, vision_patch_size, gw, vision_patch_size)
    patches = patches.transpose(0, 2, 4, 1, 3, 5).reshape(B, gh * gw, -1)
    x = patches @ v["conv1_w"]
    cls = jnp.broadcast_to(v["class_embedding"].reshape(1, 1, Dv), (B, 1, Dv))
    x = jnp.concatenate([cls, x], axis=1) + v["positional_embedding"][None]
    x = _ref_layernorm(x, v["ln_pre_g"], v["ln_pre_b"])
    zero_mask = jnp.zeros((x.shape[1], x.shape[1]), jnp.float32)
    for blk in v["blocks"]:
        x = _ref_block(x, blk, vision_heads, zero_mask)
    x = _ref_layernorm(x[:, 0, :], v["ln_post_g"], v["ln_post_b"])
    img = x @ v["proj"]

    t = params["text"]
    x = text.astype(jnp.float32) + t["positional_embedding"][None]
    for blk in t["blocks"]:
        x = _ref_block(x, blk, text_heads, t["attn_mask"])
    x = _ref_layernorm(x, t["ln_final_g"], t["ln_final_b"])
    x = x[jnp.arange(x.shape[0]), jnp.argmax(token, axis=-1)]
    txt = x @ t["text_projection"]

    img = img / jnp.linalg.norm(img, axis=1, keepdims=True)
    txt = txt / jnp.linalg.norm(txt, axis=1, keepdims=True)
    li = jnp.exp(params["logit_scale"]) * img @ txt.T
    return li, li.T


# ---------------------------------------------------------------------------
if __name__ == "__main__":
    cfg = dict(embed_dim=32, image_resolution=32, vision_layers=2, vision_width=64,
               vision_patch_size=8, context_length=8, vocab_size=64,
               transformer_width=64, transformer_heads=2, transformer_layers=2)
    vision_heads = cfg["vision_width"] // 64          # as in CLIP.__init__ (ViT branch)

    key = jax.random.PRNGKey(0)
    kp, ki, kt = jax.random.split(key, 3)
    params = build_params(kp, **cfg)

    B = 2
    image = jax.random.normal(
        ki, (B, 3, cfg["image_resolution"], cfg["image_resolution"]), jnp.float32)
    token = jax.random.randint(kt, (B, cfg["context_length"]), 1, cfg["vocab_size"])
    # encode_token(): token-embedding lookup feeding encode_text (tiny gather).
    text = params["text"]["token_embedding"][token]   # (B, L, transformer_width)

    logits_per_image, logits_per_text = clip_forward(
        params, image, text, token,
        vision_heads=vision_heads,
        vision_patch_size=cfg["vision_patch_size"],
        text_heads=cfg["transformer_heads"])
    logits_per_image = jax.block_until_ready(logits_per_image)

    assert logits_per_image.shape == (B, B)
    assert logits_per_text.shape == (B, B)
    assert bool(jnp.all(jnp.isfinite(logits_per_image)))

    ref_li, ref_lt = clip_forward_reference(
        params, image, text, token,
        vision_heads=vision_heads,
        vision_patch_size=cfg["vision_patch_size"],
        text_heads=cfg["transformer_heads"])
    err = float(jnp.max(jnp.abs(logits_per_image - ref_li)))
    assert jnp.allclose(logits_per_image, ref_li, atol=1e-2, rtol=1e-2), (
        f"logits_per_image mismatch vs reference: max abs err {err}")
    assert jnp.allclose(logits_per_text, ref_lt, atol=1e-2, rtol=1e-2), (
        "logits_per_text mismatch vs reference")

    print("KERNEL_OK")
</pallas_src>

<mosaic_0001>
module attributes {stable_mosaic.version = 11 : i64} {
  func.func @_linear_kernel(%arg0: i32, %arg1: memref<32x192xf32, #tpu.memory_space<vmem>>, %arg2: memref<192x64xf32, #tpu.memory_space<vmem>>, %arg3: memref<1x64xf32, #tpu.memory_space<vmem>>, %arg4: memref<32x64xf32, #tpu.memory_space<vmem>>) attributes {dimension_semantics = [#tpu.dimension_semantics<arbitrary>], iteration_bounds = array<i64: 1>, scalar_prefetch = 0 : i64, scratch_operands = 0 : i64, tpu.core_type = #tpu.core_type<tc>, window_params = [{pipeline_mode = #tpu.pipeline_mode<synchronous>, transform_indices = @transform_0, window_bounds = array<i64: 32, 192>}, {pipeline_mode = #tpu.pipeline_mode<synchronous>, transform_indices = @transform_1, window_bounds = array<i64: 192, 64>}, {pipeline_mode = #tpu.pipeline_mode<synchronous>, transform_indices = @transform_2, window_bounds = array<i64: 1, 64>}, {pipeline_mode = #tpu.pipeline_mode<synchronous>, transform_indices = @transform_3, window_bounds = array<i64: 32, 64>}]} {
    %c0 = arith.constant 0 : index
    %c0_0 = arith.constant 0 : index
    %0 = vector.load %arg1[%c0, %c0_0] : memref<32x192xf32, #tpu.memory_space<vmem>>, vector<32x192xf32>
    %c0_1 = arith.constant 0 : index
    %c0_2 = arith.constant 0 : index
    %1 = vector.load %arg2[%c0_1, %c0_2] : memref<192x64xf32, #tpu.memory_space<vmem>>, vector<192x64xf32>
    %cst = arith.constant dense<0.000000e+00> : vector<32x64xf32>
    %2 = tpu.matmul %0, %1, %cst {dimension_numbers = #tpu.dot_dimension_numbers<[1], [0], [0], [1], [0, 0, 1, 1], [], []>} : vector<32x192xf32>, vector<192x64xf32>, vector<32x64xf32> -> vector<32x64xf32>
    %c0_3 = arith.constant 0 : index
    %c0_4 = arith.constant 0 : index
    %3 = vector.load %arg3[%c0_3, %c0_4] : memref<1x64xf32, #tpu.memory_space<vmem>>, vector<1x64xf32>
    %4 = vector.broadcast %3 : vector<1x64xf32> to vector<32x64xf32>
    %5 = arith.addf %2, %4 : vector<32x64xf32>
    %c0_5 = arith.constant 0 : index
    %c0_6 = arith.constant 0 : index
    %6 = vector.load %arg4[%c0_5, %c0_6] : memref<32x64xf32, #tpu.memory_space<vmem>>, vector<32x64xf32>
    tpu.vector_store %arg4[%c0_5, %c0_6], %5 {strides = array<i32>} : memref<32x64xf32, #tpu.memory_space<vmem>>, vector<32x64xf32>,
    return
  }
  func.func @transform_0(%arg0: i32) -> (i32, i32) {
    %c0_i32 = arith.constant 0 : i32
    %c0_i32_0 = arith.constant 0 : i32
    %c0_i32_1 = arith.constant 0 : i32
    return %c0_i32, %c0_i32_0 : i32, i32
  }
  func.func @transform_1(%arg0: i32) -> (i32, i32) {
    %c0_i32 = arith.constant 0 : i32
    %c0_i32_0 = arith.constant 0 : i32
    %c0_i32_1 = arith.constant 0 : i32
    return %c0_i32, %c0_i32_0 : i32, i32
  }
  func.func @transform_2(%arg0: i32) -> (i32, i32) {
    %c0_i32 = arith.constant 0 : i32
    %c0_i32_0 = arith.constant 0 : i32
    %c0_i32_1 = arith.constant 0 : i32
    return %c0_i32, %c0_i32_0 : i32, i32
  }
  func.func @transform_3(%arg0: i32) -> (i32, i32) {
    %c0_i32 = arith.constant 0 : i32
    %c0_i32_0 = arith.constant 0 : i32
    %c0_i32_1 = arith.constant 0 : i32
    return %c0_i32, %c0_i32_0 : i32, i32
  }
}

module attributes {stable_mosaic.version = 11 : i64} {
  func.func @_layernorm_kernel(%arg0: i32, %arg1: memref<34x64xf32, #tpu.memory_space<vmem>>, %arg2: memref<1x64xf32, #tpu.memory_space<vmem>>, %arg3: memref<1x64xf32, #tpu.memory_space<vmem>>, %arg4: memref<34x64xf32, #tpu.memory_space<vmem>>) attributes {dimension_semantics = [#tpu.dimension_semantics<arbitrary>], iteration_bounds = array<i64: 1>, scalar_prefetch = 0 : i64, scratch_operands = 0 : i64, tpu.core_type = #tpu.core_type<tc>, window_params = [{pipeline_mode = #tpu.pipeline_mode<synchronous>, transform_indices = @transform_0, window_bounds = array<i64: 34, 64>}, {pipeline_mode = #tpu.pipeline_mode<synchronous>, transform_indices = @transform_1, window_bounds = array<i64: 1, 64>}, {pipeline_mode = #tpu.pipeline_mode<synchronous>, transform_indices = @transform_2, window_bounds = array<i64: 1, 64>}, {pipeline_mode = #tpu.pipeline_mode<synchronous>, transform_indices = @transform_3, window_bounds = array<i64: 34, 64>}]} {
    %c0 = arith.constant 0 : index
    %c0_0 = arith.constant 0 : index
    %0 = vector.load %arg1[%c0, %c0_0] : memref<34x64xf32, #tpu.memory_space<vmem>>, vector<34x64xf32>
    %cst = arith.constant dense<0.000000e+00> : vector<34xf32>
    %1 = vector.multi_reduction <add>, %0, %cst [1] : vector<34x64xf32> to vector<34xf32>
    %2 = vector.shape_cast %1 : vector<34xf32> to vector<34x1xf32>
    %cst_1 = arith.constant 6.400000e+01 : f32
    %3 = vector.broadcast %cst_1 : f32 to vector<34x1xf32>
    %4 = arith.divf %2, %3 : vector<34x1xf32>
    %5 = vector.broadcast %4 : vector<34x1xf32> to vector<34x64xf32>
    %6 = arith.subf %0, %5 : vector<34x64xf32>
    %7 = arith.mulf %6, %6 : vector<34x64xf32>
    %cst_2 = arith.constant dense<0.000000e+00> : vector<34xf32>
    %8 = vector.multi_reduction <add>, %7, %cst_2 [1] : vector<34x64xf32> to vector<34xf32>
    %9 = vector.shape_cast %8 : vector<34xf32> to vector<34x1xf32>
    %cst_3 = arith.constant 6.400000e+01 : f32
    %10 = vector.broadcast %cst_3 : f32 to vector<34x1xf32>
    %11 = arith.divf %9, %10 : vector<34x1xf32>
    %cst_4 = arith.constant 9.99999974E-6 : f32
    %12 = vector.broadcast %cst_4 : f32 to vector<34x1xf32>
    %13 = arith.addf %11, %12 : vector<34x1xf32>
    %14 = math.rsqrt %13 : vector<34x1xf32>
    %15 = vector.broadcast %14 : vector<34x1xf32> to vector<34x64xf32>
    %16 = arith.mulf %6, %15 : vector<34x64xf32>
    %c0_5 = arith.constant 0 : index
    %c0_6 = arith.constant 0 : index
    %17 = vector.load %arg2[%c0_5, %c0_6] : memref<1x64xf32, #tpu.memory_space<vmem>>, vector<1x64xf32>
    %18 = vector.broadcast %17 : vector<1x64xf32> to vector<34x64xf32>
    %19 = arith.mulf %16, %18 : vector<34x64xf32>
    %c0_7 = arith.constant 0 : index
    %c0_8 = arith.constant 0 : index
    %20 = vector.load %arg3[%c0_7, %c0_8] : memref<1x64xf32, #tpu.memory_space<vmem>>, vector<1x64xf32>
    %21 = vector.broadcast %20 : vector<1x64xf32> to vector<34x64xf32>
    %22 = arith.addf %19, %21 : vector<34x64xf32>
    %c0_9 = arith.constant 0 : index
    %c0_10 = arith.constant 0 : index
    %23 = vector.load %arg4[%c0_9, %c0_10] : memref<34x64xf32, #tpu.memory_space<vmem>>, vector<34x64xf32>
    tpu.vector_store %arg4[%c0_9, %c0_10], %22 {strides = array<i32>} : memref<34x64xf32, #tpu.memory_space<vmem>>, vector<34x64xf32>,
    return
  }
  func.func @transform_0(%arg0: i32) -> (i32, i32) {
    %c0_i32 = arith.constant 0 : i32
    %c0_i32_0 = arith.constant 0 : i32
    %c0_i32_1 = arith.constant 0 : i32
    return %c0_i32, %c0_i32_0 : i32, i32
  }
  func.func @transform_1(%arg0: i32) -> (i32, i32) {
    %c0_i32 = arith.constant 0 : i32
    %c0_i32_0 = arith.constant 0 : i32
    %c0_i32_1 = arith.constant 0 : i32
    return %c0_i32, %c0_i32_0 : i32, i32
  }
  func.func @transform_2(%arg0: i32) -> (i32, i32) {
    %c0_i32 = arith.constant 0 : i32
    %c0_i32_0 = arith.constant 0 : i32
    %c0_i32_1 = arith.constant 0 : i32
    return %c0_i32, %c0_i32_0 : i32, i32
  }
  func.func @transform_3(%arg0: i32) -> (i32, i32) {
    %c0_i32 = arith.constant 0 : i32
    %c0_i32_0 = arith.constant 0 : i32
    %c0_i32_1 = arith.constant 0 : i32
    return %c0_i32, %c0_i32_0 : i32, i32
  }
}

module attributes {stable_mosaic.version = 11 : i64} {
  func.func @_linear_kernel(%arg0: i32, %arg1: memref<34x64xf32, #tpu.memory_space<vmem>>, %arg2: memref<64x192xf32, #tpu.memory_space<vmem>>, %arg3: memref<1x192xf32, #tpu.memory_space<vmem>>, %arg4: memref<34x192xf32, #tpu.memory_space<vmem>>) attributes {dimension_semantics = [#tpu.dimension_semantics<arbitrary>], iteration_bounds = array<i64: 1>, scalar_prefetch = 0 : i64, scratch_operands = 0 : i64, tpu.core_type = #tpu.core_type<tc>, window_params = [{pipeline_mode = #tpu.pipeline_mode<synchronous>, transform_indices = @transform_0, window_bounds = array<i64: 34, 64>}, {pipeline_mode = #tpu.pipeline_mode<synchronous>, transform_indices = @transform_1, window_bounds = array<i64: 64, 192>}, {pipeline_mode = #tpu.pipeline_mode<synchronous>, transform_indices = @transform_2, window_bounds = array<i64: 1, 192>}, {pipeline_mode = #tpu.pipeline_mode<synchronous>, transform_indices = @transform_3, window_bounds = array<i64: 34, 192>}]} {
    %c0 = arith.constant 0 : index
    %c0_0 = arith.constant 0 : index
    %0 = vector.load %arg1[%c0, %c0_0] : memref<34x64xf32, #tpu.memory_space<vmem>>, vector<34x64xf32>
    %c0_1 = arith.constant 0 : index
    %c0_2 = arith.constant 0 : index
    %1 = vector.load %arg2[%c0_1, %c0_2] : memref<64x192xf32, #tpu.memory_space<vmem>>, vector<64x192xf32>
    %cst = arith.constant dense<0.000000e+00> : vector<34x192xf32>
    %2 = tpu.matmul %0, %1, %cst {dimension_numbers = #tpu.dot_dimension_numbers<[1], [0], [0], [1], [0, 0, 1, 1], [], []>} : vector<34x64xf32>, vector<64x192xf32>, vector<34x192xf32> -> vector<34x192xf32>
    %c0_3 = arith.constant 0 : index
    %c0_4 = arith.constant 0 : index
    %3 = vector.load %arg3[%c0_3, %c0_4] : memref<1x192xf32, #tpu.memory_space<vmem>>, vector<1x192xf32>
    %4 = vector.broadcast %3 : vector<1x192xf32> to vector<34x192xf32>
    %5 = arith.addf %2, %4 : vector<34x192xf32>
    %c0_5 = arith.constant 0 : index
    %c0_6 = arith.constant 0 : index
    %6 = vector.load %arg4[%c0_5, %c0_6] : memref<34x192xf32, #tpu.memory_space<vmem>>, vector<34x192xf32>
    tpu.vector_store %arg4[%c0_5, %c0_6], %5 {strides = array<i32>} : memref<34x192xf32, #tpu.memory_space<vmem>>, vector<34x192xf32>,
    return
  }
  func.func @transform_0(%arg0: i32) -> (i32, i32) {
    %c0_i32 = arith.constant 0 : i32
    %c0_i32_0 = arith.constant 0 : i32
    %c0_i32_1 = arith.constant 0 : i32
    return %c0_i32, %c0_i32_0 : i32, i32
  }
  func.func @transform_1(%arg0: i32) -> (i32, i32) {
    %c0_i32 = arith.constant 0 : i32
    %c0_i32_0 = arith.constant 0 : i32
    %c0_i32_1 = arith.constant 0 : i32
    return %c0_i32, %c0_i32_0 : i32, i32
  }
  func.func @transform_2(%arg0: i32) -> (i32, i32) {
    %c0_i32 = arith.constant 0 : i32
    %c0_i32_0 = arith.constant 0 : i32
    %c0_i32_1 = arith.constant 0 : i32
    return %c0_i32, %c0_i32_0 : i32, i32
  }
  func.func @transform_3(%arg0: i32) -> (i32, i32) {
    %c0_i32 = arith.constant 0 : i32
    %c0_i32_0 = arith.constant 0 : i32
    %c0_i32_1 = arith.constant 0 : i32
    return %c0_i32, %c0_i32_0 : i32, i32
  }
}

module attributes {stable_mosaic.version = 11 : i64} {
  func.func @_mha_kernel(%arg0: i32, %arg1: memref<1x17x64xf32, #tpu.memory_space<vmem>>, %arg2: memref<1x17x64xf32, #tpu.memory_space<vmem>>, %arg3: memref<1x17x64xf32, #tpu.memory_space<vmem>>, %arg4: memref<17x17xf32, #tpu.memory_space<vmem>>, %arg5: memref<1x17x64xf32, #tpu.memory_space<vmem>>) attributes {dimension_semantics = [#tpu.dimension_semantics<parallel>], iteration_bounds = array<i64: 2>, scalar_prefetch = 0 : i64, scratch_operands = 0 : i64, tpu.core_type = #tpu.core_type<tc>, window_params = [{transform_indices = @transform_0, window_bounds = array<i64: 1, 17, 64>}, {transform_indices = @transform_1, window_bounds = array<i64: 1, 17, 64>}, {transform_indices = @transform_2, window_bounds = array<i64: 1, 17, 64>}, {pipeline_mode = #tpu.pipeline_mode<synchronous>, transform_indices = @transform_3, window_bounds = array<i64: 17, 17>}, {transform_indices = @transform_4, window_bounds = array<i64: 1, 17, 64>}]} {
    %c0 = arith.constant 0 : index
    %c0_0 = arith.constant 0 : index
    %c0_1 = arith.constant 0 : index
    %0 = vector.load %arg1[%c0, %c0_0, %c0_1] : memref<1x17x64xf32, #tpu.memory_space<vmem>>, vector<1x17x64xf32>
    %1 = vector.shape_cast %0 : vector<1x17x64xf32> to vector<17x64xf32>
    %c0_2 = arith.constant 0 : index
    %c0_3 = arith.constant 0 : index
    %c0_4 = arith.constant 0 : index
    %2 = vector.load %arg2[%c0_2, %c0_3, %c0_4] : memref<1x17x64xf32, #tpu.memory_space<vmem>>, vector<1x17x64xf32>
    %3 = vector.shape_cast %2 : vector<1x17x64xf32> to vector<17x64xf32>
    %c0_5 = arith.constant 0 : index
    %c0_6 = arith.constant 0 : index
    %c0_7 = arith.constant 0 : index
    %4 = vector.load %arg3[%c0_5, %c0_6, %c0_7] : memref<1x17x64xf32, #tpu.memory_space<vmem>>, vector<1x17x64xf32>
    %5 = vector.shape_cast %4 : vector<1x17x64xf32> to vector<17x64xf32>
    %cst = arith.constant dense<0.000000e+00> : vector<17x17xf32>
    %6 = tpu.matmul %1, %3, %cst {dimension_numbers = #tpu.dot_dimension_numbers<[1], [1], [0], [0], [0, 0, 1, 0], [], []>} : vector<17x64xf32>, vector<17x64xf32>, vector<17x17xf32> -> vector<17x17xf32>
    %cst_8 = arith.constant 1.250000e-01 : f32
    %7 = vector.broadcast %cst_8 : f32 to vector<17x17xf32>
    %8 = arith.mulf %6, %7 : vector<17x17xf32>
    %c0_9 = arith.constant 0 : index
    %c0_10 = arith.constant 0 : index
    %9 = vector.load %arg4[%c0_9, %c0_10] : memref<17x17xf32, #tpu.memory_space<vmem>>, vector<17x17xf32>
    %10 = arith.addf %8, %9 : vector<17x17xf32>
    %cst_11 = arith.constant dense<0xFF800000> : vector<17xf32>
    %11 = vector.multi_reduction <maximumf>, %10, %cst_11 [1] : vector<17x17xf32> to vector<17xf32>
    %12 = vector.shape_cast %11 : vector<17xf32> to vector<17x1xf32>
    %13 = vector.broadcast %12 : vector<17x1xf32> to vector<17x17xf32>
    %14 = arith.subf %10, %13 : vector<17x17xf32>
    %15 = math.exp %14 : vector<17x17xf32>
    %cst_12 = arith.constant dense<0.000000e+00> : vector<17xf32>
    %16 = vector.multi_reduction <add>, %15, %cst_12 [1] : vector<17x17xf32> to vector<17xf32>
    %17 = vector.shape_cast %16 : vector<17xf32> to vector<17x1xf32>
    %18 = vector.broadcast %17 : vector<17x1xf32> to vector<17x17xf32>
    %19 = arith.divf %15, %18 : vector<17x17xf32>
    %cst_13 = arith.constant dense<0.000000e+00> : vector<17x64xf32>
    %20 = tpu.matmul %19, %5, %cst_13 {dimension_numbers = #tpu.dot_dimension_numbers<[1], [0], [0], [1], [0, 0, 1, 1], [], []>} : vector<17x17xf32>, vector<17x64xf32>, vector<17x64xf32> -> vector<17x64xf32>
    %c0_14 = arith.constant 0 : index
    %c0_15 = arith.constant 0 : index
    %c0_16 = arith.constant 0 : index
    %21 = vector.load %arg5[%c0_14, %c0_15, %c0_16] : memref<1x17x64xf32, #tpu.memory_space<vmem>>, vector<1x17x64xf32>
    %22 = vector.shape_cast %21 : vector<1x17x64xf32> to vector<17x64xf32>
    %23 = vector.shape_cast %20 : vector<17x64xf32> to vector<1x17x64xf32>
    tpu.vector_store %arg5[%c0_14, %c0_15, %c0_16], %23 {strides = array<i32>} : memref<1x17x64xf32, #tpu.memory_space<vmem>>, vector<1x17x64xf32>,
    return
  }
  func.func @transform_0(%arg0: i32) -> (i32, i32, i32) {
    %c0_i32 = arith.constant 0 : i32
    %c0_i32_0 = arith.constant 0 : i32
    %c0_i32_1 = arith.constant 0 : i32
    return %arg0, %c0_i32, %c0_i32_0 : i32, i32, i32
  }
  func.func @transform_1(%arg0: i32) -> (i32, i32, i32) {
    %c0_i32 = arith.constant 0 : i32
    %c0_i32_0 = arith.constant 0 : i32
    %c0_i32_1 = arith.constant 0 : i32
    return %arg0, %c0_i32, %c0_i32_0 : i32, i32, i32
  }
  func.func @transform_2(%arg0: i32) -> (i32, i32, i32) {
    %c0_i32 = arith.constant 0 : i32
    %c0_i32_0 = arith.constant 0 : i32
    %c0_i32_1 = arith.constant 0 : i32
    return %arg0, %c0_i32, %c0_i32_0 : i32, i32, i32
  }
  func.func @transform_3(%arg0: i32) -> (i32, i32) {
    %c0_i32 = arith.constant 0 : i32
    %c0_i32_0 = arith.constant 0 : i32
    %c0_i32_1 = arith.constant 0 : i32
    return %c0_i32, %c0_i32_0 : i32, i32
  }
  func.func @transform_4(%arg0: i32) -> (i32, i32, i32) {
    %c0_i32 = arith.constant 0 : i32
    %c0_i32_0 = arith.constant 0 : i32
    %c0_i32_1 = arith.constant 0 : i32
    return %arg0, %c0_i32, %c0_i32_0 : i32, i32, i32
  }
}

module attributes {stable_mosaic.version = 11 : i64} {
  func.func @_linear_kernel(%arg0: i32, %arg1: memref<34x64xf32, #tpu.memory_space<vmem>>, %arg2: memref<64x64xf32, #tpu.memory_space<vmem>>, %arg3: memref<1x64xf32, #tpu.memory_space<vmem>>, %arg4: memref<34x64xf32, #tpu.memory_space<vmem>>) attributes {dimension_semantics = [#tpu.dimension_semantics<arbitrary>], iteration_bounds = array<i64: 1>, scalar_prefetch = 0 : i64, scratch_operands = 0 : i64, tpu.core_type = #tpu.core_type<tc>, window_params = [{pipeline_mode = #tpu.pipeline_mode<synchronous>, transform_indices = @transform_0, window_bounds = array<i64: 34, 64>}, {pipeline_mode = #tpu.pipeline_mode<synchronous>, transform_indices = @transform_1, window_bounds = array<i64: 64, 64>}, {pipeline_mode = #tpu.pipeline_mode<synchronous>, transform_indices = @transform_2, window_bounds = array<i64: 1, 64>}, {pipeline_mode = #tpu.pipeline_mode<synchronous>, transform_indices = @transform_3, window_bounds = array<i64: 34, 64>}]} {
    %c0 = arith.constant 0 : index
    %c0_0 = arith.constant 0 : index
    %0 = vector.load %arg1[%c0, %c0_0] : memref<34x64xf32, #tpu.memory_space<vmem>>, vector<34x64xf32>
    %c0_1 = arith.constant 0 : index
    %c0_2 = arith.constant 0 : index
    %1 = vector.load %arg2[%c0_1, %c0_2] : memref<64x64xf32, #tpu.memory_space<vmem>>, vector<64x64xf32>
    %cst = arith.constant dense<0.000000e+00> : vector<34x64xf32>
    %2 = tpu.matmul %0, %1, %cst {dimension_numbers = #tpu.dot_dimension_numbers<[1], [0], [0], [1], [0, 0, 1, 1], [], []>} : vector<34x64xf32>, vector<64x64xf32>, vector<34x64xf32> -> vector<34x64xf32>
    %c0_3 = arith.constant 0 : index
    %c0_4 = arith.constant 0 : index
    %3 = vector.load %arg3[%c0_3, %c0_4] : memref<1x64xf32, #tpu.memory_space<vmem>>, vector<1x64xf32>
    %4 = vector.broadcast %3 : vector<1x64xf32> to vector<34x64xf32>
    %5 = arith.addf %2, %4 : vector<34x64xf32>
    %c0_5 = arith.constant 0 : index
    %c0_6 = arith.constant 0 : index
    %6 = vector.load %arg4[%c0_5, %c0_6] : memref<34x64xf32, #tpu.memory_space<vmem>>, vector<34x64xf32>
    tpu.vector_store %arg4[%c0_5, %c0_6], %5 {strides = array<i32>} : memref<34x64xf32, #tpu.memory_space<vmem>>, vector<34x64xf32>,
    return
  }
  func.func @transform_0(%arg0: i32) -> (i32, i32) {
    %c0_i32 = arith.constant 0 : i32
    %c0_i32_0 = arith.constant 0 : i32
    %c0_i32_1 = arith.constant 0 : i32
    return %c0_i32, %c0_i32_0 : i32, i32
  }
  func.func @transform_1(%arg0: i32) -> (i32, i32) {
    %c0_i32 = arith.constant 0 : i32
    %c0_i32_0 = arith.constant 0 : i32
    %c0_i32_1 = arith.constant 0 : i32
    return %c0_i32, %c0_i32_0 : i32, i32
  }
  func.func @transform_2(%arg0: i32) -> (i32, i32) {
    %c0_i32 = arith.constant 0 : i32
    %c0_i32_0 = arith.constant 0 : i32
    %c0_i32_1 = arith.constant 0 : i32
    return %c0_i32, %c0_i32_0 : i32, i32
  }
  func.func @transform_3(%arg0: i32) -> (i32, i32) {
    %c0_i32 = arith.constant 0 : i32
    %c0_i32_0 = arith.constant 0 : i32
    %c0_i32_1 = arith.constant 0 : i32
    return %c0_i32, %c0_i32_0 : i32, i32
  }
}

module attributes {stable_mosaic.version = 11 : i64} {
  func.func @_linear_kernel(%arg0: i32, %arg1: memref<34x64xf32, #tpu.memory_space<vmem>>, %arg2: memref<64x256xf32, #tpu.memory_space<vmem>>, %arg3: memref<1x256xf32, #tpu.memory_space<vmem>>, %arg4: memref<34x256xf32, #tpu.memory_space<vmem>>) attributes {dimension_semantics = [#tpu.dimension_semantics<arbitrary>], iteration_bounds = array<i64: 1>, scalar_prefetch = 0 : i64, scratch_operands = 0 : i64, tpu.core_type = #tpu.core_type<tc>, window_params = [{pipeline_mode = #tpu.pipeline_mode<synchronous>, transform_indices = @transform_0, window_bounds = array<i64: 34, 64>}, {pipeline_mode = #tpu.pipeline_mode<synchronous>, transform_indices = @transform_1, window_bounds = array<i64: 64, 256>}, {pipeline_mode = #tpu.pipeline_mode<synchronous>, transform_indices = @transform_2, window_bounds = array<i64: 1, 256>}, {pipeline_mode = #tpu.pipeline_mode<synchronous>, transform_indices = @transform_3, window_bounds = array<i64: 34, 256>}]} {
    %c0 = arith.constant 0 : index
    %c0_0 = arith.constant 0 : index
    %0 = vector.load %arg1[%c0, %c0_0] : memref<34x64xf32, #tpu.memory_space<vmem>>, vector<34x64xf32>
    %c0_1 = arith.constant 0 : index
    %c0_2 = arith.constant 0 : index
    %1 = vector.load %arg2[%c0_1, %c0_2] : memref<64x256xf32, #tpu.memory_space<vmem>>, vector<64x256xf32>
    %cst = arith.constant dense<0.000000e+00> : vector<34x256xf32>
    %2 = tpu.matmul %0, %1, %cst {dimension_numbers = #tpu.dot_dimension_numbers<[1], [0], [0], [1], [0, 0, 1, 1], [], []>} : vector<34x64xf32>, vector<64x256xf32>, vector<34x256xf32> -> vector<34x256xf32>
    %c0_3 = arith.constant 0 : index
    %c0_4 = arith.constant 0 : index
    %3 = vector.load %arg3[%c0_3, %c0_4] : memref<1x256xf32, #tpu.memory_space<vmem>>, vector<1x256xf32>
    %4 = vector.broadcast %3 : vector<1x256xf32> to vector<34x256xf32>
    %5 = arith.addf %2, %4 : vector<34x256xf32>
    %cst_5 = arith.constant -1.702000e+00 : f32
    %6 = vector.broadcast %cst_5 : f32 to vector<34x256xf32>
    %7 = arith.mulf %6, %5 : vector<34x256xf32>
    %8 = math.exp %7 : vector<34x256xf32>
    %cst_6 = arith.constant 1.000000e+00 : f32
    %9 = vector.broadcast %cst_6 : f32 to vector<34x256xf32>
    %10 = arith.addf %9, %8 : vector<34x256xf32>
    %cst_7 = arith.constant 1.000000e+00 : f32
    %11 = vector.broadcast %cst_7 : f32 to vector<34x256xf32>
    %12 = arith.divf %11, %10 : vector<34x256xf32>
    %13 = arith.mulf %5, %12 : vector<34x256xf32>
    %c0_8 = arith.constant 0 : index
    %c0_9 = arith.constant 0 : index
    %14 = vector.load %arg4[%c0_8, %c0_9] : memref<34x256xf32, #tpu.memory_space<vmem>>, vector<34x256xf32>
    tpu.vector_store %arg4[%c0_8, %c0_9], %13 {strides = array<i32>} : memref<34x256xf32, #tpu.memory_space<vmem>>, vector<34x256xf32>,
    return
  }
  func.func @transform_0(%arg0: i32) -> (i32, i32) {
    %c0_i32 = arith.constant 0 : i32
    %c0_i32_0 = arith.constant 0 : i32
    %c0_i32_1 = arith.constant 0 : i32
    return %c0_i32, %c0_i32_0 : i32, i32
  }
  func.func @transform_1(%arg0: i32) -> (i32, i32) {
    %c0_i32 = arith.constant 0 : i32
    %c0_i32_0 = arith.constant 0 : i32
    %c0_i32_1 = arith.constant 0 : i32
    return %c0_i32, %c0_i32_0 : i32, i32
  }
  func.func @transform_2(%arg0: i32) -> (i32, i32) {
    %c0_i32 = arith.constant 0 : i32
    %c0_i32_0 = arith.constant 0 : i32
    %c0_i32_1 = arith.constant 0 : i32
    return %c0_i32, %c0_i32_0 : i32, i32
  }
  func.func @transform_3(%arg0: i32) -> (i32, i32) {
    %c0_i32 = arith.constant 0 : i32
    %c0_i32_0 = arith.constant 0 : i32
    %c0_i32_1 = arith.constant 0 : i32
    return %c0_i32, %c0_i32_0 : i32, i32
  }
}

module attributes {stable_mosaic.version = 11 : i64} {
  func.func @_linear_kernel(%arg0: i32, %arg1: memref<34x256xf32, #tpu.memory_space<vmem>>, %arg2: memref<256x64xf32, #tpu.memory_space<vmem>>, %arg3: memref<1x64xf32, #tpu.memory_space<vmem>>, %arg4: memref<34x64xf32, #tpu.memory_space<vmem>>) attributes {dimension_semantics = [#tpu.dimension_semantics<arbitrary>], iteration_bounds = array<i64: 1>, scalar_prefetch = 0 : i64, scratch_operands = 0 : i64, tpu.core_type = #tpu.core_type<tc>, window_params = [{pipeline_mode = #tpu.pipeline_mode<synchronous>, transform_indices = @transform_0, window_bounds = array<i64: 34, 256>}, {pipeline_mode = #tpu.pipeline_mode<synchronous>, transform_indices = @transform_1, window_bounds = array<i64: 256, 64>}, {pipeline_mode = #tpu.pipeline_mode<synchronous>, transform_indices = @transform_2, window_bounds = array<i64: 1, 64>}, {pipeline_mode = #tpu.pipeline_mode<synchronous>, transform_indices = @transform_3, window_bounds = array<i64: 34, 64>}]} {
    %c0 = arith.constant 0 : index
    %c0_0 = arith.constant 0 : index
    %0 = vector.load %arg1[%c0, %c0_0] : memref<34x256xf32, #tpu.memory_space<vmem>>, vector<34x256xf32>
    %c0_1 = arith.constant 0 : index
    %c0_2 = arith.constant 0 : index
    %1 = vector.load %arg2[%c0_1, %c0_2] : memref<256x64xf32, #tpu.memory_space<vmem>>, vector<256x64xf32>
    %cst = arith.constant dense<0.000000e+00> : vector<34x64xf32>
    %2 = tpu.matmul %0, %1, %cst {dimension_numbers = #tpu.dot_dimension_numbers<[1], [0], [0], [1], [0, 0, 1, 1], [], []>} : vector<34x256xf32>, vector<256x64xf32>, vector<34x64xf32> -> vector<34x64xf32>
    %c0_3 = arith.constant 0 : index
    %c0_4 = arith.constant 0 : index
    %3 = vector.load %arg3[%c0_3, %c0_4] : memref<1x64xf32, #tpu.memory_space<vmem>>, vector<1x64xf32>
    %4 = vector.broadcast %3 : vector<1x64xf32> to vector<34x64xf32>
    %5 = arith.addf %2, %4 : vector<34x64xf32>
    %c0_5 = arith.constant 0 : index
    %c0_6 = arith.constant 0 : index
    %6 = vector.load %arg4[%c0_5, %c0_6] : memref<34x64xf32, #tpu.memory_space<vmem>>, vector<34x64xf32>
    tpu.vector_store %arg4[%c0_5, %c0_6], %5 {strides = array<i32>} : memref<34x64xf32, #tpu.memory_space<vmem>>, vector<34x64xf32>,
    return
  }
  func.func @transform_0(%arg0: i32) -> (i32, i32) {
    %c0_i32 = arith.constant 0 : i32
    %c0_i32_0 = arith.constant 0 : i32
    %c0_i32_1 = arith.constant 0 : i32
    return %c0_i32, %c0_i32_0 : i32, i32
  }
  func.func @transform_1(%arg0: i32) -> (i32, i32) {
    %c0_i32 = arith.constant 0 : i32
    %c0_i32_0 = arith.constant 0 : i32
    %c0_i32_1 = arith.constant 0 : i32
    return %c0_i32, %c0_i32_0 : i32, i32
  }
  func.func @transform_2(%arg0: i32) -> (i32, i32) {
    %c0_i32 = arith.constant 0 : i32
    %c0_i32_0 = arith.constant 0 : i32
    %c0_i32_1 = arith.constant 0 : i32
    return %c0_i32, %c0_i32_0 : i32, i32
  }
  func.func @transform_3(%arg0: i32) -> (i32, i32) {
    %c0_i32 = arith.constant 0 : i32
    %c0_i32_0 = arith.constant 0 : i32
    %c0_i32_1 = arith.constant 0 : i32
    return %c0_i32, %c0_i32_0 : i32, i32
  }
}

module attributes {stable_mosaic.version = 11 : i64} {
  func.func @_layernorm_kernel(%arg0: i32, %arg1: memref<2x64xf32, #tpu.memory_space<vmem>>, %arg2: memref<1x64xf32, #tpu.memory_space<vmem>>, %arg3: memref<1x64xf32, #tpu.memory_space<vmem>>, %arg4: memref<2x64xf32, #tpu.memory_space<vmem>>) attributes {dimension_semantics = [#tpu.dimension_semantics<arbitrary>], iteration_bounds = array<i64: 1>, scalar_prefetch = 0 : i64, scratch_operands = 0 : i64, tpu.core_type = #tpu.core_type<tc>, window_params = [{pipeline_mode = #tpu.pipeline_mode<synchronous>, transform_indices = @transform_0, window_bounds = array<i64: 2, 64>}, {pipeline_mode = #tpu.pipeline_mode<synchronous>, transform_indices = @transform_1, window_bounds = array<i64: 1, 64>}, {pipeline_mode = #tpu.pipeline_mode<synchronous>, transform_indices = @transform_2, window_bounds = array<i64: 1, 64>}, {pipeline_mode = #tpu.pipeline_mode<synchronous>, transform_indices = @transform_3, window_bounds = array<i64: 2, 64>}]} {
    %c0 = arith.constant 0 : index
    %c0_0 = arith.constant 0 : index
    %0 = vector.load %arg1[%c0, %c0_0] : memref<2x64xf32, #tpu.memory_space<vmem>>, vector<2x64xf32>
    %cst = arith.constant dense<0.000000e+00> : vector<2xf32>
    %1 = vector.multi_reduction <add>, %0, %cst [1] : vector<2x64xf32> to vector<2xf32>
    %2 = vector.shape_cast %1 : vector<2xf32> to vector<2x1xf32>
    %cst_1 = arith.constant 6.400000e+01 : f32
    %3 = vector.broadcast %cst_1 : f32 to vector<2x1xf32>
    %4 = arith.divf %2, %3 : vector<2x1xf32>
    %5 = vector.broadcast %4 : vector<2x1xf32> to vector<2x64xf32>
    %6 = arith.subf %0, %5 : vector<2x64xf32>
    %7 = arith.mulf %6, %6 : vector<2x64xf32>
    %cst_2 = arith.constant dense<0.000000e+00> : vector<2xf32>
    %8 = vector.multi_reduction <add>, %7, %cst_2 [1] : vector<2x64xf32> to vector<2xf32>
    %9 = vector.shape_cast %8 : vector<2xf32> to vector<2x1xf32>
    %cst_3 = arith.constant 6.400000e+01 : f32
    %10 = vector.broadcast %cst_3 : f32 to vector<2x1xf32>
    %11 = arith.divf %9, %10 : vector<2x1xf32>
    %cst_4 = arith.constant 9.99999974E-6 : f32
    %12 = vector.broadcast %cst_4 : f32 to vector<2x1xf32>
    %13 = arith.addf %11, %12 : vector<2x1xf32>
    %14 = math.rsqrt %13 : vector<2x1xf32>
    %15 = vector.broadcast %14 : vector<2x1xf32> to vector<2x64xf32>
    %16 = arith.mulf %6, %15 : vector<2x64xf32>
    %c0_5 = arith.constant 0 : index
    %c0_6 = arith.constant 0 : index
    %17 = vector.load %arg2[%c0_5, %c0_6] : memref<1x64xf32, #tpu.memory_space<vmem>>, vector<1x64xf32>
    %18 = vector.broadcast %17 : vector<1x64xf32> to vector<2x64xf32>
    %19 = arith.mulf %16, %18 : vector<2x64xf32>
    %c0_7 = arith.constant 0 : index
    %c0_8 = arith.constant 0 : index
    %20 = vector.load %arg3[%c0_7, %c0_8] : memref<1x64xf32, #tpu.memory_space<vmem>>, vector<1x64xf32>
    %21 = vector.broadcast %20 : vector<1x64xf32> to vector<2x64xf32>
    %22 = arith.addf %19, %21 : vector<2x64xf32>
    %c0_9 = arith.constant 0 : index
    %c0_10 = arith.constant 0 : index
    %23 = vector.load %arg4[%c0_9, %c0_10] : memref<2x64xf32, #tpu.memory_space<vmem>>, vector<2x64xf32>
    tpu.vector_store %arg4[%c0_9, %c0_10], %22 {strides = array<i32>} : memref<2x64xf32, #tpu.memory_space<vmem>>, vector<2x64xf32>,
    return
  }
  func.func @transform_0(%arg0: i32) -> (i32, i32) {
    %c0_i32 = arith.constant 0 : i32
    %c0_i32_0 = arith.constant 0 : i32
    %c0_i32_1 = arith.constant 0 : i32
    return %c0_i32, %c0_i32_0 : i32, i32
  }
  func.func @transform_1(%arg0: i32) -> (i32, i32) {
    %c0_i32 = arith.constant 0 : i32
    %c0_i32_0 = arith.constant 0 : i32
    %c0_i32_1 = arith.constant 0 : i32
    return %c0_i32, %c0_i32_0 : i32, i32
  }
  func.func @transform_2(%arg0: i32) -> (i32, i32) {
    %c0_i32 = arith.constant 0 : i32
    %c0_i32_0 = arith.constant 0 : i32
    %c0_i32_1 = arith.constant 0 : i32
    return %c0_i32, %c0_i32_0 : i32, i32
  }
  func.func @transform_3(%arg0: i32) -> (i32, i32) {
    %c0_i32 = arith.constant 0 : i32
    %c0_i32_0 = arith.constant 0 : i32
    %c0_i32_1 = arith.constant 0 : i32
    return %c0_i32, %c0_i32_0 : i32, i32
  }
}

module attributes {stable_mosaic.version = 11 : i64} {
  func.func @_linear_kernel(%arg0: i32, %arg1: memref<2x64xf32, #tpu.memory_space<vmem>>, %arg2: memref<64x32xf32, #tpu.memory_space<vmem>>, %arg3: memref<1x32xf32, #tpu.memory_space<vmem>>, %arg4: memref<2x32xf32, #tpu.memory_space<vmem>>) attributes {dimension_semantics = [#tpu.dimension_semantics<arbitrary>], iteration_bounds = array<i64: 1>, scalar_prefetch = 0 : i64, scratch_operands = 0 : i64, tpu.core_type = #tpu.core_type<tc>, window_params = [{pipeline_mode = #tpu.pipeline_mode<synchronous>, transform_indices = @transform_0, window_bounds = array<i64: 2, 64>}, {pipeline_mode = #tpu.pipeline_mode<synchronous>, transform_indices = @transform_1, window_bounds = array<i64: 64, 32>}, {pipeline_mode = #tpu.pipeline_mode<synchronous>, transform_indices = @transform_2, window_bounds = array<i64: 1, 32>}, {pipeline_mode = #tpu.pipeline_mode<synchronous>, transform_indices = @transform_3, window_bounds = array<i64: 2, 32>}]} {
    %c0 = arith.constant 0 : index
    %c0_0 = arith.constant 0 : index
    %0 = vector.load %arg1[%c0, %c0_0] : memref<2x64xf32, #tpu.memory_space<vmem>>, vector<2x64xf32>
    %c0_1 = arith.constant 0 : index
    %c0_2 = arith.constant 0 : index
    %1 = vector.load %arg2[%c0_1, %c0_2] : memref<64x32xf32, #tpu.memory_space<vmem>>, vector<64x32xf32>
    %cst = arith.constant dense<0.000000e+00> : vector<2x32xf32>
    %2 = tpu.matmul %0, %1, %cst {dimension_numbers = #tpu.dot_dimension_numbers<[1], [0], [0], [1], [0, 0, 1, 1], [], []>} : vector<2x64xf32>, vector<64x32xf32>, vector<2x32xf32> -> vector<2x32xf32>
    %c0_3 = arith.constant 0 : index
    %c0_4 = arith.constant 0 : index
    %3 = vector.load %arg3[%c0_3, %c0_4] : memref<1x32xf32, #tpu.memory_space<vmem>>, vector<1x32xf32>
    %4 = vector.broadcast %3 : vector<1x32xf32> to vector<2x32xf32>
    %5 = arith.addf %2, %4 : vector<2x32xf32>
    %c0_5 = arith.constant 0 : index
    %c0_6 = arith.constant 0 : index
    %6 = vector.load %arg4[%c0_5, %c0_6] : memref<2x32xf32, #tpu.memory_space<vmem>>, vector<2x32xf32>
    tpu.vector_store %arg4[%c0_5, %c0_6], %5 {strides = array<i32>} : memref<2x32xf32, #tpu.memory_space<vmem>>, vector<2x32xf32>,
    return
  }
  func.func @transform_0(%arg0: i32) -> (i32, i32) {
    %c0_i32 = arith.constant 0 : i32
    %c0_i32_0 = arith.constant 0 : i32
    %c0_i32_1 = arith.constant 0 : i32
    return %c0_i32, %c0_i32_0 : i32, i32
  }
  func.func @transform_1(%arg0: i32) -> (i32, i32) {
    %c0_i32 = arith.constant 0 : i32
    %c0_i32_0 = arith.constant 0 : i32
    %c0_i32_1 = arith.constant 0 : i32
    return %c0_i32, %c0_i32_0 : i32, i32
  }
  func.func @transform_2(%arg0: i32) -> (i32, i32) {
    %c0_i32 = arith.constant 0 : i32
    %c0_i32_0 = arith.constant 0 : i32
    %c0_i32_1 = arith.constant 0 : i32
    return %c0_i32, %c0_i32_0 : i32, i32
  }
  func.func @transform_3(%arg0: i32) -> (i32, i32) {
    %c0_i32 = arith.constant 0 : i32
    %c0_i32_0 = arith.constant 0 : i32
    %c0_i32_1 = arith.constant 0 : i32
    return %c0_i32, %c0_i32_0 : i32, i32
  }
}

module attributes {stable_mosaic.version = 11 : i64} {
  func.func @_layernorm_kernel(%arg0: i32, %arg1: memref<16x64xf32, #tpu.memory_space<vmem>>, %arg2: memref<1x64xf32, #tpu.memory_space<vmem>>, %arg3: memref<1x64xf32, #tpu.memory_space<vmem>>, %arg4: memref<16x64xf32, #tpu.memory_space<vmem>>) attributes {dimension_semantics = [#tpu.dimension_semantics<arbitrary>], iteration_bounds = array<i64: 1>, scalar_prefetch = 0 : i64, scratch_operands = 0 : i64, tpu.core_type = #tpu.core_type<tc>, window_params = [{pipeline_mode = #tpu.pipeline_mode<synchronous>, transform_indices = @transform_0, window_bounds = array<i64: 16, 64>}, {pipeline_mode = #tpu.pipeline_mode<synchronous>, transform_indices = @transform_1, window_bounds = array<i64: 1, 64>}, {pipeline_mode = #tpu.pipeline_mode<synchronous>, transform_indices = @transform_2, window_bounds = array<i64: 1, 64>}, {pipeline_mode = #tpu.pipeline_mode<synchronous>, transform_indices = @transform_3, window_bounds = array<i64: 16, 64>}]} {
    %c0 = arith.constant 0 : index
    %c0_0 = arith.constant 0 : index
    %0 = vector.load %arg1[%c0, %c0_0] : memref<16x64xf32, #tpu.memory_space<vmem>>, vector<16x64xf32>
    %cst = arith.constant dense<0.000000e+00> : vector<16xf32>
    %1 = vector.multi_reduction <add>, %0, %cst [1] : vector<16x64xf32> to vector<16xf32>
    %2 = vector.shape_cast %1 : vector<16xf32> to vector<16x1xf32>
    %cst_1 = arith.constant 6.400000e+01 : f32
    %3 = vector.broadcast %cst_1 : f32 to vector<16x1xf32>
    %4 = arith.divf %2, %3 : vector<16x1xf32>
    %5 = vector.broadcast %4 : vector<16x1xf32> to vector<16x64xf32>
    %6 = arith.subf %0, %5 : vector<16x64xf32>
    %7 = arith.mulf %6, %6 : vector<16x64xf32>
    %cst_2 = arith.constant dense<0.000000e+00> : vector<16xf32>
    %8 = vector.multi_reduction <add>, %7, %cst_2 [1] : vector<16x64xf32> to vector<16xf32>
    %9 = vector.shape_cast %8 : vector<16xf32> to vector<16x1xf32>
    %cst_3 = arith.constant 6.400000e+01 : f32
    %10 = vector.broadcast %cst_3 : f32 to vector<16x1xf32>
    %11 = arith.divf %9, %10 : vector<16x1xf32>
    %cst_4 = arith.constant 9.99999974E-6 : f32
    %12 = vector.broadcast %cst_4 : f32 to vector<16x1xf32>
    %13 = arith.addf %11, %12 : vector<16x1xf32>
    %14 = math.rsqrt %13 : vector<16x1xf32>
    %15 = vector.broadcast %14 : vector<16x1xf32> to vector<16x64xf32>
    %16 = arith.mulf %6, %15 : vector<16x64xf32>
    %c0_5 = arith.constant 0 : index
    %c0_6 = arith.constant 0 : index
    %17 = vector.load %arg2[%c0_5, %c0_6] : memref<1x64xf32, #tpu.memory_space<vmem>>, vector<1x64xf32>
    %18 = vector.broadcast %17 : vector<1x64xf32> to vector<16x64xf32>
    %19 = arith.mulf %16, %18 : vector<16x64xf32>
    %c0_7 = arith.constant 0 : index
    %c0_8 = arith.constant 0 : index
    %20 = vector.load %arg3[%c0_7, %c0_8] : memref<1x64xf32, #tpu.memory_space<vmem>>, vector<1x64xf32>
    %21 = vector.broadcast %20 : vector<1x64xf32> to vector<16x64xf32>
    %22 = arith.addf %19, %21 : vector<16x64xf32>
    %c0_9 = arith.constant 0 : index
    %c0_10 = arith.constant 0 : index
    %23 = vector.load %arg4[%c0_9, %c0_10] : memref<16x64xf32, #tpu.memory_space<vmem>>, vector<16x64xf32>
    tpu.vector_store %arg4[%c0_9, %c0_10], %22 {strides = array<i32>} : memref<16x64xf32, #tpu.memory_space<vmem>>, vector<16x64xf32>,
    return
  }
  func.func @transform_0(%arg0: i32) -> (i32, i32) {
    %c0_i32 = arith.constant 0 : i32
    %c0_i32_0 = arith.constant 0 : i32
    %c0_i32_1 = arith.constant 0 : i32
    return %c0_i32, %c0_i32_0 : i32, i32
  }
  func.func @transform_1(%arg0: i32) -> (i32, i32) {
    %c0_i32 = arith.constant 0 : i32
    %c0_i32_0 = arith.constant 0 : i32
    %c0_i32_1 = arith.constant 0 : i32
    return %c0_i32, %c0_i32_0 : i32, i32
  }
  func.func @transform_2(%arg0: i32) -> (i32, i32) {
    %c0_i32 = arith.constant 0 : i32
    %c0_i32_0 = arith.constant 0 : i32
    %c0_i32_1 = arith.constant 0 : i32
    return %c0_i32, %c0_i32_0 : i32, i32
  }
  func.func @transform_3(%arg0: i32) -> (i32, i32) {
    %c0_i32 = arith.constant 0 : i32
    %c0_i32_0 = arith.constant 0 : i32
    %c0_i32_1 = arith.constant 0 : i32
    return %c0_i32, %c0_i32_0 : i32, i32
  }
}

module attributes {stable_mosaic.version = 11 : i64} {
  func.func @_linear_kernel(%arg0: i32, %arg1: memref<16x64xf32, #tpu.memory_space<vmem>>, %arg2: memref<64x192xf32, #tpu.memory_space<vmem>>, %arg3: memref<1x192xf32, #tpu.memory_space<vmem>>, %arg4: memref<16x192xf32, #tpu.memory_space<vmem>>) attributes {dimension_semantics = [#tpu.dimension_semantics<arbitrary>], iteration_bounds = array<i64: 1>, scalar_prefetch = 0 : i64, scratch_operands = 0 : i64, tpu.core_type = #tpu.core_type<tc>, window_params = [{pipeline_mode = #tpu.pipeline_mode<synchronous>, transform_indices = @transform_0, window_bounds = array<i64: 16, 64>}, {pipeline_mode = #tpu.pipeline_mode<synchronous>, transform_indices = @transform_1, window_bounds = array<i64: 64, 192>}, {pipeline_mode = #tpu.pipeline_mode<synchronous>, transform_indices = @transform_2, window_bounds = array<i64: 1, 192>}, {pipeline_mode = #tpu.pipeline_mode<synchronous>, transform_indices = @transform_3, window_bounds = array<i64: 16, 192>}]} {
    %c0 = arith.constant 0 : index
    %c0_0 = arith.constant 0 : index
    %0 = vector.load %arg1[%c0, %c0_0] : memref<16x64xf32, #tpu.memory_space<vmem>>, vector<16x64xf32>
    %c0_1 = arith.constant 0 : index
    %c0_2 = arith.constant 0 : index
    %1 = vector.load %arg2[%c0_1, %c0_2] : memref<64x192xf32, #tpu.memory_space<vmem>>, vector<64x192xf32>
    %cst = arith.constant dense<0.000000e+00> : vector<16x192xf32>
    %2 = tpu.matmul %0, %1, %cst {dimension_numbers = #tpu.dot_dimension_numbers<[1], [0], [0], [1], [0, 0, 1, 1], [], []>} : vector<16x64xf32>, vector<64x192xf32>, vector<16x192xf32> -> vector<16x192xf32>
    %c0_3 = arith.constant 0 : index
    %c0_4 = arith.constant 0 : index
    %3 = vector.load %arg3[%c0_3, %c0_4] : memref<1x192xf32, #tpu.memory_space<vmem>>, vector<1x192xf32>
    %4 = vector.broadcast %3 : vector<1x192xf32> to vector<16x192xf32>
    %5 = arith.addf %2, %4 : vector<16x192xf32>
    %c0_5 = arith.constant 0 : index
    %c0_6 = arith.constant 0 : index
    %6 = vector.load %arg4[%c0_5, %c0_6] : memref<16x192xf32, #tpu.memory_space<vmem>>, vector<16x192xf32>
    tpu.vector_store %arg4[%c0_5, %c0_6], %5 {strides = array<i32>} : memref<16x192xf32, #tpu.memory_space<vmem>>, vector<16x192xf32>,
    return
  }
  func.func @transform_0(%arg0: i32) -> (i32, i32) {
    %c0_i32 = arith.constant 0 : i32
    %c0_i32_0 = arith.constant 0 : i32
    %c0_i32_1 = arith.constant 0 : i32
    return %c0_i32, %c0_i32_0 : i32, i32
  }
  func.func @transform_1(%arg0: i32) -> (i32, i32) {
    %c0_i32 = arith.constant 0 : i32
    %c0_i32_0 = arith.constant 0 : i32
    %c0_i32_1 = arith.constant 0 : i32
    return %c0_i32, %c0_i32_0 : i32, i32
  }
  func.func @transform_2(%arg0: i32) -> (i32, i32) {
    %c0_i32 = arith.constant 0 : i32
    %c0_i32_0 = arith.constant 0 : i32
    %c0_i32_1 = arith.constant 0 : i32
    return %c0_i32, %c0_i32_0 : i32, i32
  }
  func.func @transform_3(%arg0: i32) -> (i32, i32) {
    %c0_i32 = arith.constant 0 : i32
    %c0_i32_0 = arith.constant 0 : i32
    %c0_i32_1 = arith.constant 0 : i32
    return %c0_i32, %c0_i32_0 : i32, i32
  }
}

module attributes {stable_mosaic.version = 11 : i64} {
  func.func @_mha_kernel(%arg0: i32, %arg1: memref<1x8x32xf32, #tpu.memory_space<vmem>>, %arg2: memref<1x8x32xf32, #tpu.memory_space<vmem>>, %arg3: memref<1x8x32xf32, #tpu.memory_space<vmem>>, %arg4: memref<8x8xf32, #tpu.memory_space<vmem>>, %arg5: memref<1x8x32xf32, #tpu.memory_space<vmem>>) attributes {dimension_semantics = [#tpu.dimension_semantics<parallel>], iteration_bounds = array<i64: 4>, scalar_prefetch = 0 : i64, scratch_operands = 0 : i64, tpu.core_type = #tpu.core_type<tc>, window_params = [{transform_indices = @transform_0, window_bounds = array<i64: 1, 8, 32>}, {transform_indices = @transform_1, window_bounds = array<i64: 1, 8, 32>}, {transform_indices = @transform_2, window_bounds = array<i64: 1, 8, 32>}, {pipeline_mode = #tpu.pipeline_mode<synchronous>, transform_indices = @transform_3, window_bounds = array<i64: 8, 8>}, {transform_indices = @transform_4, window_bounds = array<i64: 1, 8, 32>}]} {
    %c0 = arith.constant 0 : index
    %c0_0 = arith.constant 0 : index
    %c0_1 = arith.constant 0 : index
    %0 = vector.load %arg1[%c0, %c0_0, %c0_1] : memref<1x8x32xf32, #tpu.memory_space<vmem>>, vector<1x8x32xf32>
    %1 = vector.shape_cast %0 : vector<1x8x32xf32> to vector<8x32xf32>
    %c0_2 = arith.constant 0 : index
    %c0_3 = arith.constant 0 : index
    %c0_4 = arith.constant 0 : index
    %2 = vector.load %arg2[%c0_2, %c0_3, %c0_4] : memref<1x8x32xf32, #tpu.memory_space<vmem>>, vector<1x8x32xf32>
    %3 = vector.shape_cast %2 : vector<1x8x32xf32> to vector<8x32xf32>
    %c0_5 = arith.constant 0 : index
    %c0_6 = arith.constant 0 : index
    %c0_7 = arith.constant 0 : index
    %4 = vector.load %arg3[%c0_5, %c0_6, %c0_7] : memref<1x8x32xf32, #tpu.memory_space<vmem>>, vector<1x8x32xf32>
    %5 = vector.shape_cast %4 : vector<1x8x32xf32> to vector<8x32xf32>
    %cst = arith.constant dense<0.000000e+00> : vector<8x8xf32>
    %6 = tpu.matmul %1, %3, %cst {dimension_numbers = #tpu.dot_dimension_numbers<[1], [1], [0], [0], [0, 0, 1, 0], [], []>} : vector<8x32xf32>, vector<8x32xf32>, vector<8x8xf32> -> vector<8x8xf32>
    %cst_8 = arith.constant 0.176776692 : f32
    %7 = vector.broadcast %cst_8 : f32 to vector<8x8xf32>
    %8 = arith.mulf %6, %7 : vector<8x8xf32>
    %c0_9 = arith.constant 0 : index
    %c0_10 = arith.constant 0 : index
    %9 = vector.load %arg4[%c0_9, %c0_10] : memref<8x8xf32, #tpu.memory_space<vmem>>, vector<8x8xf32>
    %10 = arith.addf %8, %9 : vector<8x8xf32>
    %cst_11 = arith.constant dense<0xFF800000> : vector<8xf32>
    %11 = vector.multi_reduction <maximumf>, %10, %cst_11 [1] : vector<8x8xf32> to vector<8xf32>
    %12 = vector.shape_cast %11 : vector<8xf32> to vector<8x1xf32>
    %13 = vector.broadcast %12 : vector<8x1xf32> to vector<8x8xf32>
    %14 = arith.subf %10, %13 : vector<8x8xf32>
    %15 = math.exp %14 : vector<8x8xf32>
    %cst_12 = arith.constant dense<0.000000e+00> : vector<8xf32>
    %16 = vector.multi_reduction <add>, %15, %cst_12 [1] : vector<8x8xf32> to vector<8xf32>
    %17 = vector.shape_cast %16 : vector<8xf32> to vector<8x1xf32>
    %18 = vector.broadcast %17 : vector<8x1xf32> to vector<8x8xf32>
    %19 = arith.divf %15, %18 : vector<8x8xf32>
    %cst_13 = arith.constant dense<0.000000e+00> : vector<8x32xf32>
    %20 = tpu.matmul %19, %5, %cst_13 {dimension_numbers = #tpu.dot_dimension_numbers<[1], [0], [0], [1], [0, 0, 1, 1], [], []>} : vector<8x8xf32>, vector<8x32xf32>, vector<8x32xf32> -> vector<8x32xf32>
    %c0_14 = arith.constant 0 : index
    %c0_15 = arith.constant 0 : index
    %c0_16 = arith.constant 0 : index
    %21 = vector.load %arg5[%c0_14, %c0_15, %c0_16] : memref<1x8x32xf32, #tpu.memory_space<vmem>>, vector<1x8x32xf32>
    %22 = vector.shape_cast %21 : vector<1x8x32xf32> to vector<8x32xf32>
    %23 = vector.shape_cast %20 : vector<8x32xf32> to vector<1x8x32xf32>
    tpu.vector_store %arg5[%c0_14, %c0_15, %c0_16], %23 {strides = array<i32>} : memref<1x8x32xf32, #tpu.memory_space<vmem>>, vector<1x8x32xf32>,
    return
  }
  func.func @transform_0(%arg0: i32) -> (i32, i32, i32) {
    %c0_i32 = arith.constant 0 : i32
    %c0_i32_0 = arith.constant 0 : i32
    %c0_i32_1 = arith.constant 0 : i32
    return %arg0, %c0_i32, %c0_i32_0 : i32, i32, i32
  }
  func.func @transform_1(%arg0: i32) -> (i32, i32, i32) {
    %c0_i32 = arith.constant 0 : i32
    %c0_i32_0 = arith.constant 0 : i32
    %c0_i32_1 = arith.constant 0 : i32
    return %arg0, %c0_i32, %c0_i32_0 : i32, i32, i32
  }
  func.func @transform_2(%arg0: i32) -> (i32, i32, i32) {
    %c0_i32 = arith.constant 0 : i32
    %c0_i32_0 = arith.constant 0 : i32
    %c0_i32_1 = arith.constant 0 : i32
    return %arg0, %c0_i32, %c0_i32_0 : i32, i32, i32
  }
  func.func @transform_3(%arg0: i32) -> (i32, i32) {
    %c0_i32 = arith.constant 0 : i32
    %c0_i32_0 = arith.constant 0 : i32
    %c0_i32_1 = arith.constant 0 : i32
    return %c0_i32, %c0_i32_0 : i32, i32
  }
  func.func @transform_4(%arg0: i32) -> (i32, i32, i32) {
    %c0_i32 = arith.constant 0 : i32
    %c0_i32_0 = arith.constant 0 : i32
    %c0_i32_1 = arith.constant 0 : i32
    return %arg0, %c0_i32, %c0_i32_0 : i32, i32, i32
  }
}

module attributes {stable_mosaic.version = 11 : i64} {
  func.func @_linear_kernel(%arg0: i32, %arg1: memref<16x64xf32, #tpu.memory_space<vmem>>, %arg2: memref<64x64xf32, #tpu.memory_space<vmem>>, %arg3: memref<1x64xf32, #tpu.memory_space<vmem>>, %arg4: memref<16x64xf32, #tpu.memory_space<vmem>>) attributes {dimension_semantics = [#tpu.dimension_semantics<arbitrary>], iteration_bounds = array<i64: 1>, scalar_prefetch = 0 : i64, scratch_operands = 0 : i64, tpu.core_type = #tpu.core_type<tc>, window_params = [{pipeline_mode = #tpu.pipeline_mode<synchronous>, transform_indices = @transform_0, window_bounds = array<i64: 16, 64>}, {pipeline_mode = #tpu.pipeline_mode<synchronous>, transform_indices = @transform_1, window_bounds = array<i64: 64, 64>}, {pipeline_mode = #tpu.pipeline_mode<synchronous>, transform_indices = @transform_2, window_bounds = array<i64: 1, 64>}, {pipeline_mode = #tpu.pipeline_mode<synchronous>, transform_indices = @transform_3, window_bounds = array<i64: 16, 64>}]} {
    %c0 = arith.constant 0 : index
    %c0_0 = arith.constant 0 : index
    %0 = vector.load %arg1[%c0, %c0_0] : memref<16x64xf32, #tpu.memory_space<vmem>>, vector<16x64xf32>
    %c0_1 = arith.constant 0 : index
    %c0_2 = arith.constant 0 : index
    %1 = vector.load %arg2[%c0_1, %c0_2] : memref<64x64xf32, #tpu.memory_space<vmem>>, vector<64x64xf32>
    %cst = arith.constant dense<0.000000e+00> : vector<16x64xf32>
    %2 = tpu.matmul %0, %1, %cst {dimension_numbers = #tpu.dot_dimension_numbers<[1], [0], [0], [1], [0, 0, 1, 1], [], []>} : vector<16x64xf32>, vector<64x64xf32>, vector<16x64xf32> -> vector<16x64xf32>
    %c0_3 = arith.constant 0 : index
    %c0_4 = arith.constant 0 : index
    %3 = vector.load %arg3[%c0_3, %c0_4] : memref<1x64xf32, #tpu.memory_space<vmem>>, vector<1x64xf32>
    %4 = vector.broadcast %3 : vector<1x64xf32> to vector<16x64xf32>
    %5 = arith.addf %2, %4 : vector<16x64xf32>
    %c0_5 = arith.constant 0 : index
    %c0_6 = arith.constant 0 : index
    %6 = vector.load %arg4[%c0_5, %c0_6] : memref<16x64xf32, #tpu.memory_space<vmem>>, vector<16x64xf32>
    tpu.vector_store %arg4[%c0_5, %c0_6], %5 {strides = array<i32>} : memref<16x64xf32, #tpu.memory_space<vmem>>, vector<16x64xf32>,
    return
  }
  func.func @transform_0(%arg0: i32) -> (i32, i32) {
    %c0_i32 = arith.constant 0 : i32
    %c0_i32_0 = arith.constant 0 : i32
    %c0_i32_1 = arith.constant 0 : i32
    return %c0_i32, %c0_i32_0 : i32, i32
  }
  func.func @transform_1(%arg0: i32) -> (i32, i32) {
    %c0_i32 = arith.constant 0 : i32
    %c0_i32_0 = arith.constant 0 : i32
    %c0_i32_1 = arith.constant 0 : i32
    return %c0_i32, %c0_i32_0 : i32, i32
  }
  func.func @transform_2(%arg0: i32) -> (i32, i32) {
    %c0_i32 = arith.constant 0 : i32
    %c0_i32_0 = arith.constant 0 : i32
    %c0_i32_1 = arith.constant 0 : i32
    return %c0_i32, %c0_i32_0 : i32, i32
  }
  func.func @transform_3(%arg0: i32) -> (i32, i32) {
    %c0_i32 = arith.constant 0 : i32
    %c0_i32_0 = arith.constant 0 : i32
    %c0_i32_1 = arith.constant 0 : i32
    return %c0_i32, %c0_i32_0 : i32, i32
  }
}

module attributes {stable_mosaic.version = 11 : i64} {
  func.func @_linear_kernel(%arg0: i32, %arg1: memref<16x64xf32, #tpu.memory_space<vmem>>, %arg2: memref<64x256xf32, #tpu.memory_space<vmem>>, %arg3: memref<1x256xf32, #tpu.memory_space<vmem>>, %arg4: memref<16x256xf32, #tpu.memory_space<vmem>>) attributes {dimension_semantics = [#tpu.dimension_semantics<arbitrary>], iteration_bounds = array<i64: 1>, scalar_prefetch = 0 : i64, scratch_operands = 0 : i64, tpu.core_type = #tpu.core_type<tc>, window_params = [{pipeline_mode = #tpu.pipeline_mode<synchronous>, transform_indices = @transform_0, window_bounds = array<i64: 16, 64>}, {pipeline_mode = #tpu.pipeline_mode<synchronous>, transform_indices = @transform_1, window_bounds = array<i64: 64, 256>}, {pipeline_mode = #tpu.pipeline_mode<synchronous>, transform_indices = @transform_2, window_bounds = array<i64: 1, 256>}, {pipeline_mode = #tpu.pipeline_mode<synchronous>, transform_indices = @transform_3, window_bounds = array<i64: 16, 256>}]} {
    %c0 = arith.constant 0 : index
    %c0_0 = arith.constant 0 : index
    %0 = vector.load %arg1[%c0, %c0_0] : memref<16x64xf32, #tpu.memory_space<vmem>>, vector<16x64xf32>
    %c0_1 = arith.constant 0 : index
    %c0_2 = arith.constant 0 : index
    %1 = vector.load %arg2[%c0_1, %c0_2] : memref<64x256xf32, #tpu.memory_space<vmem>>, vector<64x256xf32>
    %cst = arith.constant dense<0.000000e+00> : vector<16x256xf32>
    %2 = tpu.matmul %0, %1, %cst {dimension_numbers = #tpu.dot_dimension_numbers<[1], [0], [0], [1], [0, 0, 1, 1], [], []>} : vector<16x64xf32>, vector<64x256xf32>, vector<16x256xf32> -> vector<16x256xf32>
    %c0_3 = arith.constant 0 : index
    %c0_4 = arith.constant 0 : index
    %3 = vector.load %arg3[%c0_3, %c0_4] : memref<1x256xf32, #tpu.memory_space<vmem>>, vector<1x256xf32>
    %4 = vector.broadcast %3 : vector<1x256xf32> to vector<16x256xf32>
    %5 = arith.addf %2, %4 : vector<16x256xf32>
    %cst_5 = arith.constant -1.702000e+00 : f32
    %6 = vector.broadcast %cst_5 : f32 to vector<16x256xf32>
    %7 = arith.mulf %6, %5 : vector<16x256xf32>
    %8 = math.exp %7 : vector<16x256xf32>
    %cst_6 = arith.constant 1.000000e+00 : f32
    %9 = vector.broadcast %cst_6 : f32 to vector<16x256xf32>
    %10 = arith.addf %9, %8 : vector<16x256xf32>
    %cst_7 = arith.constant 1.000000e+00 : f32
    %11 = vector.broadcast %cst_7 : f32 to vector<16x256xf32>
    %12 = arith.divf %11, %10 : vector<16x256xf32>
    %13 = arith.mulf %5, %12 : vector<16x256xf32>
    %c0_8 = arith.constant 0 : index
    %c0_9 = arith.constant 0 : index
    %14 = vector.load %arg4[%c0_8, %c0_9] : memref<16x256xf32, #tpu.memory_space<vmem>>, vector<16x256xf32>
    tpu.vector_store %arg4[%c0_8, %c0_9], %13 {strides = array<i32>} : memref<16x256xf32, #tpu.memory_space<vmem>>, vector<16x256xf32>,
    return
  }
  func.func @transform_0(%arg0: i32) -> (i32, i32) {
    %c0_i32 = arith.constant 0 : i32
    %c0_i32_0 = arith.constant 0 : i32
    %c0_i32_1 = arith.constant 0 : i32
    return %c0_i32, %c0_i32_0 : i32, i32
  }
  func.func @transform_1(%arg0: i32) -> (i32, i32) {
    %c0_i32 = arith.constant 0 : i32
    %c0_i32_0 = arith.constant 0 : i32
    %c0_i32_1 = arith.constant 0 : i32
    return %c0_i32, %c0_i32_0 : i32, i32
  }
  func.func @transform_2(%arg0: i32) -> (i32, i32) {
    %c0_i32 = arith.constant 0 : i32
    %c0_i32_0 = arith.constant 0 : i32
    %c0_i32_1 = arith.constant 0 : i32
    return %c0_i32, %c0_i32_0 : i32, i32
  }
  func.func @transform_3(%arg0: i32) -> (i32, i32) {
    %c0_i32 = arith.constant 0 : i32
    %c0_i32_0 = arith.constant 0 : i32
    %c0_i32_1 = arith.constant 0 : i32
    return %c0_i32, %c0_i32_0 : i32, i32
  }
}

module attributes {stable_mosaic.version = 11 : i64} {
  func.func @_linear_kernel(%arg0: i32, %arg1: memref<16x256xf32, #tpu.memory_space<vmem>>, %arg2: memref<256x64xf32, #tpu.memory_space<vmem>>, %arg3: memref<1x64xf32, #tpu.memory_space<vmem>>, %arg4: memref<16x64xf32, #tpu.memory_space<vmem>>) attributes {dimension_semantics = [#tpu.dimension_semantics<arbitrary>], iteration_bounds = array<i64: 1>, scalar_prefetch = 0 : i64, scratch_operands = 0 : i64, tpu.core_type = #tpu.core_type<tc>, window_params = [{pipeline_mode = #tpu.pipeline_mode<synchronous>, transform_indices = @transform_0, window_bounds = array<i64: 16, 256>}, {pipeline_mode = #tpu.pipeline_mode<synchronous>, transform_indices = @transform_1, window_bounds = array<i64: 256, 64>}, {pipeline_mode = #tpu.pipeline_mode<synchronous>, transform_indices = @transform_2, window_bounds = array<i64: 1, 64>}, {pipeline_mode = #tpu.pipeline_mode<synchronous>, transform_indices = @transform_3, window_bounds = array<i64: 16, 64>}]} {
    %c0 = arith.constant 0 : index
    %c0_0 = arith.constant 0 : index
    %0 = vector.load %arg1[%c0, %c0_0] : memref<16x256xf32, #tpu.memory_space<vmem>>, vector<16x256xf32>
    %c0_1 = arith.constant 0 : index
    %c0_2 = arith.constant 0 : index
    %1 = vector.load %arg2[%c0_1, %c0_2] : memref<256x64xf32, #tpu.memory_space<vmem>>, vector<256x64xf32>
    %cst = arith.constant dense<0.000000e+00> : vector<16x64xf32>
    %2 = tpu.matmul %0, %1, %cst {dimension_numbers = #tpu.dot_dimension_numbers<[1], [0], [0], [1], [0, 0, 1, 1], [], []>} : vector<16x256xf32>, vector<256x64xf32>, vector<16x64xf32> -> vector<16x64xf32>
    %c0_3 = arith.constant 0 : index
    %c0_4 = arith.constant 0 : index
    %3 = vector.load %arg3[%c0_3, %c0_4] : memref<1x64xf32, #tpu.memory_space<vmem>>, vector<1x64xf32>
    %4 = vector.broadcast %3 : vector<1x64xf32> to vector<16x64xf32>
    %5 = arith.addf %2, %4 : vector<16x64xf32>
    %c0_5 = arith.constant 0 : index
    %c0_6 = arith.constant 0 : index
    %6 = vector.load %arg4[%c0_5, %c0_6] : memref<16x64xf32, #tpu.memory_space<vmem>>, vector<16x64xf32>
    tpu.vector_store %arg4[%c0_5, %c0_6], %5 {strides = array<i32>} : memref<16x64xf32, #tpu.memory_space<vmem>>, vector<16x64xf32>,
    return
  }
  func.func @transform_0(%arg0: i32) -> (i32, i32) {
    %c0_i32 = arith.constant 0 : i32
    %c0_i32_0 = arith.constant 0 : i32
    %c0_i32_1 = arith.constant 0 : i32
    return %c0_i32, %c0_i32_0 : i32, i32
  }
  func.func @transform_1(%arg0: i32) -> (i32, i32) {
    %c0_i32 = arith.constant 0 : i32
    %c0_i32_0 = arith.constant 0 : i32
    %c0_i32_1 = arith.constant 0 : i32
    return %c0_i32, %c0_i32_0 : i32, i32
  }
  func.func @transform_2(%arg0: i32) -> (i32, i32) {
    %c0_i32 = arith.constant 0 : i32
    %c0_i32_0 = arith.constant 0 : i32
    %c0_i32_1 = arith.constant 0 : i32
    return %c0_i32, %c0_i32_0 : i32, i32
  }
  func.func @transform_3(%arg0: i32) -> (i32, i32) {
    %c0_i32 = arith.constant 0 : i32
    %c0_i32_0 = arith.constant 0 : i32
    %c0_i32_1 = arith.constant 0 : i32
    return %c0_i32, %c0_i32_0 : i32, i32
  }
}

module attributes {stable_mosaic.version = 11 : i64} {
  func.func @_logits_kernel(%arg0: i32, %arg1: memref<1xf32, #tpu.memory_space<smem>>, %arg2: memref<2x32xf32, #tpu.memory_space<vmem>>, %arg3: memref<2x32xf32, #tpu.memory_space<vmem>>, %arg4: memref<2x2xf32, #tpu.memory_space<vmem>>) attributes {dimension_semantics = [#tpu.dimension_semantics<arbitrary>], iteration_bounds = array<i64: 1>, scalar_prefetch = 0 : i64, scratch_operands = 0 : i64, tpu.core_type = #tpu.core_type<tc>, window_params = [{transform_indices = @transform_0, window_bounds = array<i64: 1>}, {pipeline_mode = #tpu.pipeline_mode<synchronous>, transform_indices = @transform_1, window_bounds = array<i64: 2, 32>}, {pipeline_mode = #tpu.pipeline_mode<synchronous>, transform_indices = @transform_2, window_bounds = array<i64: 2, 32>}, {pipeline_mode = #tpu.pipeline_mode<synchronous>, transform_indices = @transform_3, window_bounds = array<i64: 2, 2>}]} {
    %c0 = arith.constant 0 : index
    %c0_0 = arith.constant 0 : index
    %0 = vector.load %arg2[%c0, %c0_0] : memref<2x32xf32, #tpu.memory_space<vmem>>, vector<2x32xf32>
    %c0_1 = arith.constant 0 : index
    %c0_2 = arith.constant 0 : index
    %1 = vector.load %arg3[%c0_1, %c0_2] : memref<2x32xf32, #tpu.memory_space<vmem>>, vector<2x32xf32>
    %2 = arith.mulf %0, %0 : vector<2x32xf32>
    %cst = arith.constant dense<0.000000e+00> : vector<2xf32>
    %3 = vector.multi_reduction <add>, %2, %cst [1] : vector<2x32xf32> to vector<2xf32>
    %4 = vector.shape_cast %3 : vector<2xf32> to vector<2x1xf32>
    %5 = math.rsqrt %4 : vector<2x1xf32>
    %6 = vector.broadcast %5 : vector<2x1xf32> to vector<2x32xf32>
    %7 = arith.mulf %0, %6 : vector<2x32xf32>
    %8 = arith.mulf %1, %1 : vector<2x32xf32>
    %cst_3 = arith.constant dense<0.000000e+00> : vector<2xf32>
    %9 = vector.multi_reduction <add>, %8, %cst_3 [1] : vector<2x32xf32> to vector<2xf32>
    %10 = vector.shape_cast %9 : vector<2xf32> to vector<2x1xf32>
    %11 = math.rsqrt %10 : vector<2x1xf32>
    %12 = vector.broadcast %11 : vector<2x1xf32> to vector<2x32xf32>
    %13 = arith.mulf %1, %12 : vector<2x32xf32>
    %cst_4 = arith.constant dense<0.000000e+00> : vector<2x2xf32>
    %14 = tpu.matmul %7, %13, %cst_4 {dimension_numbers = #tpu.dot_dimension_numbers<[1], [1], [0], [0], [0, 0, 1, 0], [], []>} : vector<2x32xf32>, vector<2x32xf32>, vector<2x2xf32> -> vector<2x2xf32>
    %c0_5 = arith.constant 0 : index
    %15 = memref.load %arg1[%c0_5] : memref<1xf32, #tpu.memory_space<smem>>
    %16 = vector.broadcast %15 : f32 to vector<2x2xf32>
    %17 = arith.mulf %16, %14 : vector<2x2xf32>
    %c0_6 = arith.constant 0 : index
    %c0_7 = arith.constant 0 : index
    %18 = vector.load %arg4[%c0_6, %c0_7] : memref<2x2xf32, #tpu.memory_space<vmem>>, vector<2x2xf32>
    tpu.vector_store %arg4[%c0_6, %c0_7], %17 {strides = array<i32>} : memref<2x2xf32, #tpu.memory_space<vmem>>, vector<2x2xf32>,
    return
  }
  func.func @transform_0(%arg0: i32) -> i32 {
    %c0_i32 = arith.constant 0 : i32
    %c0_i32_0 = arith.constant 0 : i32
    return %c0_i32 : i32
  }
  func.func @transform_1(%arg0: i32) -> (i32, i32) {
    %c0_i32 = arith.constant 0 : i32
    %c0_i32_0 = arith.constant 0 : i32
    %c0_i32_1 = arith.constant 0 : i32
    return %c0_i32, %c0_i32_0 : i32, i32
  }
  func.func @transform_2(%arg0: i32) -> (i32, i32) {
    %c0_i32 = arith.constant 0 : i32
    %c0_i32_0 = arith.constant 0 : i32
    %c0_i32_1 = arith.constant 0 : i32
    return %c0_i32, %c0_i32_0 : i32, i32
  }
  func.func @transform_3(%arg0: i32) -> (i32, i32) {
    %c0_i32 = arith.constant 0 : i32
    %c0_i32_0 = arith.constant 0 : i32
    %c0_i32_1 = arith.constant 0 : i32
    return %c0_i32, %c0_i32_0 : i32, i32
  }
}

</mosaic_0001>

<bundles_post_ra>
// kernel: clip_forward.36
= control target key start
LH: loop header
LB: loop body
LE: loop exit
PB: predicated region body
PF: predicated region fallthrough
CT: control target
= control target key end

     0   :  { %vm19_vm0 = vcmask 523264   ;;  %vm32_vm1 = vcmask 517120   ;;  %s203_s0 = inlined_call_operand.vmem [shape: f32[34,64], index: 0, kind: input, shape index: {}]   ;;  %s204_s1 = inlined_call_operand.vmem [shape: f32[1,64], index: 1, kind: input, shape index: {}]   ;;  %s205_s2 = inlined_call_operand.vmem [shape: f32[1,64], index: 2, kind: input, shape index: {}]   ;;  %s206_s3 = inlined_call_operand.vmem [shape: f32[34,64], index: 3, kind: output, shape index: {}]  }
   0x1   :  { %v14_v0 = vld [vmem:[%s203_s0] sm:$0xff]  ;;  %v16_v1 = vld [vmem:[%s203_s0 + $0x10] sm:$0xff]  ;;  %v15_v2 = vld [vmem:[%s203_s0 + $0x8] sm:$0xff] }
   0x2   :  { %v20_v3 = vsel %vm19_vm0, %v14_v0, 0.0  ;;  %v26_v4 = vsel %vm19_vm0, %v16_v1, 0.0  ;;  %v17_v5 = vld [vmem:[%s203_s0 + $0x18] sm:$0xff]  ;;  %v23_v6 = vsel %vm19_vm0, %v15_v2, 0.0  ;;  %v18_v8 = vld [vmem:[%s203_s0 + $0x20] sm:$0x3] }
   0x3   :  { %21 = vadd.xlane.f32.xlu0 %v20_v3  ;;  %27 = vadd.xlane.f32.xlu1 %v26_v4  ;;  %v29_v7 = vsel %vm19_vm0, %v17_v5, 0.0  ;;  %v33_v9 = vsel %vm32_vm1, %v18_v8, 0.0  ;;  %v120_v51 = vld [vmem:[%s204_s1] ss:$0 sm:$0xff] }
   0x4   :  { %v121_v53 = vld [vmem:[%s205_s2] ss:$0 sm:$0xff] }
   0x7   :  { %24 = vadd.xlane.f32.xlu0 %v23_v6  ;;  %30 = vadd.xlane.f32.xlu1 %v29_v7 }
   0xb   :  { %34 = vadd.xlane.f32.xlu0 %v33_v9 }
  0x90   :  { %v22_v10 = vpop.xlane.xlu0 %21  ;;  %v28_v11 = vpop.xlane.xlu1 %27 }
  0x91   :  { %v37_v12 = vmul.f32 0.015625, %v22_v10  ;;  %v39_v13 = vmul.f32 0.015625, %v28_v11 }
  0x93   :  { %v42_v14 = vsub.f32 %v14_v0, %v37_v12  ;;  %v44_v15 = vsub.f32 %v16_v1, %v39_v13 }
  0x94   :  { %v25_v16 = vpop.xlane.xlu0 %24  ;;  %v31_v17 = vpop.xlane.xlu1 %30 }
  0x95   :  { %v38_v18 = vmul.f32 0.015625, %v25_v16  ;;  %v40_v19 = vmul.f32 0.015625, %v31_v17  ;;  %v47_v20 = vmul.f32 %v42_v14, %v42_v14  ;;  %v49_v21 = vmul.f32 %v44_v15, %v44_v15 }
  0x97   :  { %v43_v22 = vsub.f32 %v15_v2, %v38_v18  ;;  %v45_v23 = vsub.f32 %v17_v5, %v40_v19  ;;  %v52_v24 = vsel %vm19_vm0, %v47_v20, 0.0  ;;  %v58_v27 = vsel %vm19_vm0, %v49_v21, 0.0 }
  0x98   :  { %53 = vadd.xlane.f32.xlu1 %v52_v24  ;;  %v35_v25 = vpop.xlane.xlu0 %34 }
  0x99   :  { %v41_v26 = vmul.f32 0.015625, %v35_v25  ;;  %v48_v28 = vmul.f32 %v43_v22, %v43_v22  ;;  %v50_v29 = vmul.f32 %v45_v23, %v45_v23 }
  0x9b   :  { %v46_v30 = vsub.f32 %v18_v8, %v41_v26  ;;  %v55_v31 = vsel %vm19_vm0, %v48_v28, 0.0  ;;  %v61_v32 = vsel %vm19_vm0, %v50_v29, 0.0 }
  0x9c   :  { %59 = vadd.xlane.f32.xlu1 %v58_v27  ;;  %56 = vadd.xlane.f32.xlu0 %v55_v31 }
  0x9d   :  { %v51_v33 = vmul.f32 %v46_v30, %v46_v30 }
  0x9f   :  { %v64_v34 = vsel %vm32_vm1, %v51_v33, 0.0 }
  0xa0   :  { %62 = vadd.xlane.f32.xlu0 %v61_v32  ;;  %65 = vadd.xlane.f32.xlu1 %v64_v34 }
 0x125   :  { %v54_v35 = vpop.xlane.xlu1 %53 }
 0x126   :  { %v67_v36 = vmul.f32 0.015625, %v54_v35 }
 0x128   :  { %v72_v37 = vadd.f32 1e-05, %v67_v36 }
 0x129   :  { %v60_v38 = vpop.xlane.xlu1 %59  ;;  %v57_v39 = vpop.xlane.xlu0 %56 }
 0x12a   :  { %122 = vrsqrt.f32 %v72_v37  ;;  %v69_v40 = vmul.f32 0.015625, %v60_v38  ;;  %v68_v41 = vmul.f32 0.015625, %v57_v39 }
 0x12c   :  { %v74_v42 = vadd.f32 1e-05, %v69_v40  ;;  %v73_v43 = vadd.f32 1e-05, %v68_v41 }
 0x12d   :  { %v66_v44 = vpop.xlane.xlu1 %65  ;;  %v63_v45 = vpop.xlane.xlu0 %62 }
 0x12e   :  { %124 = vrsqrt.f32 %v74_v42  ;;  %v71_v46 = vmul.f32 0.015625, %v66_v44  ;;  %v70_v47 = vmul.f32 0.015625, %v63_v45 }
 0x12f   :  { %126 = vrsqrt.f32 %v73_v43 }
 0x130   :  { %v76_v48 = vadd.f32 1e-05, %v71_v46  ;;  %v75_v49 = vadd.f32 1e-05, %v70_v47 }
 0x132   :  { %128 = vrsqrt.f32 %v76_v48 }
 0x133   :  { %130 = vrsqrt.f32 %v75_v49 }
 0x134   :  { %v123_v50 = vpop.eup %122 }
 0x135   :  { %v82_v52 = vmul.f32 %v123_v50, %v42_v14 }
 0x137   :  { %v94_v54 = vmul.f32 %v120_v51, %v82_v52 }
 0x138   :  { %v125_v55 = vpop.eup %124 }
 0x139   :  { %v127_v56 = vpop.eup %126  ;;  %v106_v57 = vadd.f32 %v121_v53, %v94_v54  ;;  %v84_v58 = vmul.f32 %v125_v55, %v44_v15 }
 0x13a   :  { %v83_v59 = vmul.f32 %v127_v56, %v43_v22 }
 0x13b   :  { %111 = vst.msk [vmem:[%s206_s3] sm:$0xff] %vm19_vm0, %v106_v57  ;;  %v96_v60 = vmul.f32 %v120_v51, %v84_v58 }
 0x13c   :  { %v129_v61 = vpop.eup %128  ;;  %v95_v62 = vmul.f32 %v120_v51, %v83_v59 }
 0x13d   :  { %v131_v63 = vpop.eup %130  ;;  %v108_v0 = vadd.f32 %v121_v53, %v96_v60  ;;  %v86_v1 = vmul.f32 %v129_v61, %v46_v30 }
 0x13e   :  { %v107_v2 = vadd.f32 %v121_v53, %v95_v62  ;;  %v85_v3 = vmul.f32 %v131_v63, %v45_v23 }
 0x13f   :  { %113 = vst.msk [vmem:[%s206_s3 + $0x10] sm:$0xff] %vm19_vm0, %v108_v0  ;;  %v98_v4 = vmul.f32 %v120_v51, %v86_v1 }
 0x140   :  { %112 = vst.msk [vmem:[%s206_s3 + $0x8] sm:$0xff] %vm19_vm0, %v107_v2  ;;  %v97_v5 = vmul.f32 %v120_v51, %v85_v3 }
 0x141   :  { %v110_v6 = vadd.f32 %v121_v53, %v98_v4 }
 0x142   :  { %v109_v7 = vadd.f32 %v121_v53, %v97_v5 }
 0x143   :  { %115 = vst.msk [vmem:[%s206_s3 + $0x20] sm:$0x3] %vm32_vm1, %v110_v6 }
 0x144   :  { %114 = vst.msk [vmem:[%s206_s3 + $0x18] sm:$0xff] %vm19_vm0, %v109_v7 }

// kernel: clip_forward.35
= control target key start
LH: loop header
LB: loop body
LE: loop exit
PB: predicated region body
PF: predicated region fallthrough
CT: control target
= control target key end

     0   :  { %v225_v0 = vmov 0.0|0.0   ;;  %vm53_vm0 = vcmask 523264   ;;  %s389_s1 = inlined_call_operand.vmem [shape: f32[192,64], index: 1, kind: input, shape index: {}]   ;;  %s390_s0 = inlined_call_operand.vmem [shape: f32[32,192], index: 0, kind: input, shape index: {}]   ;;  %s391_s2 = inlined_call_operand.vmem [shape: f32[1,64], index: 2, kind: input, shape index: {}]   ;;  %s392_s3 = inlined_call_operand.vmem [shape: f32[32,64], index: 3, kind: output, shape index: {}]  }
   0x1   :  { %164 = vmatprep.subr.bf16.mxu0 %v225_v0  ;;  %200 = vmatprep.subr.bf16.mxu1 %v225_v0  ;;  %v22_v1 = vld [vmem:[%s389_s1] sm:$0xff]  ;;  %v23_v2 = vld [vmem:[%s389_s1 + $0x8] sm:$0xff]  ;;  %v24_v3 = vld [vmem:[%s389_s1 + $0x10] sm:$0xff] }
   0x2   :  { %v165_v4 = vpack.c.bf16 %v23_v2, %v22_v1  ;;  %v25_v5 = vld [vmem:[%s389_s1 + $0x18] sm:$0xff]  ;;  %v26_v7 = vld [vmem:[%s389_s1 + $0x20] sm:$0xff]  ;;  %v27_v8 = vld [vmem:[%s389_s1 + $0x28] sm:$0xff] }
   0x3   :  { %v168_v6 = vpack.c.bf16 %v25_v5, %v24_v3  ;;  %v171_v9 = vpack.c.bf16 %v27_v8, %v26_v7  ;;  %v28_v10 = vld [vmem:[%s389_s1 + $0x30] sm:$0xff]  ;;  %v29_v11 = vld [vmem:[%s389_s1 + $0x38] sm:$0xff]  ;;  %v15_v12 = vld [vmem:[%s390_s0 + $0x8] sm:$0xff] }
   0x4   :  { %166 = vmatpush1.bf16.msra.mxu0 %v165_v4  ;;  %212 = vmatpush1.bf16.msra.mxu1 %v165_v4  ;;  %v19_v13 = vld [vmem:[%s390_s0 + $0x28] sm:$0xff]  ;;  %v174_v14 = vpack.c.bf16 %v29_v11, %v28_v10  ;;  %v30_v15 = vld [vmem:[%s389_s1 + $0x40] sm:$0xff]  ;;  %v32_v18 = vld [vmem:[%s389_s1 + $0x50] sm:$0xff] }
   0x5   :  { %167 = vmatprep.subr.bf16.mxu0 %v225_v0  ;;  %201 = vmatprep.subr.bf16.mxu1 %v225_v0  ;;  %v31_v16 = vld [vmem:[%s389_s1 + $0x48] sm:$0xff]  ;;  %v33_v19 = vld [vmem:[%s389_s1 + $0x58] sm:$0xff]  ;;  %v34_v21 = vld [vmem:[%s389_s1 + $0x60] sm:$0xff] }
   0x6   :  { %160 = vmatprep.mubr.msk.f32.mxu0 %vm53_vm0, %v15_v12  ;;  %162 = vmatprep.mubr.msk.f32.mxu1 %vm53_vm0, %v19_v13  ;;  %v177_v17 = vpack.c.bf16 %v31_v16, %v30_v15  ;;  %v180_v20 = vpack.c.bf16 %v33_v19, %v32_v18  ;;  %v35_v22 = vld [vmem:[%s389_s1 + $0x68] sm:$0xff]  ;;  %v36_v24 = vld [vmem:[%s389_s1 + $0x70] sm:$0xff]  ;;  %v37_v25 = vld [vmem:[%s389_s1 + $0x78] sm:$0xff] }
   0x7   :  { %v183_v23 = vpack.c.bf16 %v35_v22, %v34_v21  ;;  %v186_v26 = vpack.c.bf16 %v37_v25, %v36_v24  ;;  %v38_v27 = vld [vmem:[%s389_s1 + $0x80] sm:$0xff]  ;;  %v39_v28 = vld [vmem:[%s389_s1 + $0x88] sm:$0xff]  ;;  %v40_v30 = vld [vmem:[%s389_s1 + $0x90] sm:$0xff] }
   0x8   :  { %169 = vmatpush1.bf16.msra.mxu0 %v168_v6  ;;  %213 = vmatpush1.bf16.msra.mxu1 %v168_v6  ;;  %v189_v29 = vpack.c.bf16 %v39_v28, %v38_v27  ;;  %v41_v31 = vld [vmem:[%s389_s1 + $0x98] sm:$0xff]  ;;  %v42_v33 = vld [vmem:[%s389_s1 + $0xa0] sm:$0xff]  ;;  %v43_v34 = vld [vmem:[%s389_s1 + $0xa8] sm:$0xff] }
   0x9   :  { %170 = vmatprep.subr.bf16.mxu0 %v225_v0  ;;  %202 = vmatprep.subr.bf16.mxu1 %v225_v0  ;;  %v192_v32 = vpack.c.bf16 %v41_v31, %v40_v30  ;;  %v195_v35 = vpack.c.bf16 %v43_v34, %v42_v33  ;;  %v44_v36 = vld [vmem:[%s389_s1 + $0xb0] sm:$0xff]  ;;  %v45_v37 = vld [vmem:[%s389_s1 + $0xb8] sm:$0xff]  ;;  %v14_v39 = vld [vmem:[%s390_s0] sm:$0xff] }
   0xa   :  { %v198_v38 = vpack.c.bf16 %v45_v37, %v44_v36  ;;  %v18_v40 = vld [vmem:[%s390_s0 + $0x20] sm:$0xff]  ;;  %v17_v41 = vld [vmem:[%s390_s0 + $0x18] sm:$0xff]  ;;  %v16_v43 = vld [vmem:[%s390_s0 + $0x10] sm:$0xff] }
   0xb   :  { %v21_v42 = vld [vmem:[%s390_s0 + $0x38] sm:$0xff]  ;;  %v20_v44 = vld [vmem:[%s390_s0 + $0x30] sm:$0xff]  ;;  %v159_v45 = vld [vmem:[%s391_s2] ss:$0 sm:$0xff] }
   0xc   :  { %172 = vmatpush1.bf16.msra.mxu0 %v171_v9  ;;  %214 = vmatpush1.bf16.msra.mxu1 %v171_v9 }
   0xd   :  { %173 = vmatprep.subr.bf16.mxu0 %v225_v0  ;;  %203 = vmatprep.subr.bf16.mxu1 %v225_v0 }
  0x10   :  { %175 = vmatpush1.bf16.msra.mxu0 %v174_v14  ;;  %215 = vmatpush1.bf16.msra.mxu1 %v174_v14 }
  0x11   :  { %176 = vmatprep.subr.bf16.mxu0 %v225_v0  ;;  %204 = vmatprep.subr.bf16.mxu1 %v225_v0 }
  0x14   :  { %178 = vmatpush1.bf16.msra.mxu0 %v177_v17  ;;  %216 = vmatpush1.bf16.msra.mxu1 %v177_v17 }
  0x15   :  { %179 = vmatprep.subr.bf16.mxu0 %v225_v0  ;;  %205 = vmatprep.subr.bf16.mxu1 %v225_v0 }
  0x18   :  { %181 = vmatpush1.bf16.msra.mxu0 %v180_v20  ;;  %217 = vmatpush1.bf16.msra.mxu1 %v180_v20 }
  0x19   :  { %182 = vmatprep.subr.bf16.mxu0 %v225_v0  ;;  %206 = vmatprep.subr.bf16.mxu1 %v225_v0 }
  0x1c   :  { %184 = vmatpush1.bf16.msra.mxu0 %v183_v23  ;;  %218 = vmatpush1.bf16.msra.mxu1 %v183_v23 }
  0x1d   :  { %185 = vmatprep.subr.bf16.mxu0 %v225_v0  ;;  %207 = vmatprep.subr.bf16.mxu1 %v225_v0 }
  0x20   :  { %187 = vmatpush1.bf16.msra.mxu0 %v186_v26  ;;  %219 = vmatpush1.bf16.msra.mxu1 %v186_v26 }
  0x21   :  { %188 = vmatprep.subr.bf16.mxu0 %v225_v0  ;;  %208 = vmatprep.subr.bf16.mxu1 %v225_v0 }
  0x24   :  { %190 = vmatpush1.bf16.msra.mxu0 %v189_v29  ;;  %220 = vmatpush1.bf16.msra.mxu1 %v189_v29 }
  0x25   :  { %191 = vmatprep.subr.bf16.mxu0 %v225_v0  ;;  %209 = vmatprep.subr.bf16.mxu1 %v225_v0 }
  0x28   :  { %193 = vmatpush1.bf16.msra.mxu0 %v192_v32  ;;  %221 = vmatpush1.bf16.msra.mxu1 %v192_v32 }
  0x29   :  { %194 = vmatprep.subr.bf16.mxu0 %v225_v0  ;;  %210 = vmatprep.subr.bf16.mxu1 %v225_v0 }
  0x2c   :  { %196 = vmatpush1.bf16.msra.mxu0 %v195_v35  ;;  %222 = vmatpush1.bf16.msra.mxu1 %v195_v35 }
  0x2d   :  { %197 = vmatprep.subr.bf16.mxu0 %v225_v0  ;;  %211 = vmatprep.subr.bf16.mxu1 %v225_v0 }
  0x30   :  { %199 = vmatpush1.bf16.msra.mxu0 %v198_v38  ;;  %223 = vmatpush1.bf16.msra.mxu1 %v198_v38 }
  0x33   :  { %131 = vmatmul.mubr.f32.vlgmr.msra.gmra.mrb[0].mxu0 %v14_v39  ;;  %141 = vmatmul.mubr.f32.vlgmr.msra.gmra.mrb[0].mxu1 %v18_v40 }
  0x34   :  { %161 = vmatprep.mubr.msk.f32.mxu0 %vm53_vm0, %v17_v41  ;;  %163 = vmatprep.mubr.msk.f32.mxu1 %vm53_vm0, %v21_v42 }
  0x37   :  { %136 = vmatmul.mubr.f32.gmra.mrb[2].mxu0 %v16_v43  ;;  %146 = vmatmul.mubr.f32.gmra.mrb[2].mxu1 %v20_v44 }
 0x106   :  { %v132_v46 = vpop.f32.mrb[0].mxu0  ;;  %v142_v47 = vpop.f32.mrb[0].mxu1 }
 0x107   :  { %v133_v48 = vadd.f32 %v159_v45, %v132_v46  ;;  %v143_v49 = vadd.f32 %v159_v45, %v142_v47  ;;  %v134_v50 = vpop.f32.mrb[1].mxu0  ;;  %v144_v51 = vpop.f32.mrb[1].mxu1 }
 0x109   :  { %151 = vst.msk [vmem:[%s392_s3] sm:$0xff] %vm53_vm0, %v133_v48  ;;  %153 = vst.msk [vmem:[%s392_s3 + $0x10] sm:$0xff] %vm53_vm0, %v143_v49 }
 0x10a   :  { %v137_v52 = vpop.f32.mrb[2].mxu0  ;;  %v147_v53 = vpop.f32.mrb[2].mxu1 }
 0x10b   :  { %v138_v54 = vadd.f32 %v159_v45, %v137_v52  ;;  %v148_v55 = vadd.f32 %v159_v45, %v147_v53  ;;  %v139_v56 = vpop.f32.mrb[3].mxu0  ;;  %v149_v57 = vpop.f32.mrb[3].mxu1 }
 0x10d   :  { %152 = vst.msk [vmem:[%s392_s3 + $0x8] sm:$0xff] %vm53_vm0, %v138_v54  ;;  %154 = vst.msk [vmem:[%s392_s3 + $0x18] sm:$0xff] %vm53_vm0, %v148_v55 }

// kernel: clip_forward.38
= control target key start
LH: loop header
LB: loop body
LE: loop exit
PB: predicated region body
PF: predicated region fallthrough
CT: control target
= control target key end

     0   :  { %v203_v3 = vmov 0.0   ;;  %vm47_vm0 = vcmask 523264   ;;  %v37_v30 = vlaneseq  ;;  %vm167_vm1 = vcmask 517120   ;;  %s329_s1 = inlined_call_operand.vmem [shape: f32[64,192], index: 1, kind: input, shape index: {}]   ;;  %s330_s0 = inlined_call_operand.vmem [shape: f32[34,64], index: 0, kind: input, shape index: {}]   ;;  %s331_s2 = inlined_call_operand.vmem [shape: f32[1,192], index: 2, kind: input, shape index: {}]   ;;  %s332_s3 = inlined_call_operand.vmem [shape: f32[34,192], index: 3, kind: output, shape index: {}]  }
   0x1   :  { %v20_v0 = vld [vmem:[%s329_s1 + $0x8] sm:$0xff]  ;;  %v22_v1 = vld [vmem:[%s329_s1 + $0x18] sm:$0xff]  ;;  %v19_v2 = vld [vmem:[%s329_s1] sm:$0xff]  ;;  %127 = vmatprep.mubr.f32.mxu0 %v203_v3  ;;  %145 = vmatprep.mubr.f32.mxu1 %v203_v3 }
   0x2   :  { %v178_v4 = vpack.c.bf16 %v22_v1, %v20_v0  ;;  %v21_v5 = vld [vmem:[%s329_s1 + $0x10] sm:$0xff]  ;;  %v24_v6 = vld [vmem:[%s329_s1 + $0x28] sm:$0xff]  ;;  %v26_v7 = vld [vmem:[%s329_s1 + $0x38] sm:$0xff]  ;;  %v38_v31 = vshrl.u32 %v37_v30, 7 }
   0x3   :  { %v180_v8 = vpack.c.bf16 %v21_v5, %v19_v2  ;;  %v182_v9 = vpack.c.bf16 %v26_v7, %v24_v6  ;;  %v23_v10 = vld [vmem:[%s329_s1 + $0x20] sm:$0xff]  ;;  %v25_v11 = vld [vmem:[%s329_s1 + $0x30] sm:$0xff]  ;;  %v28_v12 = vld [vmem:[%s329_s1 + $0x48] sm:$0xff] }
   0x4   :  { %179 = vmatprep.subr.bf16.mxu0 %v178_v4  ;;  %194 = vmatprep.subr.bf16.mxu1 %v178_v4  ;;  %v30_v13 = vld [vmem:[%s329_s1 + $0x58] sm:$0xff]  ;;  %v184_v14 = vpack.c.bf16 %v25_v11, %v23_v10  ;;  %v27_v16 = vld [vmem:[%s329_s1 + $0x40] sm:$0xff]  ;;  %v29_v17 = vld [vmem:[%s329_s1 + $0x50] sm:$0xff]  ;;  %v39_v32 = vsub.s32 0, %v38_v31  ;;  %v43_v34 = vsub.s32 1, %v38_v31 }
   0x5   :  { %181 = vmatpush1.bf16.msra.mxu0 %v180_v8  ;;  %198 = vmatpush1.bf16.msra.mxu1 %v180_v8  ;;  %v186_v15 = vpack.c.bf16 %v30_v13, %v28_v12  ;;  %v32_v18 = vld [vmem:[%s329_s1 + $0x68] sm:$0xff]  ;;  %v34_v19 = vld [vmem:[%s329_s1 + $0x78] sm:$0xff]  ;;  %v188_v20 = vpack.c.bf16 %v29_v17, %v27_v16  ;;  %v31_v22 = vld [vmem:[%s329_s1 + $0x60] sm:$0xff] }
   0x6   :  { %183 = vmatprep.subr.bf16.mxu0 %v182_v9  ;;  %195 = vmatprep.subr.bf16.mxu1 %v182_v9  ;;  %v190_v21 = vpack.c.bf16 %v34_v19, %v32_v18  ;;  %v33_v23 = vld [vmem:[%s329_s1 + $0x70] sm:$0xff]  ;;  %v14_v25 = vld [vmem:[%s330_s0] sm:$0xff]  ;;  %v17_v26 = vld [vmem:[%s330_s0 + $0x18] sm:$0xff] }
   0x7   :  { %v192_v24 = vpack.c.bf16 %v33_v23, %v31_v22  ;;  %v15_v27 = vld [vmem:[%s330_s0 + $0x8] sm:$0xff]  ;;  %v18_v28 = vld [vmem:[%s330_s0 + $0x20] sm:$0x3]  ;;  %v16_v29 = vld [vmem:[%s330_s0 + $0x10] sm:$0xff] }
   0x8   :  { %v35_v33 = vld [vmem:[%s331_s2] sm:$0x3] }
   0x9   :  { %185 = vmatpush1.bf16.msra.mxu0 %v184_v14  ;;  %199 = vmatpush1.bf16.msra.mxu1 %v184_v14  ;;  %v40_v35 = vrot.slane %v35_v33, %v39_v32  ;;  %v44_v36 = vrot.slane %v35_v33, %v43_v34 }
   0xa   :  { %187 = vmatprep.subr.bf16.mxu0 %v186_v15  ;;  %196 = vmatprep.subr.bf16.mxu1 %v186_v15 }
   0xd   :  { %189 = vmatpush1.bf16.msra.mxu0 %v188_v20  ;;  %200 = vmatpush1.bf16.msra.mxu1 %v188_v20 }
   0xe   :  { %191 = vmatprep.subr.bf16.mxu0 %v190_v21  ;;  %197 = vmatprep.subr.bf16.mxu1 %v190_v21 }
  0x11   :  { %193 = vmatpush1.bf16.msra.mxu0 %v192_v24  ;;  %201 = vmatpush1.bf16.msra.mxu1 %v192_v24 }
  0x14   :  { %173 = vmatmul.mubr.msk.f32.vlgmr.msra.gmra.mrb[0].mxu0 %vm47_vm0, %v14_v25  ;;  %176 = vmatmul.mubr.msk.f32.vlgmr.msra.gmra.mrb[0].mxu1 %vm47_vm0, %v17_v26 }
  0x15   :  { %133 = vmatprep.mubr.f32.mxu0 %v203_v3  ;;  %151 = vmatprep.mubr.f32.mxu1 %v203_v3 }
  0x18   :  { %174 = vmatmul.mubr.msk.f32.gmra.mrb[2].mxu0 %vm47_vm0, %v15_v27  ;;  %177 = vmatmul.mubr.msk.f32.gmra.mrb[2].mxu1 %vm47_vm0, %v18_v28 }
  0x19   :  { %139 = vmatprep.mubr.f32.mxu0 %v203_v3 }
  0x1c   :  { %175 = vmatmul.mubr.msk.f32.gmra.mrb[4].mxu0 %vm47_vm0, %v16_v29 }
  0xe7   :  { %v129_v37 = vpop.f32.mrb[0].mxu0  ;;  %v147_v38 = vpop.f32.mrb[0].mxu1 }
  0xe8   :  { %v130_v39 = vadd.f32 %v129_v37, %v40_v35  ;;  %v131_v40 = vpop.f32.mrb[1].mxu0  ;;  %v148_v41 = vadd.f32 %v147_v38, %v40_v35  ;;  %v149_v42 = vpop.f32.mrb[1].mxu1 }
  0xe9   :  { %v132_v43 = vadd.f32 %v131_v40, %v44_v36  ;;  %v150_v44 = vadd.f32 %v149_v42, %v44_v36 }
  0xea   :  { %158 = vst [vmem:[%s332_s3] sm:$0xff] %v130_v39  ;;  %164 = vst [vmem:[%s332_s3 + $0x30] sm:$0xff] %v148_v41 }
  0xeb   :  { %159 = vst.msk [vmem:[%s332_s3 + $0x8] sm:$0xff] %vm47_vm0, %v132_v43  ;;  %v135_v45 = vpop.f32.mrb[2].mxu0  ;;  %165 = vst.msk [vmem:[%s332_s3 + $0x38] sm:$0xff] %vm47_vm0, %v150_v44  ;;  %v153_v46 = vpop.f32.mrb[2].mxu1 }
  0xec   :  { %v136_v47 = vadd.f32 %v135_v45, %v40_v35  ;;  %v137_v48 = vpop.f32.mrb[3].mxu0  ;;  %v154_v49 = vadd.f32 %v153_v46, %v40_v35  ;;  %v155_v50 = vpop.f32.mrb[3].mxu1 }
  0xed   :  { %v138_v51 = vadd.f32 %v137_v48, %v44_v36  ;;  %v156_v52 = vadd.f32 %v155_v50, %v44_v36 }
  0xee   :  { %160 = vst [vmem:[%s332_s3 + $0x10] sm:$0xff] %v136_v47  ;;  %166 = vst [vmem:[%s332_s3 + $0x40] sm:$0x3] %v154_v49 }
  0xef   :  { %161 = vst.msk [vmem:[%s332_s3 + $0x18] sm:$0xff] %vm47_vm0, %v138_v51  ;;  %v141_v53 = vpop.f32.mrb[4].mxu0 }
  0xf0   :  { %168 = vst.msk [vmem:[%s332_s3 + $0x48] sm:$0x3] %vm167_vm1, %v156_v52  ;;  %v142_v54 = vadd.f32 %v141_v53, %v40_v35  ;;  %v143_v55 = vpop.f32.mrb[5].mxu0 }
  0xf1   :  { %v144_v56 = vadd.f32 %v143_v55, %v44_v36 }
  0xf2   :  { %162 = vst [vmem:[%s332_s3 + $0x20] sm:$0xff] %v142_v54 }
  0xf3   :  { %163 = vst.msk [vmem:[%s332_s3 + $0x28] sm:$0xff] %vm47_vm0, %v144_v56 }

// kernel: clip_forward.39
= control target key start
LH: loop header
LB: loop body
LE: loop exit
PB: predicated region body
PF: predicated region fallthrough
CT: control target
= control target key end

     0   :  { %s696_s15 = smov 0   ;;  %s765_s0 = inlined_call_operand.vmem [shape: f32[2,17,64], index: 0, kind: input, shape index: {}]   ;;  %s766_s1 = inlined_call_operand.vmem [shape: f32[2,17,64], index: 1, kind: input, shape index: {}]   ;;  %s767_s2 = inlined_call_operand.vmem [shape: f32[2,17,64], index: 2, kind: input, shape index: {}]   ;;  %s768_s3 = inlined_call_operand.vmem [shape: f32[17,17], index: 3, kind: input, shape index: {}]   ;;  %s769_s4 = inlined_call_operand.vmem [shape: f32[2,17,64], index: 4, kind: output, shape index: {}]  }
   0x1 LB: > { %s566_s16 = sadd.s32 4294967295, %s666_s15   ;;  %p570_p0 = scmp.ge.s32.totalorder %s666_s15, 1  ;;  %s666_s15 = sphi %s696_s15, %s14_s15  }
   0x2   : > { %p182_p1 = scmp.lt.s32.totalorder %s666_s15, 3 }
   0x4   : > { %p183_p2 = pnand %p570_p0, %p182_p1 }
   0x5   : > { %p218_p3 = scmp.lt.s32.totalorder (!%p183_p2), %s566_s16, 1  ;;  %v668_v0 = vmov (!%p183_p2), 0.0|0.0   ;;  %vm669_vm0 = vmmov (!%p183_p2), 0   ;;  %v670_v1 = vmov (!%p183_p2), 0.0   ;;  %vm247_vm1 = vcmask (!%p183_p2), 523264   ;;  %v349_v10 = vld [vmem:[%s768_s3] sm:$0xff] (!%p183_p2) }
   0x6   : > { %186 = sbr.rel (%p183_p2) target bundleno = 782 (0x30e), region = 36  ;;  %629 = vmatprep.subr.bf16.mxu0 (!%p183_p2), %v668_v0  ;;  %605 = vmatprep.mubr.msk.f32.mxu0 (!%p183_p2), %vm669_vm0, %v670_v1  ;;  %vm631_vm2 = vmpackc.low (!%p183_p2), %vm247_vm1, %vm247_vm1  ;;  %vm355_vm3 = vcmask (!%p183_p2), 138240   ;;  %v350_v15 = vld [vmem:[%s768_s3 + $0x8] sm:$0xff] (!%p183_p2)  ;;  %v351_v21 = vld [vmem:[%s768_s3 + $0x10] sm:$0x1] (!%p183_p2)  ;;  %vm362_vm4 = vcmask (!%p183_p2), 131072  }
   0x7   : > { %633 = vmatprep.subr.bf16.mxu1 (!%p183_p2), %v668_v0  ;;  %620 = vmatprep.mubr.msk.f32.mxu1 (!%p183_p2), %vm669_vm0, %v670_v1  ;;  %vm399_vm5 = vcmask (!%p183_p2), 1040384   ;;  %vm485_vm6 = vcmask (!%p183_p2), 516096  }
   0xd   : > { %s771_s16 = smov (!%p218_p3, %s566_s16), 1 }
   0xe   : > { %s708_s17 = smul.u32 24, %s771_s16 }
  0x10   : > { %s227_s20 = scalar_lea.vmem %s766_s1, %s708_s17  ;;  %s222_s23 = scalar_lea.vmem %s765_s0, %s708_s17 }
  0x11   : > { %v241_v2 = vld [vmem:[%s227_s20] sm:$0xff]  ;;  %v242_v3 = vld [vmem:[%s227_s20 + $0x8] sm:$0xff]  ;;  %v243_v5 = vld [vmem:[%s227_s20 + $0x10] sm:$0x1]  ;;  %s232_s6 = scalar_lea.vmem %s767_s2, %s708_s17  ;;  %s237_s9 = scalar_lea.vmem %s769_s4, %s708_s17 }
  0x12   : > { %v630_v4 = vpack.c.bf16 %v242_v3, %v241_v2  ;;  %v238_v6 = vld [vmem:[%s222_s23] sm:$0xff]  ;;  %v239_v7 = vld [vmem:[%s222_s23 + $0x8] sm:$0xff]  ;;  %v240_v8 = vld [vmem:[%s222_s23 + $0x10] sm:$0x1] }
  0x13   : > { %v244_v42 = vld [vmem:[%s232_s6] sm:$0xff]  ;;  %v245_v43 = vld [vmem:[%s232_s6 + $0x8] sm:$0xff]  ;;  %v246_v45 = vld [vmem:[%s232_s6 + $0x10] sm:$0x1] }
  0x14   : > { %632 = vmatpush3.bf16.xpose.msk.msra.mxu0 %vm631_vm2, %v630_v4  ;;  %v634_v44 = vpack.c.bf16 %v245_v43, %v244_v42 }
  0x15   : > { %603 = vmatprep.subr.mxu0 %v670_v1 }
  0x16   : > { %635 = vmatpush3.bf16.msra.mxu1 %v634_v44 }
  0x17   : > { %618 = vmatprep.subr.mxu1 %v670_v1 }
  0x1a   : > { %619 = vmatpush3.msk.msra.mxu1 %vm399_vm5, %v246_v45 }
  0x1c   : > { %604 = vmatpush3.xpose.msk.msra.mxu0 %vm247_vm1, %v243_v5 }
  0x1f   : > { %606 = vmatmul.mubr.msk.f32.vlgmr.msra.gmra.mrb[0].mxu0 %vm247_vm1, %v238_v6 }
  0x20   : > { %608 = vmatprep.mubr.msk.f32.mxu0 %vm669_vm0, %v670_v1 }
  0x23   : > { %609 = vmatmul.mubr.msk.f32.gmra.mrb[2].mxu0 %vm247_vm1, %v239_v7 }
  0x24   : > { %611 = vmatprep.mubr.msk.f32.mxu0 %vm669_vm0, %v670_v1 }
  0x27   : > { %612 = vmatmul.mubr.msk.f32.gmra.mrb[4].mxu0 %vm247_vm1, %v240_v8 }
  0xf2   : > { %v332_v9 = vpop.f32.mrb[0].mxu0 }
  0xf3   : > { %v346_v11 = vmul.f32 0.125, %v332_v9  ;;  %v607_v12 = vpop.f32.mrb[1].mxu0 }
  0xf5   : > { %v352_v13 = vadd.f32 %v349_v10, %v346_v11 }
  0xf6   : > { %v337_v14 = vpop.f32.mrb[2].mxu0 }
  0xf7   : > { %v347_v16 = vmul.f32 0.125, %v337_v14  ;;  %v610_v17 = vpop.f32.mrb[3].mxu0  ;;  %v356_v18 = vsel %vm355_vm3, %v352_v13, -inf }
  0xf8   : > { %357 = vmax.xlane.f32.xlu0 %v356_v18 }
  0xf9   : > { %v353_v19 = vadd.f32 %v350_v15, %v347_v16 }
  0xfa   : > { %v342_v20 = vpop.f32.mrb[4].mxu0 }
  0xfb   : > { %v348_v22 = vmul.f32 0.125, %v342_v20  ;;  %v613_v23 = vpop.f32.mrb[5].mxu0  ;;  %v359_v24 = vsel %vm355_vm3, %v353_v19, -inf }
  0xfc   : > { %360 = vmax.xlane.f32.xlu0 %v359_v24 }
  0xfd   : > { %v354_v25 = vadd.f32 %v351_v21, %v348_v22 }
  0xff   : > { %v363_v26 = vsel %vm362_vm4, %v354_v25, -inf }
 0x100   : > { %364 = vmax.xlane.f32.xlu1 %v363_v26 }
 0x185   : > { %v358_v27 = vpop.xlane.xlu0 %357 }
 0x186   : > { %v366_v28 = vsub.f32 %v352_v13, %v358_v27 }
 0x188   : > { %v369_v29 = vmul.f32 1.442695, %v366_v28 }
 0x189   : > { %v361_v30 = vpop.xlane.xlu0 %360 }
 0x18a   : > { %648 = vpow2.f32 %v369_v29  ;;  %v367_v31 = vsub.f32 %v353_v19, %v361_v30 }
 0x18c   : > { %v371_v32 = vmul.f32 1.442695, %v367_v31 }
 0x18d   : > { %v365_v33 = vpop.xlane.xlu1 %364 }
 0x18e   : > { %650 = vpow2.f32 %v371_v32  ;;  %v368_v34 = vsub.f32 %v354_v25, %v365_v33 }
 0x190   : > { %v373_v35 = vmul.f32 1.442695, %v368_v34 }
 0x192   : > { %652 = vpow2.f32 %v373_v35 }
 0x194   : > { %v649_v36 = vpop.eup %648 }
 0x195   : > { %v375_v37 = vsel %vm355_vm3, %v649_v36, 0.0 }
 0x196   : > { %376 = vadd.xlane.f32.xlu1 %v375_v37 }
 0x198   : > { %v651_v38 = vpop.eup %650 }
 0x199   : > { %v378_v39 = vsel %vm355_vm3, %v651_v38, 0.0 }
 0x19a   : > { %379 = vadd.xlane.f32.xlu0 %v378_v39 }
 0x19c   : > { %v653_v40 = vpop.eup %652 }
 0x19d   : > { %v381_v41 = vsel %vm362_vm4, %v653_v40, 0.0 }
 0x19e   : > { %382 = vadd.xlane.f32.xlu1 %v381_v41 }
 0x223   : > { %v377_v46 = vpop.xlane.xlu1 %376 }
 0x224   : > { %654 = vrcp.f32 %v377_v46 }
 0x227   : > { %v380_v47 = vpop.xlane.xlu0 %379 }
 0x228   : > { %656 = vrcp.f32 %v380_v47 }
 0x22b   : > { %v383_v48 = vpop.xlane.xlu1 %382 }
 0x22c   : > { %658 = vrcp.f32 %v383_v48 }
 0x22e   : > { %v655_v49 = vpop.eup %654 }
 0x22f   : > { %v385_v50 = vmul.f32 %v655_v49, %v649_v36 }
 0x231   : > { %621 = vmatmul.mubr.msk.f32.vlgmr.msra.gmra.mrb[0].mxu1 %vm355_vm3, %v385_v50 }
 0x232   : > { %v657_v51 = vpop.eup %656  ;;  %623 = vmatprep.mubr.msk.f32.mxu1 %vm669_vm0, %v670_v1 }
 0x233   : > { %v387_v52 = vmul.f32 %v657_v51, %v651_v38 }
 0x235   : > { %624 = vmatmul.mubr.msk.f32.gmra.mrb[2].mxu1 %vm355_vm3, %v387_v52 }
 0x236   : > { %v659_v53 = vpop.eup %658  ;;  %626 = vmatprep.mubr.msk.f32.mxu1 %vm669_vm0, %v670_v1 }
 0x237   : > { %v389_v54 = vmul.f32 %v659_v53, %v653_v40 }
 0x239   : > { %627 = vmatmul.mubr.msk.f32.gmra.mrb[4].mxu1 %vm355_vm3, %v389_v54 }
 0x304   : > { %v469_v55 = vpop.f32.mrb[0].mxu1 }
 0x305   : > { %483 = vst.msk [vmem:[%s237_s9] sm:$0xff] %vm247_vm1, %v469_v55  ;;  %v622_v56 = vpop.f32.mrb[1].mxu1 }
 0x308   : > { %v474_v57 = vpop.f32.mrb[2].mxu1 }
 0x309   : > { %484 = vst.msk [vmem:[%s237_s9 + $0x8] sm:$0xff] %vm247_vm1, %v474_v57  ;;  %v625_v58 = vpop.f32.mrb[3].mxu1 }
 0x30c   : > { %v479_v59 = vpop.f32.mrb[4].mxu1 }
 0x30d   : > { %486 = vst.msk [vmem:[%s237_s9 + $0x10] sm:$0x1] %vm485_vm6, %v479_v59  ;;  %v628_v60 = vpop.f32.mrb[5].mxu1 }
 0x30e PF: > { %s14_s15 = sadd.s32 1, %s666_s15  }
 0x30f   : > { %p11_p4 = scmp.ge.s32.totalorder %s14_s15, 4  }
 0x311   :  { %13 = sbr.rel (!%p11_p4) target bundleno = 1 (0x1), region = 72 }

// kernel: clip_forward.40
= control target key start
LH: loop header
LB: loop body
LE: loop exit
PB: predicated region body
PF: predicated region fallthrough
CT: control target
= control target key end

     0   :  { %v223_v0 = vmov 0.0|0.0   ;;  %vm224_vm0 = vmmov 0   ;;  %v225_v6 = vmov 0.0   ;;  %vm34_vm1 = vcmask 523264   ;;  %s317_s1 = inlined_call_operand.vmem [shape: f32[64,64], index: 1, kind: input, shape index: {}]   ;;  %s318_s0 = inlined_call_operand.vmem [shape: f32[34,64], index: 0, kind: input, shape index: {}]   ;;  %s319_s2 = inlined_call_operand.vmem [shape: f32[1,64], index: 2, kind: input, shape index: {}]   ;;  %s320_s3 = inlined_call_operand.vmem [shape: f32[34,64], index: 3, kind: output, shape index: {}]  }
   0x1   :  { %200 = vmatprep.subr.bf16.mxu0 %v223_v0  ;;  %v19_v1 = vld [vmem:[%s317_s1] sm:$0xff]  ;;  %v20_v2 = vld [vmem:[%s317_s1 + $0x8] sm:$0xff]  ;;  %212 = vmatprep.subr.bf16.mxu1 %v223_v0  ;;  %v21_v3 = vld [vmem:[%s317_s1 + $0x10] sm:$0xff]  ;;  %vm144_vm2 = vcmask 517120  }
   0x2   :  { %v201_v4 = vpack.c.bf16 %v20_v2, %v19_v1  ;;  %v22_v5 = vld [vmem:[%s317_s1 + $0x18] sm:$0xff]  ;;  %185 = vmatprep.mubr.msk.f32.mxu0 %vm224_vm0, %v225_v6  ;;  %194 = vmatprep.mubr.msk.f32.mxu1 %vm224_vm0, %v225_v6  ;;  %v23_v8 = vld [vmem:[%s317_s1 + $0x20] sm:$0xff]  ;;  %v24_v9 = vld [vmem:[%s317_s1 + $0x28] sm:$0xff] }
   0x3   :  { %v204_v7 = vpack.c.bf16 %v22_v5, %v21_v3  ;;  %v207_v10 = vpack.c.bf16 %v24_v9, %v23_v8  ;;  %v25_v11 = vld [vmem:[%s317_s1 + $0x30] sm:$0xff]  ;;  %v26_v12 = vld [vmem:[%s317_s1 + $0x38] sm:$0xff]  ;;  %v14_v14 = vld [vmem:[%s318_s0] sm:$0xff] }
   0x4   :  { %202 = vmatpush3.bf16.msra.mxu0 %v201_v4  ;;  %216 = vmatpush3.bf16.msra.mxu1 %v201_v4  ;;  %v210_v13 = vpack.c.bf16 %v26_v12, %v25_v11  ;;  %v17_v15 = vld [vmem:[%s318_s0 + $0x18] sm:$0xff]  ;;  %v15_v16 = vld [vmem:[%s318_s0 + $0x8] sm:$0xff]  ;;  %v18_v17 = vld [vmem:[%s318_s0 + $0x20] sm:$0x3] }
   0x5   :  { %203 = vmatprep.subr.bf16.mxu0 %v223_v0  ;;  %213 = vmatprep.subr.bf16.mxu1 %v223_v0  ;;  %v16_v18 = vld [vmem:[%s318_s0 + $0x10] sm:$0xff]  ;;  %v150_v19 = vld [vmem:[%s319_s2] ss:$0 sm:$0xff] }
   0x8   :  { %205 = vmatpush3.bf16.msra.mxu0 %v204_v7  ;;  %217 = vmatpush3.bf16.msra.mxu1 %v204_v7 }
   0x9   :  { %206 = vmatprep.subr.bf16.mxu0 %v223_v0  ;;  %214 = vmatprep.subr.bf16.mxu1 %v223_v0 }
   0xc   :  { %208 = vmatpush3.bf16.msra.mxu0 %v207_v10  ;;  %218 = vmatpush3.bf16.msra.mxu1 %v207_v10 }
   0xd   :  { %209 = vmatprep.subr.bf16.mxu0 %v223_v0  ;;  %215 = vmatprep.subr.bf16.mxu1 %v223_v0 }
  0x10   :  { %211 = vmatpush3.bf16.msra.mxu0 %v210_v13  ;;  %219 = vmatpush3.bf16.msra.mxu1 %v210_v13 }
  0x13   :  { %186 = vmatmul.mubr.msk.f32.vlgmr.msra.gmra.mrb[0].mxu0 %vm34_vm1, %v14_v14  ;;  %195 = vmatmul.mubr.msk.f32.vlgmr.msra.gmra.mrb[0].mxu1 %vm34_vm1, %v17_v15 }
  0x14   :  { %188 = vmatprep.mubr.msk.f32.mxu0 %vm224_vm0, %v225_v6  ;;  %197 = vmatprep.mubr.msk.f32.mxu1 %vm224_vm0, %v225_v6 }
  0x17   :  { %189 = vmatmul.mubr.msk.f32.gmra.mrb[2].mxu0 %vm34_vm1, %v15_v16  ;;  %198 = vmatmul.mubr.msk.f32.gmra.mrb[2].mxu1 %vm34_vm1, %v18_v17 }
  0x18   :  { %191 = vmatprep.mubr.msk.f32.mxu0 %vm224_vm0, %v225_v6 }
  0x1b   :  { %192 = vmatmul.mubr.msk.f32.gmra.mrb[4].mxu0 %vm34_vm1, %v16_v18 }
  0xe6   :  { %v116_v20 = vpop.f32.mrb[0].mxu0  ;;  %v131_v21 = vpop.f32.mrb[0].mxu1 }
  0xe7   :  { %v117_v22 = vadd.f32 %v150_v19, %v116_v20  ;;  %v187_v23 = vpop.f32.mrb[1].mxu0  ;;  %v132_v24 = vadd.f32 %v150_v19, %v131_v21  ;;  %v196_v25 = vpop.f32.mrb[1].mxu1 }
  0xe9   :  { %140 = vst.msk [vmem:[%s320_s3] sm:$0xff] %vm34_vm1, %v117_v22  ;;  %143 = vst.msk [vmem:[%s320_s3 + $0x18] sm:$0xff] %vm34_vm1, %v132_v24 }
  0xea   :  { %v121_v26 = vpop.f32.mrb[2].mxu0  ;;  %v136_v27 = vpop.f32.mrb[2].mxu1 }
  0xeb   :  { %v122_v28 = vadd.f32 %v150_v19, %v121_v26  ;;  %v190_v29 = vpop.f32.mrb[3].mxu0  ;;  %v137_v30 = vadd.f32 %v150_v19, %v136_v27  ;;  %v199_v31 = vpop.f32.mrb[3].mxu1 }
  0xed   :  { %141 = vst.msk [vmem:[%s320_s3 + $0x8] sm:$0xff] %vm34_vm1, %v122_v28 }
  0xee   :  { %145 = vst.msk [vmem:[%s320_s3 + $0x20] sm:$0x3] %vm144_vm2, %v137_v30  ;;  %v126_v32 = vpop.f32.mrb[4].mxu0 }
  0xef   :  { %v127_v33 = vadd.f32 %v150_v19, %v126_v32  ;;  %v193_v34 = vpop.f32.mrb[5].mxu0 }
  0xf1   :  { %142 = vst.msk [vmem:[%s320_s3 + $0x10] sm:$0xff] %vm34_vm1, %v127_v33 }

// kernel: clip_forward.42
= control target key start
LH: loop header
LB: loop body
LE: loop exit
PB: predicated region body
PF: predicated region fallthrough
CT: control target
= control target key end

     0   :  { %v312_v3 = vmov 0.0   ;;  %vm47_vm0 = vcmask 523264   ;;  %v37_v30 = vlaneseq  ;;  %s469_s1 = inlined_call_operand.vmem [shape: f32[64,256], index: 1, kind: input, shape index: {}]   ;;  %s470_s0 = inlined_call_operand.vmem [shape: f32[34,64], index: 0, kind: input, shape index: {}]   ;;  %s471_s2 = inlined_call_operand.vmem [shape: f32[1,256], index: 2, kind: input, shape index: {}]   ;;  %s472_s3 = inlined_call_operand.vmem [shape: f32[34,256], index: 3, kind: output, shape index: {}]  }
   0x1   :  { %v20_v0 = vld [vmem:[%s469_s1 + $0x8] sm:$0xff]  ;;  %v22_v1 = vld [vmem:[%s469_s1 + $0x18] sm:$0xff]  ;;  %v19_v2 = vld [vmem:[%s469_s1] sm:$0xff]  ;;  %127 = vmatprep.mubr.f32.mxu0 %v312_v3  ;;  %145 = vmatprep.mubr.f32.mxu1 %v312_v3 }
   0x2   :  { %v247_v4 = vpack.c.bf16 %v22_v1, %v20_v0  ;;  %v21_v5 = vld [vmem:[%s469_s1 + $0x10] sm:$0xff]  ;;  %v24_v6 = vld [vmem:[%s469_s1 + $0x28] sm:$0xff]  ;;  %v26_v7 = vld [vmem:[%s469_s1 + $0x38] sm:$0xff]  ;;  %v38_v31 = vshrl.u32 %v37_v30, 7 }
   0x3   :  { %v249_v8 = vpack.c.bf16 %v21_v5, %v19_v2  ;;  %v251_v9 = vpack.c.bf16 %v26_v7, %v24_v6  ;;  %v23_v10 = vld [vmem:[%s469_s1 + $0x20] sm:$0xff]  ;;  %v25_v11 = vld [vmem:[%s469_s1 + $0x30] sm:$0xff]  ;;  %v28_v12 = vld [vmem:[%s469_s1 + $0x48] sm:$0xff] }
   0x4   :  { %248 = vmatprep.subr.bf16.mxu0 %v247_v4  ;;  %263 = vmatprep.subr.bf16.mxu1 %v247_v4  ;;  %v30_v13 = vld [vmem:[%s469_s1 + $0x58] sm:$0xff]  ;;  %v253_v14 = vpack.c.bf16 %v25_v11, %v23_v10  ;;  %v27_v16 = vld [vmem:[%s469_s1 + $0x40] sm:$0xff]  ;;  %v29_v17 = vld [vmem:[%s469_s1 + $0x50] sm:$0xff]  ;;  %v39_v32 = vsub.s32 0, %v38_v31  ;;  %v43_v34 = vsub.s32 1, %v38_v31 }
   0x5   :  { %250 = vmatpush1.bf16.msra.mxu0 %v249_v8  ;;  %267 = vmatpush1.bf16.msra.mxu1 %v249_v8  ;;  %v255_v15 = vpack.c.bf16 %v30_v13, %v28_v12  ;;  %v32_v18 = vld [vmem:[%s469_s1 + $0x68] sm:$0xff]  ;;  %v34_v19 = vld [vmem:[%s469_s1 + $0x78] sm:$0xff]  ;;  %v257_v20 = vpack.c.bf16 %v29_v17, %v27_v16  ;;  %v31_v22 = vld [vmem:[%s469_s1 + $0x60] sm:$0xff] }
   0x6   :  { %252 = vmatprep.subr.bf16.mxu0 %v251_v9  ;;  %264 = vmatprep.subr.bf16.mxu1 %v251_v9  ;;  %v259_v21 = vpack.c.bf16 %v34_v19, %v32_v18  ;;  %v33_v23 = vld [vmem:[%s469_s1 + $0x70] sm:$0xff]  ;;  %v14_v25 = vld [vmem:[%s470_s0] sm:$0xff]  ;;  %v17_v26 = vld [vmem:[%s470_s0 + $0x18] sm:$0xff] }
   0x7   :  { %v261_v24 = vpack.c.bf16 %v33_v23, %v31_v22  ;;  %v15_v27 = vld [vmem:[%s470_s0 + $0x8] sm:$0xff]  ;;  %v18_v28 = vld [vmem:[%s470_s0 + $0x20] sm:$0x3]  ;;  %v16_v29 = vld [vmem:[%s470_s0 + $0x10] sm:$0xff] }
   0x8   :  { %v35_v33 = vld [vmem:[%s471_s2] sm:$0x3] }
   0x9   :  { %254 = vmatpush1.bf16.msra.mxu0 %v253_v14  ;;  %268 = vmatpush1.bf16.msra.mxu1 %v253_v14  ;;  %v40_v35 = vrot.slane %v35_v33, %v39_v32  ;;  %v44_v36 = vrot.slane %v35_v33, %v43_v34 }
   0xa   :  { %256 = vmatprep.subr.bf16.mxu0 %v255_v15  ;;  %265 = vmatprep.subr.bf16.mxu1 %v255_v15 }
   0xd   :  { %258 = vmatpush1.bf16.msra.mxu0 %v257_v20  ;;  %269 = vmatpush1.bf16.msra.mxu1 %v257_v20 }
   0xe   :  { %260 = vmatprep.subr.bf16.mxu0 %v259_v21  ;;  %266 = vmatprep.subr.bf16.mxu1 %v259_v21 }
  0x11   :  { %262 = vmatpush1.bf16.msra.mxu0 %v261_v24  ;;  %270 = vmatpush1.bf16.msra.mxu1 %v261_v24 }
  0x14   :  { %242 = vmatmul.mubr.msk.f32.vlgmr.msra.gmra.mrb[0].mxu0 %vm47_vm0, %v14_v25  ;;  %245 = vmatmul.mubr.msk.f32.vlgmr.msra.gmra.mrb[0].mxu1 %vm47_vm0, %v17_v26 }
  0x15   :  { %133 = vmatprep.mubr.f32.mxu0 %v312_v3  ;;  %151 = vmatprep.mubr.f32.mxu1 %v312_v3 }
  0x18   :  { %243 = vmatmul.mubr.msk.f32.gmra.mrb[2].mxu0 %vm47_vm0, %v15_v27  ;;  %246 = vmatmul.mubr.msk.f32.gmra.mrb[2].mxu1 %vm47_vm0, %v18_v28 }
  0x19   :  { %139 = vmatprep.mubr.f32.mxu0 %v312_v3 }
  0x1c   :  { %244 = vmatmul.mubr.msk.f32.gmra.mrb[4].mxu0 %vm47_vm0, %v16_v29 }
  0xe7   :  { %v129_v37 = vpop.f32.mrb[0].mxu0  ;;  %v147_v38 = vpop.f32.mrb[0].mxu1 }
  0xe8   :  { %v399_v39 = vadd.f32 %v129_v37, %v40_v35  ;;  %v401_v40 = vadd.f32 %v147_v38, %v40_v35  ;;  %v131_v41 = vpop.f32.mrb[1].mxu0  ;;  %v149_v42 = vpop.f32.mrb[1].mxu1 }
  0xe9   :  { %v403_v43 = vadd.f32 %v131_v41, %v44_v36  ;;  %v405_v44 = vadd.f32 %v149_v42, %v44_v36 }
  0xea   :  { %v158_v45 = vmul.f32 -1.702, %v399_v39  ;;  %v164_v46 = vmul.f32 -1.702, %v401_v40 }
  0xeb   :  { %v159_v47 = vmul.f32 -1.702, %v403_v43  ;;  %v165_v48 = vmul.f32 -1.702, %v405_v44  ;;  %v135_v49 = vpop.f32.mrb[2].mxu0  ;;  %v153_v50 = vpop.f32.mrb[2].mxu1 }
  0xec   :  { %v168_v51 = vmul.f32 1.442695, %v158_v45  ;;  %v180_v52 = vmul.f32 1.442695, %v164_v46  ;;  %v411_v53 = vadd.f32 %v135_v49, %v40_v35  ;;  %v413_v54 = vadd.f32 %v153_v50, %v40_v35  ;;  %v137_v55 = vpop.f32.mrb[3].mxu0  ;;  %v155_v56 = vpop.f32.mrb[3].mxu1 }
  0xed   :  { %v170_v57 = vmul.f32 1.442695, %v159_v47  ;;  %v182_v58 = vmul.f32 1.442695, %v165_v48  ;;  %v415_v59 = vadd.f32 %v137_v55, %v44_v36  ;;  %v417_v60 = vadd.f32 %v155_v56, %v44_v36 }
  0xee   :  { %272 = vpow2.f32 %v168_v51  ;;  %v160_v61 = vmul.f32 -1.702, %v411_v53  ;;  %v166_v62 = vmul.f32 -1.702, %v413_v54 }
  0xef   :  { %274 = vpow2.f32 %v180_v52  ;;  %v161_v63 = vmul.f32 -1.702, %v415_v59  ;;  %v167_v0 = vmul.f32 -1.702, %v417_v60  ;;  %v141_v1 = vpop.f32.mrb[4].mxu0 }
  0xf0   :  { %276 = vpow2.f32 %v170_v57  ;;  %v172_v2 = vmul.f32 1.442695, %v160_v61  ;;  %v184_v3 = vmul.f32 1.442695, %v166_v62  ;;  %v423_v4 = vadd.f32 %v141_v1, %v40_v35  ;;  %v143_v5 = vpop.f32.mrb[5].mxu0 }
  0xf1   :  { %278 = vpow2.f32 %v182_v58  ;;  %v174_v6 = vmul.f32 1.442695, %v161_v63  ;;  %v186_v7 = vmul.f32 1.442695, %v167_v0  ;;  %v425_v8 = vadd.f32 %v143_v5, %v44_v36 }
  0xf2   :  { %280 = vpow2.f32 %v172_v2  ;;  %v162_v9 = vmul.f32 -1.702, %v423_v4 }
  0xf3   :  { %282 = vpow2.f32 %v184_v3  ;;  %v163_v10 = vmul.f32 -1.702, %v425_v8 }
  0xf4   :  { %284 = vpow2.f32 %v174_v6  ;;  %v176_v11 = vmul.f32 1.442695, %v162_v9 }
  0xf5   :  { %286 = vpow2.f32 %v186_v7  ;;  %v178_v12 = vmul.f32 1.442695, %v163_v10 }
  0xf6   :  { %288 = vpow2.f32 %v176_v11 }
  0xf7   :  { %290 = vpow2.f32 %v178_v12 }
  0xf8   :  { %v273_v13 = vpop.eup %272 }
  0xf9   :  { %v275_v14 = vpop.eup %274  ;;  %v188_v15 = vadd.f32 1.0, %v273_v13 }
  0xfa   :  { %v277_v16 = vpop.eup %276  ;;  %v194_v17 = vadd.f32 1.0, %v275_v14 }
  0xfb   :  { %v279_v18 = vpop.eup %278  ;;  %292 = vrcp.f32 %v188_v15  ;;  %v189_v19 = vadd.f32 1.0, %v277_v16 }
  0xfc   :  { %v281_v20 = vpop.eup %280  ;;  %294 = vrcp.f32 %v194_v17  ;;  %v195_v21 = vadd.f32 1.0, %v279_v18 }
  0xfd   :  { %v283_v22 = vpop.eup %282  ;;  %296 = vrcp.f32 %v189_v19  ;;  %v190_v23 = vadd.f32 1.0, %v281_v20 }
  0xfe   :  { %v285_v24 = vpop.eup %284  ;;  %298 = vrcp.f32 %v195_v21  ;;  %v196_v25 = vadd.f32 1.0, %v283_v22 }
  0xff   :  { %v287_v26 = vpop.eup %286  ;;  %300 = vrcp.f32 %v190_v23  ;;  %v191_v27 = vadd.f32 1.0, %v285_v24 }
 0x100   :  { %v289_v28 = vpop.eup %288  ;;  %302 = vrcp.f32 %v196_v25  ;;  %v197_v29 = vadd.f32 1.0, %v287_v26 }
 0x101   :  { %v291_v30 = vpop.eup %290  ;;  %304 = vrcp.f32 %v191_v27  ;;  %v192_v31 = vadd.f32 1.0, %v289_v28 }
 0x102   :  { %306 = vrcp.f32 %v197_v29  ;;  %v193_v32 = vadd.f32 1.0, %v291_v30 }
 0x103   :  { %308 = vrcp.f32 %v192_v31 }
 0x104   :  { %310 = vrcp.f32 %v193_v32 }
 0x105   :  { %v293_v33 = vpop.eup %292 }
 0x106   :  { %v295_v34 = vpop.eup %294  ;;  %v218_v35 = vmul.f32 %v293_v33, %v399_v39 }
 0x107   :  { %v297_v36 = vpop.eup %296  ;;  %v224_v37 = vmul.f32 %v295_v34, %v401_v40 }
 0x108   :  { %v299_v38 = vpop.eup %298  ;;  %228 = vst [vmem:[%s472_s3] sm:$0xff] %v218_v35  ;;  %v219_v41 = vmul.f32 %v297_v36, %v403_v43 }
 0x109   :  { %v301_v42 = vpop.eup %300  ;;  %234 = vst [vmem:[%s472_s3 + $0x30] sm:$0xff] %v224_v37  ;;  %v225_v45 = vmul.f32 %v299_v38, %v405_v44 }
 0x10a   :  { %v303_v46 = vpop.eup %302  ;;  %229 = vst [vmem:[%s472_s3 + $0x8] sm:$0xff] %v219_v41  ;;  %v220_v39 = vmul.f32 %v301_v42, %v411_v53 }
 0x10b   :  { %v305_v40 = vpop.eup %304  ;;  %235 = vst [vmem:[%s472_s3 + $0x38] sm:$0xff] %v225_v45  ;;  %v226_v43 = vmul.f32 %v303_v46, %v413_v54 }
 0x10c   :  { %v307_v47 = vpop.eup %306  ;;  %230 = vst [vmem:[%s472_s3 + $0x10] sm:$0xff] %v220_v39  ;;  %v221_v44 = vmul.f32 %v305_v40, %v415_v59 }
 0x10d   :  { %v309_v48 = vpop.eup %308  ;;  %236 = vst [vmem:[%s472_s3 + $0x40] sm:$0x3] %v226_v43  ;;  %v227_v49 = vmul.f32 %v307_v47, %v417_v60 }
 0x10e   :  { %v311_v50 = vpop.eup %310  ;;  %231 = vst [vmem:[%s472_s3 + $0x18] sm:$0xff] %v221_v44  ;;  %v222_v51 = vmul.f32 %v309_v48, %v423_v4 }
 0x10f   :  { %237 = vst [vmem:[%s472_s3 + $0x48] sm:$0x3] %v227_v49  ;;  %v223_v52 = vmul.f32 %v311_v50, %v425_v8 }
 0x110   :  { %232 = vst [vmem:[%s472_s3 + $0x20] sm:$0xff] %v222_v51 }
 0x111   :  { %233 = vst [vmem:[%s472_s3 + $0x28] sm:$0xff] %v223_v52 }

// kernel: clip_forward.43
= control target key start
LH: loop header
LB: loop body
LE: loop exit
PB: predicated region body
PF: predicated region fallthrough
CT: control target
= control target key end

     0   :  { %vm153_vm0 = vcmask 523264   ;;  %vm158_vm1 = vcmask 517120   ;;  %s428_s1 = inlined_call_operand.vmem [shape: f32[256,64], index: 1, kind: input, shape index: {}]   ;;  %s429_s0 = inlined_call_operand.vmem [shape: f32[34,256], index: 0, kind: input, shape index: {}]   ;;  %s430_s2 = inlined_call_operand.vmem [shape: f32[1,64], index: 2, kind: input, shape index: {}]   ;;  %s431_s3 = inlined_call_operand.vmem [shape: f32[34,64], index: 3, kind: output, shape index: {}]  }
   0x1   :  { %v40_v0 = vld [vmem:[%s428_s1 + $0x80] sm:$0xff]  ;;  %v41_v1 = vld [vmem:[%s428_s1 + $0x88] sm:$0xff]  ;;  %v42_v5 = vld [vmem:[%s428_s1 + $0x90] sm:$0xff] }
   0x2   :  { %v24_v2 = vld [vmem:[%s428_s1] sm:$0xff]  ;;  %v212_v3 = vpack.c.bf16 %v41_v1, %v40_v0  ;;  %v25_v4 = vld [vmem:[%s428_s1 + $0x8] sm:$0xff]  ;;  %v43_v6 = vld [vmem:[%s428_s1 + $0x98] sm:$0xff] }
   0x3   :  { %v214_v7 = vpack.c.bf16 %v25_v4, %v24_v2  ;;  %v216_v8 = vpack.c.bf16 %v43_v6, %v42_v5  ;;  %v26_v9 = vld [vmem:[%s428_s1 + $0x10] sm:$0xff]  ;;  %v27_v10 = vld [vmem:[%s428_s1 + $0x18] sm:$0xff]  ;;  %v44_v11 = vld [vmem:[%s428_s1 + $0xa0] sm:$0xff] }
   0x4   :  { %213 = vmatprep.subr.bf16.mxu0 %v212_v3  ;;  %244 = vmatprep.subr.bf16.mxu1 %v212_v3  ;;  %v45_v12 = vld [vmem:[%s428_s1 + $0xa8] sm:$0xff]  ;;  %v218_v13 = vpack.c.bf16 %v27_v10, %v26_v9  ;;  %v28_v15 = vld [vmem:[%s428_s1 + $0x20] sm:$0xff]  ;;  %v46_v17 = vld [vmem:[%s428_s1 + $0xb0] sm:$0xff] }
   0x5   :  { %215 = vmatpush3.bf16.msra.mxu0 %v214_v7  ;;  %252 = vmatpush3.bf16.msra.mxu1 %v214_v7  ;;  %v220_v14 = vpack.c.bf16 %v45_v12, %v44_v11  ;;  %v29_v16 = vld [vmem:[%s428_s1 + $0x28] sm:$0xff]  ;;  %v47_v18 = vld [vmem:[%s428_s1 + $0xb8] sm:$0xff]  ;;  %v30_v21 = vld [vmem:[%s428_s1 + $0x30] sm:$0xff] }
   0x6   :  { %217 = vmatprep.subr.bf16.mxu0 %v216_v8  ;;  %245 = vmatprep.subr.bf16.mxu1 %v216_v8  ;;  %v222_v19 = vpack.c.bf16 %v29_v16, %v28_v15  ;;  %v224_v20 = vpack.c.bf16 %v47_v18, %v46_v17  ;;  %v31_v22 = vld [vmem:[%s428_s1 + $0x38] sm:$0xff]  ;;  %v48_v23 = vld [vmem:[%s428_s1 + $0xc0] sm:$0xff]  ;;  %v49_v24 = vld [vmem:[%s428_s1 + $0xc8] sm:$0xff] }
   0x7   :  { %v15_v25 = vld [vmem:[%s429_s0 + $0x8] sm:$0xff]  ;;  %v21_v26 = vld [vmem:[%s429_s0 + $0x38] sm:$0xff]  ;;  %v226_v27 = vpack.c.bf16 %v31_v22, %v30_v21  ;;  %v228_v28 = vpack.c.bf16 %v49_v24, %v48_v23  ;;  %v32_v29 = vld [vmem:[%s428_s1 + $0x40] sm:$0xff] }
   0x8   :  { %127 = vmatprep.mubr.f32.mxu0 %v15_v25  ;;  %v33_v30 = vld [vmem:[%s428_s1 + $0x48] sm:$0xff]  ;;  %v50_v31 = vld [vmem:[%s428_s1 + $0xd0] sm:$0xff]  ;;  %v51_v32 = vld [vmem:[%s428_s1 + $0xd8] sm:$0xff]  ;;  %142 = vmatprep.mubr.f32.mxu1 %v21_v26 }
   0x9   :  { %219 = vmatpush3.bf16.msra.mxu0 %v218_v13  ;;  %253 = vmatpush3.bf16.msra.mxu1 %v218_v13  ;;  %v230_v33 = vpack.c.bf16 %v33_v30, %v32_v29  ;;  %v232_v34 = vpack.c.bf16 %v51_v32, %v50_v31  ;;  %v34_v35 = vld [vmem:[%s428_s1 + $0x50] sm:$0xff]  ;;  %v35_v36 = vld [vmem:[%s428_s1 + $0x58] sm:$0xff]  ;;  %v52_v37 = vld [vmem:[%s428_s1 + $0xe0] sm:$0xff] }
   0xa   :  { %221 = vmatprep.subr.bf16.mxu0 %v220_v14  ;;  %246 = vmatprep.subr.bf16.mxu1 %v220_v14  ;;  %v53_v38 = vld [vmem:[%s428_s1 + $0xe8] sm:$0xff]  ;;  %v234_v39 = vpack.c.bf16 %v35_v36, %v34_v35  ;;  %v36_v41 = vld [vmem:[%s428_s1 + $0x60] sm:$0xff]  ;;  %v54_v43 = vld [vmem:[%s428_s1 + $0xf0] sm:$0xff] }
   0xb   :  { %v236_v40 = vpack.c.bf16 %v53_v38, %v52_v37  ;;  %v37_v42 = vld [vmem:[%s428_s1 + $0x68] sm:$0xff]  ;;  %v55_v44 = vld [vmem:[%s428_s1 + $0xf8] sm:$0xff]  ;;  %v38_v47 = vld [vmem:[%s428_s1 + $0x70] sm:$0xff] }
   0xc   :  { %v238_v45 = vpack.c.bf16 %v37_v42, %v36_v41  ;;  %v240_v46 = vpack.c.bf16 %v55_v44, %v54_v43  ;;  %v39_v48 = vld [vmem:[%s428_s1 + $0x78] sm:$0xff]  ;;  %v14_v50 = vld [vmem:[%s429_s0] sm:$0xff]  ;;  %v20_v51 = vld [vmem:[%s429_s0 + $0x30] sm:$0xff] }
   0xd   :  { %223 = vmatpush3.bf16.msra.mxu0 %v222_v19  ;;  %254 = vmatpush3.bf16.msra.mxu1 %v222_v19  ;;  %v242_v49 = vpack.c.bf16 %v39_v48, %v38_v47  ;;  %v17_v52 = vld [vmem:[%s429_s0 + $0x18] sm:$0xff]  ;;  %v23_v53 = vld [vmem:[%s429_s0 + $0x48] sm:$0x3]  ;;  %v16_v54 = vld [vmem:[%s429_s0 + $0x10] sm:$0xff] }
   0xe   :  { %225 = vmatprep.subr.bf16.mxu0 %v224_v20  ;;  %247 = vmatprep.subr.bf16.mxu1 %v224_v20  ;;  %v22_v55 = vld [vmem:[%s429_s0 + $0x40] sm:$0x3]  ;;  %v19_v56 = vld [vmem:[%s429_s0 + $0x28] sm:$0xff] }
   0xf   :  { %v18_v57 = vld [vmem:[%s429_s0 + $0x20] sm:$0xff] }
  0x10   :  { %v164_v60 = vld [vmem:[%s430_s2] ss:$0 sm:$0xff] }
  0x11   :  { %227 = vmatpush3.bf16.msra.mxu0 %v226_v27  ;;  %255 = vmatpush3.bf16.msra.mxu1 %v226_v27 }
  0x12   :  { %229 = vmatprep.subr.bf16.mxu0 %v228_v28  ;;  %248 = vmatprep.subr.bf16.mxu1 %v228_v28 }
  0x15   :  { %231 = vmatpush3.bf16.msra.mxu0 %v230_v33  ;;  %256 = vmatpush3.bf16.msra.mxu1 %v230_v33 }
  0x16   :  { %233 = vmatprep.subr.bf16.mxu0 %v232_v34  ;;  %249 = vmatprep.subr.bf16.mxu1 %v232_v34 }
  0x19   :  { %235 = vmatpush3.bf16.msra.mxu0 %v234_v39  ;;  %257 = vmatpush3.bf16.msra.mxu1 %v234_v39 }
  0x1a   :  { %237 = vmatprep.subr.bf16.mxu0 %v236_v40  ;;  %250 = vmatprep.subr.bf16.mxu1 %v236_v40 }
  0x1d   :  { %239 = vmatpush3.bf16.msra.mxu0 %v238_v45  ;;  %258 = vmatpush3.bf16.msra.mxu1 %v238_v45 }
  0x1e   :  { %241 = vmatprep.subr.bf16.mxu0 %v240_v46  ;;  %251 = vmatprep.subr.bf16.mxu1 %v240_v46 }
  0x21   :  { %243 = vmatpush3.bf16.msra.mxu0 %v242_v49  ;;  %259 = vmatpush3.bf16.msra.mxu1 %v242_v49 }
  0x24   :  { %128 = vmatmul.mubr.f32.vlgmr.msra.gmra.mrb[0].mxu0 %v14_v50  ;;  %143 = vmatmul.mubr.f32.vlgmr.msra.gmra.mrb[0].mxu1 %v20_v51 }
  0x25   :  { %132 = vmatprep.mubr.f32.mxu0 %v17_v52  ;;  %147 = vmatprep.mubr.f32.mxu1 %v23_v53 }
  0x28   :  { %133 = vmatmul.mubr.f32.gmra.mrb[2].mxu0 %v16_v54  ;;  %148 = vmatmul.mubr.f32.gmra.mrb[2].mxu1 %v22_v55 }
  0x29   :  { %137 = vmatprep.mubr.f32.mxu0 %v19_v56 }
  0x2c   :  { %138 = vmatmul.mubr.f32.gmra.mrb[4].mxu0 %v18_v57 }
  0xf7   :  { %v197_v58 = vpop.f32.mrb[0].mxu0  ;;  %v206_v59 = vpop.f32.mrb[0].mxu1 }
  0xf8   :  { %v198_v61 = vpop.f32.mrb[1].mxu0  ;;  %v207_v62 = vpop.f32.mrb[1].mxu1 }
  0xf9   :  { %v199_v63 = vadd.f32 %v198_v61, %v197_v58  ;;  %v208_v0 = vadd.f32 %v207_v62, %v206_v59 }
  0xfb   :  { %v130_v1 = vadd.f32 %v199_v63, %v164_v60  ;;  %v200_v2 = vpop.f32.mrb[2].mxu0  ;;  %v145_v3 = vadd.f32 %v208_v0, %v164_v60  ;;  %v209_v4 = vpop.f32.mrb[2].mxu1 }
  0xfc   :  { %v201_v5 = vpop.f32.mrb[3].mxu0  ;;  %v210_v6 = vpop.f32.mrb[3].mxu1 }
  0xfd   :  { %154 = vst.msk [vmem:[%s431_s3] sm:$0xff] %vm153_vm0, %v130_v1  ;;  %157 = vst.msk [vmem:[%s431_s3 + $0x18] sm:$0xff] %vm153_vm0, %v145_v3  ;;  %v202_v7 = vadd.f32 %v201_v5, %v200_v2  ;;  %v211_v8 = vadd.f32 %v210_v6, %v209_v4 }
  0xff   :  { %v135_v9 = vadd.f32 %v202_v7, %v164_v60  ;;  %v203_v10 = vpop.f32.mrb[4].mxu0  ;;  %v150_v11 = vadd.f32 %v211_v8, %v164_v60 }
 0x100   :  { %v204_v12 = vpop.f32.mrb[5].mxu0 }
 0x101   :  { %155 = vst.msk [vmem:[%s431_s3 + $0x8] sm:$0xff] %vm153_vm0, %v135_v9  ;;  %v205_v13 = vadd.f32 %v204_v12, %v203_v10 }
 0x102   :  { %159 = vst.msk [vmem:[%s431_s3 + $0x20] sm:$0x3] %vm158_vm1, %v150_v11 }
 0x103   :  { %v140_v14 = vadd.f32 %v205_v13, %v164_v60 }
 0x105   :  { %156 = vst.msk [vmem:[%s431_s3 + $0x10] sm:$0xff] %vm153_vm0, %v140_v14 }

// kernel: clip_forward.51
= control target key start
LH: loop header
LB: loop body
LE: loop exit
PB: predicated region body
PF: predicated region fallthrough
CT: control target
= control target key end

     0   :  { %vm15_vm0 = vcmask 517120   ;;  %s90_s0 = inlined_call_operand.vmem [shape: f32[2,64], index: 0, kind: input, shape index: {}]   ;;  %s91_s1 = inlined_call_operand.vmem [shape: f32[1,64], index: 1, kind: input, shape index: {}]   ;;  %s92_s2 = inlined_call_operand.vmem [shape: f32[1,64], index: 2, kind: input, shape index: {}]   ;;  %s93_s3 = inlined_call_operand.vmem [shape: f32[2,64], index: 3, kind: output, shape index: {}]  }
   0x1   :  { %v14_v0 = vld [vmem:[%s90_s0] sm:$0x3] }
   0x2   :  { %v16_v1 = vsel %vm15_vm0, %v14_v0, 0.0  ;;  %v51_v11 = vld [vmem:[%s91_s1] ss:$0 sm:$0xff] }
   0x3   :  { %17 = vadd.xlane.f32.xlu0 %v16_v1  ;;  %v52_v13 = vld [vmem:[%s92_s2] ss:$0 sm:$0xff] }
  0x90   :  { %v18_v2 = vpop.xlane.xlu0 %17 }
  0x91   :  { %v20_v3 = vmul.f32 0.015625, %v18_v2 }
  0x93   :  { %v21_v4 = vsub.f32 %v14_v0, %v20_v3 }
  0x95   :  { %v22_v5 = vmul.f32 %v21_v4, %v21_v4 }
  0x97   :  { %v23_v6 = vsel %vm15_vm0, %v22_v5, 0.0 }
  0x98   :  { %24 = vadd.xlane.f32.xlu0 %v23_v6 }
 0x125   :  { %v25_v7 = vpop.xlane.xlu0 %24 }
 0x126   :  { %v26_v8 = vmul.f32 0.015625, %v25_v7 }
 0x128   :  { %v27_v9 = vadd.f32 1e-05, %v26_v8 }
 0x12a   :  { %53 = vrsqrt.f32 %v27_v9 }
 0x134   :  { %v54_v10 = vpop.eup %53 }
 0x135   :  { %v29_v12 = vmul.f32 %v54_v10, %v21_v4 }
 0x137   :  { %v37_v14 = vmul.f32 %v51_v11, %v29_v12 }
 0x139   :  { %v45_v15 = vadd.f32 %v52_v13, %v37_v14 }
 0x13b   :  { %46 = vst.msk [vmem:[%s93_s3] sm:$0x3] %vm15_vm0, %v45_v15 }

// kernel: clip_forward.52
= control target key start
LH: loop header
LB: loop body
LE: loop exit
PB: predicated region body
PF: predicated region fallthrough
CT: control target
= control target key end

     0   :  { %v155_v0 = vmov 0.0|0.0   ;;  %vm156_vm0 = vmmov 0   ;;  %v157_v4 = vmov 0.0   ;;  %vm30_vm1 = vcmask 523264   ;;  %s211_s1 = inlined_call_operand.vmem [shape: f32[64,32], index: 1, kind: input, shape index: {}]   ;;  %s212_s0 = inlined_call_operand.vmem [shape: f32[2,64], index: 0, kind: input, shape index: {}]   ;;  %s213_s2 = inlined_call_operand.vmem [shape: f32[1,32], index: 2, kind: input, shape index: {}]   ;;  %s214_s3 = inlined_call_operand.vmem [shape: f32[2,32], index: 3, kind: output, shape index: {}]  }
   0x1   :  { %140 = vmatprep.subr.bf16.mxu0 %v155_v0  ;;  %v15_v1 = vld [vmem:[%s211_s1] sm:$0xff]  ;;  %v16_v2 = vld [vmem:[%s211_s1 + $0x8] sm:$0xff]  ;;  %v17_v3 = vld [vmem:[%s211_s1 + $0x10] sm:$0xff]  ;;  %137 = vmatprep.mubr.msk.f32.mxu0 %vm156_vm0, %v157_v4  ;;  %vm104_vm2 = vcmask 254976  }
   0x2   :  { %v141_v5 = vpack.c.bf16 %v16_v2, %v15_v1  ;;  %v18_v6 = vld [vmem:[%s211_s1 + $0x18] sm:$0xff]  ;;  %v19_v8 = vld [vmem:[%s211_s1 + $0x20] sm:$0xff]  ;;  %v20_v9 = vld [vmem:[%s211_s1 + $0x28] sm:$0xff] }
   0x3   :  { %v144_v7 = vpack.c.bf16 %v18_v6, %v17_v3  ;;  %v147_v10 = vpack.c.bf16 %v20_v9, %v19_v8  ;;  %v21_v11 = vld [vmem:[%s211_s1 + $0x30] sm:$0xff]  ;;  %v22_v12 = vld [vmem:[%s211_s1 + $0x38] sm:$0xff]  ;;  %v14_v14 = vld [vmem:[%s212_s0] sm:$0x3] }
   0x4   :  { %142 = vmatpush3.bf16.msra.mxu0 %v141_v5  ;;  %v150_v13 = vpack.c.bf16 %v22_v12, %v21_v11  ;;  %v110_v15 = vld [vmem:[%s213_s2] ss:$0 sm:$0xff] }
   0x5   :  { %143 = vmatprep.subr.bf16.mxu0 %v155_v0 }
   0x8   :  { %145 = vmatpush3.bf16.msra.mxu0 %v144_v7 }
   0x9   :  { %146 = vmatprep.subr.bf16.mxu0 %v155_v0 }
   0xc   :  { %148 = vmatpush3.bf16.msra.mxu0 %v147_v10 }
   0xd   :  { %149 = vmatprep.subr.bf16.mxu0 %v155_v0 }
  0x10   :  { %151 = vmatpush3.bf16.msra.mxu0 %v150_v13 }
  0x13   :  { %138 = vmatmul.mubr.msk.f32.vlgmr.msra.gmra.mrb[0].mxu0 %vm30_vm1, %v14_v14 }
  0xe6   :  { %v100_v16 = vpop.f32.mrb[0].mxu0 }
  0xe7   :  { %v101_v17 = vadd.f32 %v110_v15, %v100_v16  ;;  %v139_v18 = vpop.f32.mrb[1].mxu0 }
  0xe9   :  { %105 = vst.msk [vmem:[%s214_s3] sm:$0x3] %vm104_vm2, %v101_v17 }

// kernel: clip_forward.53
= control target key start
LH: loop header
LB: loop body
LE: loop exit
PB: predicated region body
PF: predicated region fallthrough
CT: control target
= control target key end

     0   :  { %vm16_vm0 = vcmask 523264   ;;  %s118_s0 = inlined_call_operand.vmem [shape: f32[16,64], index: 0, kind: input, shape index: {}]   ;;  %s119_s1 = inlined_call_operand.vmem [shape: f32[1,64], index: 1, kind: input, shape index: {}]   ;;  %s120_s2 = inlined_call_operand.vmem [shape: f32[1,64], index: 2, kind: input, shape index: {}]   ;;  %s121_s3 = inlined_call_operand.vmem [shape: f32[16,64], index: 3, kind: output, shape index: {}]  }
   0x1   :  { %v14_v0 = vld [vmem:[%s118_s0] sm:$0xff]  ;;  %v15_v1 = vld [vmem:[%s118_s0 + $0x8] sm:$0xff] }
   0x2   :  { %v17_v2 = vsel %vm16_vm0, %v14_v0, 0.0  ;;  %v20_v3 = vsel %vm16_vm0, %v15_v1, 0.0  ;;  %v68_v21 = vld [vmem:[%s119_s1] ss:$0 sm:$0xff] }
   0x3   :  { %18 = vadd.xlane.f32.xlu0 %v17_v2  ;;  %v69_v23 = vld [vmem:[%s120_s2] ss:$0 sm:$0xff] }
   0x7   :  { %21 = vadd.xlane.f32.xlu0 %v20_v3 }
  0x90   :  { %v19_v4 = vpop.xlane.xlu0 %18 }
  0x91   :  { %v24_v5 = vmul.f32 0.015625, %v19_v4 }
  0x93   :  { %v26_v6 = vsub.f32 %v14_v0, %v24_v5 }
  0x94   :  { %v22_v7 = vpop.xlane.xlu0 %21 }
  0x95   :  { %v25_v8 = vmul.f32 0.015625, %v22_v7  ;;  %v28_v9 = vmul.f32 %v26_v6, %v26_v6 }
  0x97   :  { %v27_v10 = vsub.f32 %v15_v1, %v25_v8  ;;  %v30_v11 = vsel %vm16_vm0, %v28_v9, 0.0 }
  0x98   :  { %31 = vadd.xlane.f32.xlu1 %v30_v11 }
  0x99   :  { %v29_v12 = vmul.f32 %v27_v10, %v27_v10 }
  0x9b   :  { %v33_v13 = vsel %vm16_vm0, %v29_v12, 0.0 }
  0x9c   :  { %34 = vadd.xlane.f32.xlu1 %v33_v13 }
 0x125   :  { %v32_v14 = vpop.xlane.xlu1 %31 }
 0x126   :  { %v36_v15 = vmul.f32 0.015625, %v32_v14 }
 0x128   :  { %v38_v16 = vadd.f32 1e-05, %v36_v15 }
 0x129   :  { %v35_v17 = vpop.xlane.xlu1 %34 }
 0x12a   :  { %70 = vrsqrt.f32 %v38_v16  ;;  %v37_v18 = vmul.f32 0.015625, %v35_v17 }
 0x12c   :  { %v39_v19 = vadd.f32 1e-05, %v37_v18 }
 0x12e   :  { %72 = vrsqrt.f32 %v39_v19 }
 0x134   :  { %v71_v20 = vpop.eup %70 }
 0x135   :  { %v42_v22 = vmul.f32 %v71_v20, %v26_v6 }
 0x137   :  { %v51_v24 = vmul.f32 %v68_v21, %v42_v22 }
 0x138   :  { %v73_v25 = vpop.eup %72 }
 0x139   :  { %v60_v26 = vadd.f32 %v69_v23, %v51_v24  ;;  %v43_v27 = vmul.f32 %v73_v25, %v27_v10 }
 0x13b   :  { %62 = vst.msk [vmem:[%s121_s3] sm:$0xff] %vm16_vm0, %v60_v26  ;;  %v52_v28 = vmul.f32 %v68_v21, %v43_v27 }
 0x13d   :  { %v61_v29 = vadd.f32 %v69_v23, %v52_v28 }
 0x13f   :  { %63 = vst.msk [vmem:[%s121_s3 + $0x8] sm:$0xff] %vm16_vm0, %v61_v29 }

// kernel: clip_forward.54
= control target key start
LH: loop header
LB: loop body
LE: loop exit
PB: predicated region body
PF: predicated region fallthrough
CT: control target
= control target key end

     0   :  { %v163_v3 = vmov 0.0   ;;  %vm44_vm0 = vcmask 523264   ;;  %v34_v27 = vlaneseq  ;;  %s257_s1 = inlined_call_operand.vmem [shape: f32[64,192], index: 1, kind: input, shape index: {}]   ;;  %s258_s0 = inlined_call_operand.vmem [shape: f32[16,64], index: 0, kind: input, shape index: {}]   ;;  %s259_s2 = inlined_call_operand.vmem [shape: f32[1,192], index: 2, kind: input, shape index: {}]   ;;  %s260_s3 = inlined_call_operand.vmem [shape: f32[16,192], index: 3, kind: output, shape index: {}]  }
   0x1   :  { %v17_v0 = vld [vmem:[%s257_s1 + $0x8] sm:$0xff]  ;;  %v19_v1 = vld [vmem:[%s257_s1 + $0x18] sm:$0xff]  ;;  %v16_v2 = vld [vmem:[%s257_s1] sm:$0xff]  ;;  %115 = vmatprep.mubr.f32.mxu0 %v163_v3  ;;  %121 = vmatprep.mubr.f32.mxu1 %v163_v3 }
   0x2   :  { %v138_v4 = vpack.c.bf16 %v19_v1, %v17_v0  ;;  %v18_v5 = vld [vmem:[%s257_s1 + $0x10] sm:$0xff]  ;;  %v21_v6 = vld [vmem:[%s257_s1 + $0x28] sm:$0xff]  ;;  %v23_v7 = vld [vmem:[%s257_s1 + $0x38] sm:$0xff]  ;;  %v35_v28 = vshrl.u32 %v34_v27, 7 }
   0x3   :  { %v140_v8 = vpack.c.bf16 %v18_v5, %v16_v2  ;;  %v142_v9 = vpack.c.bf16 %v23_v7, %v21_v6  ;;  %v20_v10 = vld [vmem:[%s257_s1 + $0x20] sm:$0xff]  ;;  %v22_v11 = vld [vmem:[%s257_s1 + $0x30] sm:$0xff]  ;;  %v25_v12 = vld [vmem:[%s257_s1 + $0x48] sm:$0xff] }
   0x4   :  { %139 = vmatprep.subr.bf16.mxu0 %v138_v4  ;;  %154 = vmatprep.subr.bf16.mxu1 %v138_v4  ;;  %v27_v13 = vld [vmem:[%s257_s1 + $0x58] sm:$0xff]  ;;  %v144_v14 = vpack.c.bf16 %v22_v11, %v20_v10  ;;  %v24_v16 = vld [vmem:[%s257_s1 + $0x40] sm:$0xff]  ;;  %v26_v17 = vld [vmem:[%s257_s1 + $0x50] sm:$0xff]  ;;  %v36_v29 = vsub.s32 0, %v35_v28  ;;  %v40_v31 = vsub.s32 1, %v35_v28 }
   0x5   :  { %141 = vmatpush1.bf16.msra.mxu0 %v140_v8  ;;  %158 = vmatpush1.bf16.msra.mxu1 %v140_v8  ;;  %v146_v15 = vpack.c.bf16 %v27_v13, %v25_v12  ;;  %v29_v18 = vld [vmem:[%s257_s1 + $0x68] sm:$0xff]  ;;  %v31_v19 = vld [vmem:[%s257_s1 + $0x78] sm:$0xff]  ;;  %v148_v20 = vpack.c.bf16 %v26_v17, %v24_v16  ;;  %v28_v22 = vld [vmem:[%s257_s1 + $0x60] sm:$0xff] }
   0x6   :  { %143 = vmatprep.subr.bf16.mxu0 %v142_v9  ;;  %155 = vmatprep.subr.bf16.mxu1 %v142_v9  ;;  %v150_v21 = vpack.c.bf16 %v31_v19, %v29_v18  ;;  %v30_v23 = vld [vmem:[%s257_s1 + $0x70] sm:$0xff]  ;;  %v14_v25 = vld [vmem:[%s258_s0] sm:$0xff]  ;;  %v15_v26 = vld [vmem:[%s258_s0 + $0x8] sm:$0xff] }
   0x7   :  { %v152_v24 = vpack.c.bf16 %v30_v23, %v28_v22  ;;  %v32_v30 = vld [vmem:[%s259_s2] sm:$0x3] }
   0x8   :  { %v37_v32 = vrot.slane %v32_v30, %v36_v29  ;;  %v41_v33 = vrot.slane %v32_v30, %v40_v31 }
   0x9   :  { %145 = vmatpush1.bf16.msra.mxu0 %v144_v14  ;;  %159 = vmatpush1.bf16.msra.mxu1 %v144_v14 }
   0xa   :  { %147 = vmatprep.subr.bf16.mxu0 %v146_v15  ;;  %156 = vmatprep.subr.bf16.mxu1 %v146_v15 }
   0xd   :  { %149 = vmatpush1.bf16.msra.mxu0 %v148_v20  ;;  %160 = vmatpush1.bf16.msra.mxu1 %v148_v20 }
   0xe   :  { %151 = vmatprep.subr.bf16.mxu0 %v150_v21  ;;  %157 = vmatprep.subr.bf16.mxu1 %v150_v21 }
  0x11   :  { %153 = vmatpush1.bf16.msra.mxu0 %v152_v24  ;;  %161 = vmatpush1.bf16.msra.mxu1 %v152_v24 }
  0x14   :  { %136 = vmatmul.mubr.msk.f32.vlgmr.msra.gmra.mrb[0].mxu0 %vm44_vm0, %v14_v25  ;;  %137 = vmatmul.mubr.msk.f32.vlgmr.msra.gmra.mrb[0].mxu1 %vm44_vm0, %v15_v26 }
  0xe7   :  { %v117_v34 = vpop.f32.mrb[0].mxu0  ;;  %v123_v35 = vpop.f32.mrb[0].mxu1 }
  0xe8   :  { %v118_v36 = vadd.f32 %v117_v34, %v37_v32  ;;  %v124_v37 = vadd.f32 %v123_v35, %v37_v32  ;;  %v119_v38 = vpop.f32.mrb[1].mxu0  ;;  %v125_v39 = vpop.f32.mrb[1].mxu1 }
  0xe9   :  { %v120_v40 = vadd.f32 %v119_v38, %v41_v33  ;;  %v126_v41 = vadd.f32 %v125_v39, %v41_v33 }
  0xea   :  { %128 = vst [vmem:[%s260_s3] sm:$0xff] %v118_v36  ;;  %130 = vst [vmem:[%s260_s3 + $0x10] sm:$0xff] %v124_v37 }
  0xeb   :  { %129 = vst.msk [vmem:[%s260_s3 + $0x8] sm:$0xff] %vm44_vm0, %v120_v40  ;;  %131 = vst.msk [vmem:[%s260_s3 + $0x18] sm:$0xff] %vm44_vm0, %v126_v41 }

// kernel: clip_forward.55
= control target key start
LH: loop header
LB: loop body
LE: loop exit
PB: predicated region body
PF: predicated region fallthrough
CT: control target
= control target key end

     0   :  { %s550_s15 = smov 0   ;;  %s588_s0 = inlined_call_operand.vmem [shape: f32[4,8,32], index: 0, kind: input, shape index: {}]   ;;  %s589_s1 = inlined_call_operand.vmem [shape: f32[4,8,32], index: 1, kind: input, shape index: {}]   ;;  %s590_s2 = inlined_call_operand.vmem [shape: f32[4,8,32], index: 2, kind: input, shape index: {}]   ;;  %s591_s3 = inlined_call_operand.vmem [shape: f32[8,8], index: 3, kind: input, shape index: {}]   ;;  %s592_s4 = inlined_call_operand.vmem [shape: f32[4,8,32], index: 4, kind: output, shape index: {}]  }
   0x1 LB: > { %s473_s16 = sadd.s32 4294967295, %s521_s15   ;;  %p477_p0 = scmp.ge.s32.totalorder %s521_s15, 1  ;;  %s521_s15 = sphi %s550_s15, %s14_s15  }
   0x2   : > { %p179_p1 = scmp.lt.s32.totalorder %s521_s15, 5 }
   0x4   : > { %p180_p2 = pnand %p477_p0, %p179_p1 }
   0x5   : > { %p211_p3 = scmp.lt.s32.totalorder (!%p180_p2), %s473_s16, 3  ;;  %v523_v0 = vmov (!%p180_p2), 0.0   ;;  %vm524_vm0 = vmmov (!%p180_p2), 0   ;;  %vm230_vm1 = vcmask (!%p180_p2), 261120   ;;  %v308_v4 = vld [vmem:[%s591_s3] sm:$0xff] (!%p180_p2)  ;;  %vm310_vm2 = vcmask (!%p180_p2), 64512  }
   0x6   : > { %183 = sbr.rel (%p180_p2) target bundleno = 763 (0x2fb), region = 36  ;;  %491 = vmatprep.subr.mxu0 (!%p180_p2), %v523_v0  ;;  %493 = vmatprep.mubr.msk.f32.mxu0 (!%p180_p2), %vm524_vm0, %v523_v0 }
   0x7   : > { %496 = vmatprep.subr.mxu1 (!%p180_p2), %v523_v0  ;;  %498 = vmatprep.mubr.msk.f32.mxu1 (!%p180_p2), %vm524_vm0, %v523_v0 }
   0xd   : > { %s594_s16 = smov (!%p211_p3, %s473_s16), 3 }
   0xe   : > { %s558_s17 = sshll.u32 %s594_s16, 3 }
   0xf   : > { %s218_s20 = scalar_lea.vmem %s589_s1, %s558_s17  ;;  %s214_s23 = scalar_lea.vmem %s588_s0, %s558_s17 }
  0x10   : > { %v228_v1 = vld [vmem:[%s218_s20] sm:$0xff]  ;;  %s222_s28 = scalar_lea.vmem %s590_s2, %s558_s17  ;;  %s226_s5 = scalar_lea.vmem %s592_s4, %s558_s17 }
  0x11   : > { %492 = vmatpush3.xpose.msk.msra.mxu0 %vm230_vm1, %v228_v1  ;;  %v227_v2 = vld [vmem:[%s214_s23] sm:$0xff] }
  0x12   : > { %v229_v14 = vld [vmem:[%s222_s28] sm:$0xff] }
  0x13   : > { %497 = vmatpush3.msra.mxu1 %v229_v14 }
  0x14   : > { %494 = vmatmul.mubr.msk.f32.vlgmr.msra.gmra.mrb[0].mxu0 %vm230_vm1, %v227_v2 }
  0xe7   : > { %v303_v3 = vpop.f32.mrb[0].mxu0 }
  0xe8   : > { %v307_v5 = vmul.f32 0.17677669, %v303_v3  ;;  %v495_v6 = vpop.f32.mrb[1].mxu0 }
  0xea   : > { %v309_v7 = vadd.f32 %v308_v4, %v307_v5 }
  0xec   : > { %v311_v8 = vsel %vm310_vm2, %v309_v7, -inf }
  0xed   : > { %312 = vmax.xlane.f32.xlu0 %v311_v8 }
 0x17a   : > { %v313_v9 = vpop.xlane.xlu0 %312 }
 0x17b   : > { %v314_v10 = vsub.f32 %v309_v7, %v313_v9 }
 0x17d   : > { %v315_v11 = vmul.f32 1.442695, %v314_v10 }
 0x17f   : > { %511 = vpow2.f32 %v315_v11 }
 0x189   : > { %v512_v12 = vpop.eup %511 }
 0x18a   : > { %v317_v13 = vsel %vm310_vm2, %v512_v12, 0.0 }
 0x18b   : > { %318 = vadd.xlane.f32.xlu0 %v317_v13 }
 0x218   : > { %v319_v15 = vpop.xlane.xlu0 %318 }
 0x219   : > { %513 = vrcp.f32 %v319_v15 }
 0x223   : > { %v514_v16 = vpop.eup %513 }
 0x224   : > { %v321_v17 = vmul.f32 %v514_v16, %v512_v12 }
 0x226   : > { %499 = vmatmul.mubr.msk.f32.vlgmr.msra.gmra.mrb[0].mxu1 %vm310_vm2, %v321_v17 }
 0x2f9   : > { %v391_v18 = vpop.f32.mrb[0].mxu1 }
 0x2fa   : > { %395 = vst.msk [vmem:[%s226_s5] sm:$0xff] %vm230_vm1, %v391_v18  ;;  %v500_v19 = vpop.f32.mrb[1].mxu1 }
 0x2fb PF: > { %s14_s15 = sadd.s32 1, %s521_s15  }
 0x2fc   : > { %p11_p4 = scmp.ge.s32.totalorder %s14_s15, 6  }
 0x2fe   :  { %13 = sbr.rel (!%p11_p4) target bundleno = 1 (0x1), region = 72 }

// kernel: clip_forward.56
= control target key start
LH: loop header
LB: loop body
LE: loop exit
PB: predicated region body
PF: predicated region fallthrough
CT: control target
= control target key end

     0   :  { %vm31_vm0 = vcmask 523264   ;;  %s230_s1 = inlined_call_operand.vmem [shape: f32[64,64], index: 1, kind: input, shape index: {}]   ;;  %s231_s0 = inlined_call_operand.vmem [shape: f32[16,64], index: 0, kind: input, shape index: {}]   ;;  %s232_s2 = inlined_call_operand.vmem [shape: f32[1,64], index: 2, kind: input, shape index: {}]   ;;  %s233_s3 = inlined_call_operand.vmem [shape: f32[16,64], index: 3, kind: output, shape index: {}]  }
   0x1   :  { %v16_v0 = vld [vmem:[%s230_s1] sm:$0xff]  ;;  %v17_v1 = vld [vmem:[%s230_s1 + $0x8] sm:$0xff]  ;;  %v18_v2 = vld [vmem:[%s230_s1 + $0x10] sm:$0xff] }
   0x2   :  { %v151_v3 = vpack.c.bf16 %v17_v1, %v16_v0  ;;  %v19_v4 = vld [vmem:[%s230_s1 + $0x18] sm:$0xff]  ;;  %v20_v6 = vld [vmem:[%s230_s1 + $0x20] sm:$0xff]  ;;  %v21_v7 = vld [vmem:[%s230_s1 + $0x28] sm:$0xff] }
   0x3   :  { %v155_v5 = vpack.c.bf16 %v19_v4, %v18_v2  ;;  %v14_v8 = vld [vmem:[%s231_s0] sm:$0xff]  ;;  %v159_v9 = vpack.c.bf16 %v21_v7, %v20_v6  ;;  %v22_v10 = vld [vmem:[%s230_s1 + $0x30] sm:$0xff]  ;;  %v23_v11 = vld [vmem:[%s230_s1 + $0x38] sm:$0xff] }
   0x4   :  { %152 = vmatprep.subr.bf16.mxu0 %v151_v3  ;;  %148 = vmatprep.mubr.msk.f32.mxu0 %vm31_vm0, %v14_v8  ;;  %v163_v12 = vpack.c.bf16 %v23_v11, %v22_v10  ;;  %v15_v13 = vld [vmem:[%s231_s0 + $0x8] sm:$0xff]  ;;  %v119_v14 = vld [vmem:[%s232_s2] ss:$0 sm:$0xff] }
   0x5   :  { %154 = vmatpush3.bf16.msra.mxu0 %v151_v3 }
   0x6   :  { %156 = vmatprep.subr.bf16.mxu0 %v155_v5 }
   0x9   :  { %158 = vmatpush3.bf16.msra.mxu0 %v155_v5 }
   0xa   :  { %160 = vmatprep.subr.bf16.mxu0 %v159_v9 }
   0xd   :  { %162 = vmatpush3.bf16.msra.mxu0 %v159_v9 }
   0xe   :  { %164 = vmatprep.subr.bf16.mxu0 %v163_v12 }
  0x11   :  { %166 = vmatpush3.bf16.msra.mxu0 %v163_v12 }
  0x14   :  { %149 = vmatmul.mubr.msk.f32.vlgmr.msra.gmra.mrb[0].mxu0 %vm31_vm0, %v15_v13 }
  0xe7   :  { %v150_v15 = vpop.f32.mrb[0].mxu0 }
  0xe8   :  { %v110_v16 = vadd.f32 %v150_v15, %v119_v14  ;;  %v104_v17 = vpop.f32.mrb[1].mxu0 }
  0xe9   :  { %v105_v18 = vadd.f32 %v119_v14, %v104_v17 }
  0xea   :  { %114 = vst.msk [vmem:[%s233_s3 + $0x8] sm:$0xff] %vm31_vm0, %v110_v16 }
  0xeb   :  { %113 = vst.msk [vmem:[%s233_s3] sm:$0xff] %vm31_vm0, %v105_v18 }

// kernel: clip_forward.58
= control target key start
LH: loop header
LB: loop body
LE: loop exit
PB: predicated region body
PF: predicated region fallthrough
CT: control target
= control target key end

     0   :  { %v207_v3 = vmov 0.0   ;;  %vm44_vm0 = vcmask 523264   ;;  %v34_v27 = vlaneseq  ;;  %s297_s1 = inlined_call_operand.vmem [shape: f32[64,256], index: 1, kind: input, shape index: {}]   ;;  %s298_s0 = inlined_call_operand.vmem [shape: f32[16,64], index: 0, kind: input, shape index: {}]   ;;  %s299_s2 = inlined_call_operand.vmem [shape: f32[1,256], index: 2, kind: input, shape index: {}]   ;;  %s300_s3 = inlined_call_operand.vmem [shape: f32[16,256], index: 3, kind: output, shape index: {}]  }
   0x1   :  { %v17_v0 = vld [vmem:[%s297_s1 + $0x8] sm:$0xff]  ;;  %v19_v1 = vld [vmem:[%s297_s1 + $0x18] sm:$0xff]  ;;  %v16_v2 = vld [vmem:[%s297_s1] sm:$0xff]  ;;  %115 = vmatprep.mubr.f32.mxu0 %v207_v3  ;;  %121 = vmatprep.mubr.f32.mxu1 %v207_v3 }
   0x2   :  { %v166_v4 = vpack.c.bf16 %v19_v1, %v17_v0  ;;  %v18_v5 = vld [vmem:[%s297_s1 + $0x10] sm:$0xff]  ;;  %v21_v6 = vld [vmem:[%s297_s1 + $0x28] sm:$0xff]  ;;  %v23_v7 = vld [vmem:[%s297_s1 + $0x38] sm:$0xff]  ;;  %v35_v28 = vshrl.u32 %v34_v27, 7 }
   0x3   :  { %v168_v8 = vpack.c.bf16 %v18_v5, %v16_v2  ;;  %v170_v9 = vpack.c.bf16 %v23_v7, %v21_v6  ;;  %v20_v10 = vld [vmem:[%s297_s1 + $0x20] sm:$0xff]  ;;  %v22_v11 = vld [vmem:[%s297_s1 + $0x30] sm:$0xff]  ;;  %v25_v12 = vld [vmem:[%s297_s1 + $0x48] sm:$0xff] }
   0x4   :  { %167 = vmatprep.subr.bf16.mxu0 %v166_v4  ;;  %182 = vmatprep.subr.bf16.mxu1 %v166_v4  ;;  %v27_v13 = vld [vmem:[%s297_s1 + $0x58] sm:$0xff]  ;;  %v172_v14 = vpack.c.bf16 %v22_v11, %v20_v10  ;;  %v24_v16 = vld [vmem:[%s297_s1 + $0x40] sm:$0xff]  ;;  %v26_v17 = vld [vmem:[%s297_s1 + $0x50] sm:$0xff]  ;;  %v36_v29 = vsub.s32 0, %v35_v28  ;;  %v40_v31 = vsub.s32 1, %v35_v28 }
   0x5   :  { %169 = vmatpush1.bf16.msra.mxu0 %v168_v8  ;;  %186 = vmatpush1.bf16.msra.mxu1 %v168_v8  ;;  %v174_v15 = vpack.c.bf16 %v27_v13, %v25_v12  ;;  %v29_v18 = vld [vmem:[%s297_s1 + $0x68] sm:$0xff]  ;;  %v31_v19 = vld [vmem:[%s297_s1 + $0x78] sm:$0xff]  ;;  %v176_v20 = vpack.c.bf16 %v26_v17, %v24_v16  ;;  %v28_v22 = vld [vmem:[%s297_s1 + $0x60] sm:$0xff] }
   0x6   :  { %171 = vmatprep.subr.bf16.mxu0 %v170_v9  ;;  %183 = vmatprep.subr.bf16.mxu1 %v170_v9  ;;  %v178_v21 = vpack.c.bf16 %v31_v19, %v29_v18  ;;  %v30_v23 = vld [vmem:[%s297_s1 + $0x70] sm:$0xff]  ;;  %v14_v25 = vld [vmem:[%s298_s0] sm:$0xff]  ;;  %v15_v26 = vld [vmem:[%s298_s0 + $0x8] sm:$0xff] }
   0x7   :  { %v180_v24 = vpack.c.bf16 %v30_v23, %v28_v22  ;;  %v32_v30 = vld [vmem:[%s299_s2] sm:$0x3] }
   0x8   :  { %v37_v32 = vrot.slane %v32_v30, %v36_v29  ;;  %v41_v33 = vrot.slane %v32_v30, %v40_v31 }
   0x9   :  { %173 = vmatpush1.bf16.msra.mxu0 %v172_v14  ;;  %187 = vmatpush1.bf16.msra.mxu1 %v172_v14 }
   0xa   :  { %175 = vmatprep.subr.bf16.mxu0 %v174_v15  ;;  %184 = vmatprep.subr.bf16.mxu1 %v174_v15 }
   0xd   :  { %177 = vmatpush1.bf16.msra.mxu0 %v176_v20  ;;  %188 = vmatpush1.bf16.msra.mxu1 %v176_v20 }
   0xe   :  { %179 = vmatprep.subr.bf16.mxu0 %v178_v21  ;;  %185 = vmatprep.subr.bf16.mxu1 %v178_v21 }
  0x11   :  { %181 = vmatpush1.bf16.msra.mxu0 %v180_v24  ;;  %189 = vmatpush1.bf16.msra.mxu1 %v180_v24 }
  0x14   :  { %164 = vmatmul.mubr.msk.f32.vlgmr.msra.gmra.mrb[0].mxu0 %vm44_vm0, %v14_v25  ;;  %165 = vmatmul.mubr.msk.f32.vlgmr.msra.gmra.mrb[0].mxu1 %vm44_vm0, %v15_v26 }
  0xe7   :  { %v117_v34 = vpop.f32.mrb[0].mxu0  ;;  %v123_v35 = vpop.f32.mrb[0].mxu1 }
  0xe8   :  { %v118_v36 = vadd.f32 %v117_v34, %v37_v32  ;;  %v124_v37 = vadd.f32 %v123_v35, %v37_v32  ;;  %v119_v38 = vpop.f32.mrb[1].mxu0  ;;  %v125_v39 = vpop.f32.mrb[1].mxu1 }
  0xe9   :  { %v120_v40 = vadd.f32 %v119_v38, %v41_v33  ;;  %v126_v41 = vadd.f32 %v125_v39, %v41_v33 }
  0xea   :  { %v128_v42 = vmul.f32 -1.702, %v118_v36  ;;  %v130_v43 = vmul.f32 -1.702, %v124_v37 }
  0xeb   :  { %v129_v44 = vmul.f32 -1.702, %v120_v40  ;;  %v131_v45 = vmul.f32 -1.702, %v126_v41 }
  0xec   :  { %v132_v46 = vmul.f32 1.442695, %v128_v42  ;;  %v136_v47 = vmul.f32 1.442695, %v130_v43 }
  0xed   :  { %v134_v48 = vmul.f32 1.442695, %v129_v44  ;;  %v138_v49 = vmul.f32 1.442695, %v131_v45 }
  0xee   :  { %191 = vpow2.f32 %v132_v46 }
  0xef   :  { %193 = vpow2.f32 %v136_v47 }
  0xf0   :  { %195 = vpow2.f32 %v134_v48 }
  0xf1   :  { %197 = vpow2.f32 %v138_v49 }
  0xf8   :  { %v192_v50 = vpop.eup %191 }
  0xf9   :  { %v194_v51 = vpop.eup %193  ;;  %v140_v52 = vadd.f32 1.0, %v192_v50 }
  0xfa   :  { %v196_v53 = vpop.eup %195  ;;  %v142_v54 = vadd.f32 1.0, %v194_v51 }
  0xfb   :  { %v198_v55 = vpop.eup %197  ;;  %199 = vrcp.f32 %v140_v52  ;;  %v141_v56 = vadd.f32 1.0, %v196_v53 }
  0xfc   :  { %201 = vrcp.f32 %v142_v54  ;;  %v143_v57 = vadd.f32 1.0, %v198_v55 }
  0xfd   :  { %203 = vrcp.f32 %v141_v56 }
  0xfe   :  { %205 = vrcp.f32 %v143_v57 }
 0x105   :  { %v200_v58 = vpop.eup %199 }
 0x106   :  { %v202_v59 = vpop.eup %201  ;;  %v152_v60 = vmul.f32 %v200_v58, %v118_v36 }
 0x107   :  { %v204_v61 = vpop.eup %203  ;;  %v154_v62 = vmul.f32 %v202_v59, %v124_v37 }
 0x108   :  { %v206_v63 = vpop.eup %205  ;;  %156 = vst [vmem:[%s300_s3] sm:$0xff] %v152_v60  ;;  %v153_v0 = vmul.f32 %v204_v61, %v120_v40 }
 0x109   :  { %158 = vst [vmem:[%s300_s3 + $0x10] sm:$0xff] %v154_v62  ;;  %v155_v1 = vmul.f32 %v206_v63, %v126_v41 }
 0x10a   :  { %157 = vst [vmem:[%s300_s3 + $0x8] sm:$0xff] %v153_v0 }
 0x10b   :  { %159 = vst [vmem:[%s300_s3 + $0x18] sm:$0xff] %v155_v1 }

// kernel: clip_forward.59
= control target key start
LH: loop header
LB: loop body
LE: loop exit
PB: predicated region body
PF: predicated region fallthrough
CT: control target
= control target key end

     0   :  { %vm132_vm0 = vcmask 523264   ;;  %s363_s1 = inlined_call_operand.vmem [shape: f32[256,64], index: 1, kind: input, shape index: {}]   ;;  %s364_s0 = inlined_call_operand.vmem [shape: f32[16,256], index: 0, kind: input, shape index: {}]   ;;  %s365_s2 = inlined_call_operand.vmem [shape: f32[1,64], index: 2, kind: input, shape index: {}]   ;;  %s366_s3 = inlined_call_operand.vmem [shape: f32[16,64], index: 3, kind: output, shape index: {}]  }
   0x1   :  { %v34_v0 = vld [vmem:[%s363_s1 + $0x80] sm:$0xff]  ;;  %v35_v1 = vld [vmem:[%s363_s1 + $0x88] sm:$0xff]  ;;  %v36_v5 = vld [vmem:[%s363_s1 + $0x90] sm:$0xff] }
   0x2   :  { %v18_v2 = vld [vmem:[%s363_s1] sm:$0xff]  ;;  %v178_v3 = vpack.c.bf16 %v35_v1, %v34_v0  ;;  %v19_v4 = vld [vmem:[%s363_s1 + $0x8] sm:$0xff]  ;;  %v37_v6 = vld [vmem:[%s363_s1 + $0x98] sm:$0xff] }
   0x3   :  { %v180_v7 = vpack.c.bf16 %v19_v4, %v18_v2  ;;  %v182_v8 = vpack.c.bf16 %v37_v6, %v36_v5  ;;  %v20_v9 = vld [vmem:[%s363_s1 + $0x10] sm:$0xff]  ;;  %v21_v10 = vld [vmem:[%s363_s1 + $0x18] sm:$0xff]  ;;  %v38_v11 = vld [vmem:[%s363_s1 + $0xa0] sm:$0xff] }
   0x4   :  { %179 = vmatprep.subr.bf16.mxu0 %v178_v3  ;;  %210 = vmatprep.subr.bf16.mxu1 %v178_v3  ;;  %v39_v12 = vld [vmem:[%s363_s1 + $0xa8] sm:$0xff]  ;;  %v184_v13 = vpack.c.bf16 %v21_v10, %v20_v9  ;;  %v22_v15 = vld [vmem:[%s363_s1 + $0x20] sm:$0xff]  ;;  %v40_v17 = vld [vmem:[%s363_s1 + $0xb0] sm:$0xff] }
   0x5   :  { %181 = vmatpush3.bf16.msra.mxu0 %v180_v7  ;;  %218 = vmatpush3.bf16.msra.mxu1 %v180_v7  ;;  %v186_v14 = vpack.c.bf16 %v39_v12, %v38_v11  ;;  %v23_v16 = vld [vmem:[%s363_s1 + $0x28] sm:$0xff]  ;;  %v41_v18 = vld [vmem:[%s363_s1 + $0xb8] sm:$0xff]  ;;  %v24_v21 = vld [vmem:[%s363_s1 + $0x30] sm:$0xff] }
   0x6   :  { %183 = vmatprep.subr.bf16.mxu0 %v182_v8  ;;  %211 = vmatprep.subr.bf16.mxu1 %v182_v8  ;;  %v188_v19 = vpack.c.bf16 %v23_v16, %v22_v15  ;;  %v190_v20 = vpack.c.bf16 %v41_v18, %v40_v17  ;;  %v25_v22 = vld [vmem:[%s363_s1 + $0x38] sm:$0xff]  ;;  %v42_v23 = vld [vmem:[%s363_s1 + $0xc0] sm:$0xff]  ;;  %v43_v24 = vld [vmem:[%s363_s1 + $0xc8] sm:$0xff] }
   0x7   :  { %v15_v25 = vld [vmem:[%s364_s0 + $0x8] sm:$0xff]  ;;  %v17_v26 = vld [vmem:[%s364_s0 + $0x18] sm:$0xff]  ;;  %v192_v27 = vpack.c.bf16 %v25_v22, %v24_v21  ;;  %v194_v28 = vpack.c.bf16 %v43_v24, %v42_v23  ;;  %v26_v29 = vld [vmem:[%s363_s1 + $0x40] sm:$0xff] }
   0x8   :  { %121 = vmatprep.mubr.f32.mxu0 %v15_v25  ;;  %v27_v30 = vld [vmem:[%s363_s1 + $0x48] sm:$0xff]  ;;  %v44_v31 = vld [vmem:[%s363_s1 + $0xd0] sm:$0xff]  ;;  %v45_v32 = vld [vmem:[%s363_s1 + $0xd8] sm:$0xff]  ;;  %126 = vmatprep.mubr.f32.mxu1 %v17_v26 }
   0x9   :  { %185 = vmatpush3.bf16.msra.mxu0 %v184_v13  ;;  %219 = vmatpush3.bf16.msra.mxu1 %v184_v13  ;;  %v196_v33 = vpack.c.bf16 %v27_v30, %v26_v29  ;;  %v198_v34 = vpack.c.bf16 %v45_v32, %v44_v31  ;;  %v28_v35 = vld [vmem:[%s363_s1 + $0x50] sm:$0xff]  ;;  %v29_v36 = vld [vmem:[%s363_s1 + $0x58] sm:$0xff]  ;;  %v46_v37 = vld [vmem:[%s363_s1 + $0xe0] sm:$0xff] }
   0xa   :  { %187 = vmatprep.subr.bf16.mxu0 %v186_v14  ;;  %212 = vmatprep.subr.bf16.mxu1 %v186_v14  ;;  %v47_v38 = vld [vmem:[%s363_s1 + $0xe8] sm:$0xff]  ;;  %v200_v39 = vpack.c.bf16 %v29_v36, %v28_v35  ;;  %v30_v41 = vld [vmem:[%s363_s1 + $0x60] sm:$0xff]  ;;  %v48_v43 = vld [vmem:[%s363_s1 + $0xf0] sm:$0xff] }
   0xb   :  { %v202_v40 = vpack.c.bf16 %v47_v38, %v46_v37  ;;  %v31_v42 = vld [vmem:[%s363_s1 + $0x68] sm:$0xff]  ;;  %v49_v44 = vld [vmem:[%s363_s1 + $0xf8] sm:$0xff]  ;;  %v32_v47 = vld [vmem:[%s363_s1 + $0x70] sm:$0xff] }
   0xc   :  { %v204_v45 = vpack.c.bf16 %v31_v42, %v30_v41  ;;  %v206_v46 = vpack.c.bf16 %v49_v44, %v48_v43  ;;  %v33_v48 = vld [vmem:[%s363_s1 + $0x78] sm:$0xff]  ;;  %v14_v50 = vld [vmem:[%s364_s0] sm:$0xff]  ;;  %v16_v51 = vld [vmem:[%s364_s0 + $0x10] sm:$0xff] }
   0xd   :  { %189 = vmatpush3.bf16.msra.mxu0 %v188_v19  ;;  %220 = vmatpush3.bf16.msra.mxu1 %v188_v19  ;;  %v208_v49 = vpack.c.bf16 %v33_v48, %v32_v47  ;;  %v139_v54 = vld [vmem:[%s365_s2] ss:$0 sm:$0xff] }
   0xe   :  { %191 = vmatprep.subr.bf16.mxu0 %v190_v20  ;;  %213 = vmatprep.subr.bf16.mxu1 %v190_v20 }
  0x11   :  { %193 = vmatpush3.bf16.msra.mxu0 %v192_v27  ;;  %221 = vmatpush3.bf16.msra.mxu1 %v192_v27 }
  0x12   :  { %195 = vmatprep.subr.bf16.mxu0 %v194_v28  ;;  %214 = vmatprep.subr.bf16.mxu1 %v194_v28 }
  0x15   :  { %197 = vmatpush3.bf16.msra.mxu0 %v196_v33  ;;  %222 = vmatpush3.bf16.msra.mxu1 %v196_v33 }
  0x16   :  { %199 = vmatprep.subr.bf16.mxu0 %v198_v34  ;;  %215 = vmatprep.subr.bf16.mxu1 %v198_v34 }
  0x19   :  { %201 = vmatpush3.bf16.msra.mxu0 %v200_v39  ;;  %223 = vmatpush3.bf16.msra.mxu1 %v200_v39 }
  0x1a   :  { %203 = vmatprep.subr.bf16.mxu0 %v202_v40  ;;  %216 = vmatprep.subr.bf16.mxu1 %v202_v40 }
  0x1d   :  { %205 = vmatpush3.bf16.msra.mxu0 %v204_v45  ;;  %224 = vmatpush3.bf16.msra.mxu1 %v204_v45 }
  0x1e   :  { %207 = vmatprep.subr.bf16.mxu0 %v206_v46  ;;  %217 = vmatprep.subr.bf16.mxu1 %v206_v46 }
  0x21   :  { %209 = vmatpush3.bf16.msra.mxu0 %v208_v49  ;;  %225 = vmatpush3.bf16.msra.mxu1 %v208_v49 }
  0x24   :  { %122 = vmatmul.mubr.f32.vlgmr.msra.gmra.mrb[0].mxu0 %v14_v50  ;;  %127 = vmatmul.mubr.f32.vlgmr.msra.gmra.mrb[0].mxu1 %v16_v51 }
  0xf7   :  { %v172_v52 = vpop.f32.mrb[0].mxu0  ;;  %v175_v53 = vpop.f32.mrb[0].mxu1 }
  0xf8   :  { %v173_v55 = vpop.f32.mrb[1].mxu0  ;;  %v176_v56 = vpop.f32.mrb[1].mxu1 }
  0xf9   :  { %v174_v57 = vadd.f32 %v173_v55, %v172_v52  ;;  %v177_v58 = vadd.f32 %v176_v56, %v175_v53 }
  0xfb   :  { %v124_v59 = vadd.f32 %v174_v57, %v139_v54  ;;  %v129_v60 = vadd.f32 %v177_v58, %v139_v54 }
  0xfd   :  { %133 = vst.msk [vmem:[%s366_s3] sm:$0xff] %vm132_vm0, %v124_v59  ;;  %134 = vst.msk [vmem:[%s366_s3 + $0x8] sm:$0xff] %vm132_vm0, %v129_v60 }

// kernel: clip_forward.69
= control target key start
LH: loop header
LB: loop body
LE: loop exit
PB: predicated region body
PF: predicated region fallthrough
CT: control target
= control target key end

     0   :  { %vm18_vm0 = vcmask 254976   ;;  %v131_v6 = vmov 0.0   ;;  %vm132_vm1 = vmmov 0   ;;  %vm30_vm2 = vcmask 261120   ;;  %s165_s2 = inlined_call_operand.vmem [shape: f32[2,32], index: 2, kind: input, shape index: {}]   ;;  %s166_s1 = inlined_call_operand.vmem [shape: f32[2,32], index: 1, kind: input, shape index: {}]   ;;  %s167_s0 = inlined_call_operand.<no memory space> [shape: f32[1], index: 0, kind: input, shape index: {}]   ;;  %s168_s3 = inlined_call_operand.vmem [shape: f32[2,2], index: 3, kind: output, shape index: {}]  }
   0x1   :  { %v16_v0 = vld [vmem:[%s165_s2] sm:$0x3]  ;;  %120 = vmatprep.subr.mxu0 %v131_v6  ;;  %122 = vmatprep.mubr.msk.f32.mxu0 %vm132_vm1, %v131_v6  ;;  %v108_v13 = vstv %s167_s0  ;;  %vm110_vm3 = vcmask 9216  }
   0x2   :  { %v15_v1 = vld [vmem:[%s166_s1] sm:$0x3]  ;;  %v24_v2 = vmul.f32 %v16_v0, %v16_v0 }
   0x3   :  { %v17_v3 = vmul.f32 %v15_v1, %v15_v1 }
   0x4   :  { %v25_v4 = vsel %vm18_vm0, %v24_v2, 0.0 }
   0x5   :  { %26 = vadd.xlane.f32.xlu0 %v25_v4  ;;  %v19_v5 = vsel %vm18_vm0, %v17_v3, 0.0 }
   0x9   :  { %20 = vadd.xlane.f32.xlu0 %v19_v5 }
  0x92   :  { %v27_v7 = vpop.xlane.xlu0 %26 }
  0x93   :  { %127 = vrsqrt.f32 %v27_v7 }
  0x96   :  { %v21_v8 = vpop.xlane.xlu0 %20 }
  0x97   :  { %129 = vrsqrt.f32 %v21_v8 }
  0x9d   :  { %v128_v9 = vpop.eup %127 }
  0x9e   :  { %v29_v10 = vmul.f32 %v128_v9, %v16_v0 }
  0xa0   :  { %121 = vmatpush3.xpose.msk.msra.mxu0 %vm30_vm2, %v29_v10 }
  0xa1   :  { %v130_v11 = vpop.eup %129 }
  0xa2   :  { %v23_v12 = vmul.f32 %v130_v11, %v15_v1 }
  0xa4   :  { %123 = vmatmul.mubr.msk.f32.vlgmr.msra.gmra.mrb[0].mxu0 %vm30_vm2, %v23_v12 }
 0x177   :  { %v103_v14 = vpop.f32.mrb[0].mxu0 }
 0x178   :  { %v109_v15 = vmul.f32 %v108_v13, %v103_v14  ;;  %v124_v16 = vpop.f32.mrb[1].mxu0 }
 0x17a   :  { %111 = vst.msk [vmem:[%s168_s3] sm:$0x3] %vm110_vm3, %v109_v15 }

</bundles_post_ra>
